<compile_context>
chip_gen: v7x
topology: tpu7x:2x2x1
jax: 0.10.0
libtpu: 0.0.40
codegen_flags: <defaults>
</compile_context>

<pallas_src>
import jax
import jax.numpy as jnp
from jax import lax
from jax.experimental import pallas as pl
from jax.experimental.pallas import tpu as pltpu

# ---- model hyperparameters (small, TPU-tile-friendly, per the module) ----
VOCAB_SIZE = 256                         # multiple of 128 -> lane-dense output
EMBEDDING_DIM = 16
CONTEXT_SIZE = 8
IN_DIM = CONTEXT_SIZE * EMBEDDING_DIM    # 128
HIDDEN = 128                             # fixed by the module (Linear(_, 128))
B_TILE = 128                             # batch rows per grid step (multiple of 8)


def ngram_kernel(ids_ref, emb_ref, w1_ref, b1_ref, w2_ref, b2_ref, o_ref):
    """ids: (B_TILE, CTX) int32 -> log_probs: (B_TILE, VOCAB). All operands in VMEM."""
    ids = ids_ref[...]                                        # (BT, CTX) int32
    emb = emb_ref[...]                                        # (VOCAB, EMB) bf16
    bt = ids.shape[0]

    # One iota over the vocab lanes, hoisted out of the loop.
    vocab_iota = lax.broadcasted_iota(jnp.int32, (bt, VOCAB_SIZE), 1)

    # Embedding gather + flatten + linear1, fused:
    #   x = concat_c E[ids[:, c]]  ;  x @ W1 = sum_c (onehot_c @ E) @ W1[c*16:(c+1)*16]
    # The one-hot matmul reproduces the gather exactly (one nonzero 1.0 per row).
    hsum = None
    for c in range(CONTEXT_SIZE):
        eq = ids[:, c:c + 1] == vocab_iota                    # (BT, VOCAB) bool
        onehot = jnp.where(eq, 1.0, 0.0).astype(jnp.bfloat16)
        xc = jnp.dot(onehot, emb,                              # (BT, EMB) f32, exact gather
                     preferred_element_type=jnp.float32)
        part = jnp.dot(xc.astype(jnp.bfloat16),
                       w1_ref[c * EMBEDDING_DIM:(c + 1) * EMBEDDING_DIM, :],
                       preferred_element_type=jnp.float32)     # (BT, HIDDEN) f32
        hsum = part if hsum is None else hsum + part

    # linear1 bias + ReLU (f32 on the VPU)
    h = jnp.maximum(hsum + b1_ref[...], 0.0)                   # (BT, HIDDEN) f32

    # linear2 (bf16 operands, f32 accumulation)
    logits = jnp.dot(h.astype(jnp.bfloat16), w2_ref[...],
                     preferred_element_type=jnp.float32) + b2_ref[...]

    # numerically stable log_softmax over the vocab (lane) axis
    m = jnp.max(logits, axis=-1, keepdims=True)
    shifted = logits - m
    lse = jnp.log(jnp.sum(jnp.exp(shifted), axis=-1, keepdims=True))
    o_ref[...] = shifted - lse                                 # (BT, VOCAB) f32


@jax.jit
def ngram_forward(ids, emb_bf16, w1_bf16, b1, w2_bf16, b2):
    """ids: (B, CONTEXT_SIZE) int32 token ids -> (B, VOCAB_SIZE) f32 log-probs.

    Row-wise this is exactly the module's forward; batching B contexts per call
    is the main performance lever (the module's single-context case is B == 1).
    """
    B = ids.shape[0]
    nb = pl.cdiv(B, B_TILE)
    b_pad = nb * B_TILE
    if b_pad != B:
        ids = jnp.pad(ids, ((0, b_pad - B), (0, 0)))           # pad rows use token 0

    inv = lambda i: (0, 0)                                     # grid-invariant operands
    out = pl.pallas_call(
        ngram_kernel,
        out_shape=jax.ShapeDtypeStruct((b_pad, VOCAB_SIZE), jnp.float32),
        grid=(nb,),
        in_specs=[
            pl.BlockSpec((B_TILE, CONTEXT_SIZE), lambda i: (i, 0)),   # token ids
            pl.BlockSpec((VOCAB_SIZE, EMBEDDING_DIM), inv),           # emb table (bf16)
            pl.BlockSpec((IN_DIM, HIDDEN), inv),                      # w1 (bf16)
            pl.BlockSpec((1, HIDDEN), inv),                           # b1 (f32)
            pl.BlockSpec((HIDDEN, VOCAB_SIZE), inv),                  # w2 (bf16)
            pl.BlockSpec((1, VOCAB_SIZE), inv),                       # b2 (f32)
        ],
        out_specs=pl.BlockSpec((B_TILE, VOCAB_SIZE), lambda i: (i, 0)),
        compiler_params=pltpu.CompilerParams(
            dimension_semantics=("parallel",)),                # shard batch over TCs (v7x)
    )(ids, emb_bf16, w1_bf16, b1, w2_bf16, b2)
    return out[:B]


def _reference_forward(ids, emb_bf16, w1_bf16, b1, w2_bf16, b2):
    """Pure-JAX reference (same bf16-rounded weights, f32 math, mirrored h cast)."""
    emb = emb_bf16.astype(jnp.float32)
    x = jnp.take(emb, ids.reshape(-1), axis=0).reshape(ids.shape[0], IN_DIM)
    h = jnp.maximum(x @ w1_bf16.astype(jnp.float32) + b1, 0.0)
    h = h.astype(jnp.bfloat16).astype(jnp.float32)             # mirror kernel's bf16 activation
    logits = h @ w2_bf16.astype(jnp.float32) + b2
    return jax.nn.log_softmax(logits, axis=-1)


if __name__ == "__main__":
    key = jax.random.PRNGKey(0)
    k_emb, k_w1, k_b1, k_w2, k_b2, k_in = jax.random.split(key, 6)

    # deterministic parameter init (shapes per nn.Embedding / nn.Linear in __init__)
    emb = jax.random.normal(k_emb, (VOCAB_SIZE, EMBEDDING_DIM), jnp.float32)
    w1 = jax.random.normal(k_w1, (IN_DIM, HIDDEN), jnp.float32) * 0.05
    b1 = jax.random.normal(k_b1, (1, HIDDEN), jnp.float32) * 0.05
    w2 = jax.random.normal(k_w2, (HIDDEN, VOCAB_SIZE), jnp.float32) * 0.05
    b2 = jax.random.normal(k_b2, (1, VOCAB_SIZE), jnp.float32) * 0.05

    # bf16 weight storage (f32 accumulation happens inside the kernel)
    emb_bf16 = emb.astype(jnp.bfloat16)
    w1_bf16 = w1.astype(jnp.bfloat16)
    w2_bf16 = w2.astype(jnp.bfloat16)

    # a batch of contexts, each CONTEXT_SIZE token ids
    B = 1024
    ids = jax.random.randint(k_in, (B, CONTEXT_SIZE), 0, VOCAB_SIZE, jnp.int32)

    log_probs = ngram_forward(ids, emb_bf16, w1_bf16, b1, w2_bf16, b2)
    log_probs = jax.block_until_ready(log_probs)

    ref = _reference_forward(ids, emb_bf16, w1_bf16, b1, w2_bf16, b2)
    assert log_probs.shape == (B, VOCAB_SIZE)
    max_err = float(jnp.max(jnp.abs(log_probs - ref)))
    assert jnp.allclose(log_probs, ref, atol=2e-3, rtol=2e-3), max_err

    print("KERNEL_OK")
</pallas_src>

<mosaic_0001>
module attributes {stable_mosaic.version = 11 : i64} {
  func.func @ngram_kernel(%arg0: i32, %arg1: memref<128x8xi32, #tpu.memory_space<vmem>>, %arg2: memref<256x16xbf16, #tpu.memory_space<vmem>>, %arg3: memref<128x128xbf16, #tpu.memory_space<vmem>>, %arg4: memref<1x128xf32, #tpu.memory_space<vmem>>, %arg5: memref<128x256xbf16, #tpu.memory_space<vmem>>, %arg6: memref<1x256xf32, #tpu.memory_space<vmem>>, %arg7: memref<128x256xf32, #tpu.memory_space<vmem>>) attributes {dimension_semantics = [#tpu.dimension_semantics<parallel>], iteration_bounds = array<i64: 8>, scalar_prefetch = 0 : i64, scratch_operands = 0 : i64, tpu.core_type = #tpu.core_type<tc>, window_params = [{transform_indices = @transform_0, window_bounds = array<i64: 128, 8>}, {pipeline_mode = #tpu.pipeline_mode<synchronous>, transform_indices = @transform_1, window_bounds = array<i64: 256, 16>}, {pipeline_mode = #tpu.pipeline_mode<synchronous>, transform_indices = @transform_2, window_bounds = array<i64: 128, 128>}, {pipeline_mode = #tpu.pipeline_mode<synchronous>, transform_indices = @transform_3, window_bounds = array<i64: 1, 128>}, {pipeline_mode = #tpu.pipeline_mode<synchronous>, transform_indices = @transform_4, window_bounds = array<i64: 128, 256>}, {pipeline_mode = #tpu.pipeline_mode<synchronous>, transform_indices = @transform_5, window_bounds = array<i64: 1, 256>}, {transform_indices = @transform_6, window_bounds = array<i64: 128, 256>}]} {
    %c0 = arith.constant 0 : index
    %c0_0 = arith.constant 0 : index
    %0 = vector.load %arg1[%c0, %c0_0] : memref<128x8xi32, #tpu.memory_space<vmem>>, vector<128x8xi32>
    %c0_1 = arith.constant 0 : index
    %c0_2 = arith.constant 0 : index
    %1 = vector.load %arg2[%c0_1, %c0_2] : memref<256x16xbf16, #tpu.memory_space<vmem>>, vector<256x16xbf16>
    %2 = tpu.iota {dimensions = array<i32: 1>} : vector<128x256xi32>
    %3 = vector.extract_strided_slice %0 {offsets = [0, 0], sizes = [128, 1], strides = [1, 1]} : vector<128x8xi32> to vector<128x1xi32>
    %4 = vector.broadcast %3 : vector<128x1xi32> to vector<128x256xi32>
    %5 = arith.cmpi eq, %4, %2 : vector<128x256xi32>
    %cst = arith.constant 1.000000e+00 : f32
    %cst_3 = arith.constant 0.000000e+00 : f32
    %6 = vector.broadcast %cst : f32 to vector<128x256xf32>
    %7 = vector.broadcast %cst_3 : f32 to vector<128x256xf32>
    %8 = arith.select %5, %6, %7 : vector<128x256xi1>, vector<128x256xf32>
    %9 = arith.truncf %8 : vector<128x256xf32> to vector<128x256xbf16>
    %cst_4 = arith.constant dense<0.000000e+00> : vector<128x16xf32>
    %10 = tpu.matmul %9, %1, %cst_4 {dimension_numbers = #tpu.dot_dimension_numbers<[1], [0], [0], [1], [0, 0, 1, 1], [], []>} : vector<128x256xbf16>, vector<256x16xbf16>, vector<128x16xf32> -> vector<128x16xf32>
    %11 = arith.truncf %10 : vector<128x16xf32> to vector<128x16xbf16>
    %c0_5 = arith.constant 0 : index
    %c0_6 = arith.constant 0 : index
    %12 = vector.load %arg3[%c0_5, %c0_6] : memref<128x128xbf16, #tpu.memory_space<vmem>>, vector<16x128xbf16>
    %cst_7 = arith.constant dense<0.000000e+00> : vector<128x128xf32>
    %13 = tpu.matmul %11, %12, %cst_7 {dimension_numbers = #tpu.dot_dimension_numbers<[1], [0], [0], [1], [0, 0, 1, 1], [], []>} : vector<128x16xbf16>, vector<16x128xbf16>, vector<128x128xf32> -> vector<128x128xf32>
    %14 = vector.extract_strided_slice %0 {offsets = [0, 1], sizes = [128, 1], strides = [1, 1]} : vector<128x8xi32> to vector<128x1xi32>
    %15 = vector.broadcast %14 : vector<128x1xi32> to vector<128x256xi32>
    %16 = arith.cmpi eq, %15, %2 : vector<128x256xi32>
    %cst_8 = arith.constant 1.000000e+00 : f32
    %cst_9 = arith.constant 0.000000e+00 : f32
    %17 = vector.broadcast %cst_8 : f32 to vector<128x256xf32>
    %18 = vector.broadcast %cst_9 : f32 to vector<128x256xf32>
    %19 = arith.select %16, %17, %18 : vector<128x256xi1>, vector<128x256xf32>
    %20 = arith.truncf %19 : vector<128x256xf32> to vector<128x256xbf16>
    %cst_10 = arith.constant dense<0.000000e+00> : vector<128x16xf32>
    %21 = tpu.matmul %20, %1, %cst_10 {dimension_numbers = #tpu.dot_dimension_numbers<[1], [0], [0], [1], [0, 0, 1, 1], [], []>} : vector<128x256xbf16>, vector<256x16xbf16>, vector<128x16xf32> -> vector<128x16xf32>
    %22 = arith.truncf %21 : vector<128x16xf32> to vector<128x16xbf16>
    %c16 = arith.constant 16 : index
    %c0_11 = arith.constant 0 : index
    %23 = vector.load %arg3[%c16, %c0_11] : memref<128x128xbf16, #tpu.memory_space<vmem>>, vector<16x128xbf16>
    %cst_12 = arith.constant dense<0.000000e+00> : vector<128x128xf32>
    %24 = tpu.matmul %22, %23, %cst_12 {dimension_numbers = #tpu.dot_dimension_numbers<[1], [0], [0], [1], [0, 0, 1, 1], [], []>} : vector<128x16xbf16>, vector<16x128xbf16>, vector<128x128xf32> -> vector<128x128xf32>
    %25 = arith.addf %13, %24 : vector<128x128xf32>
    %26 = vector.extract_strided_slice %0 {offsets = [0, 2], sizes = [128, 1], strides = [1, 1]} : vector<128x8xi32> to vector<128x1xi32>
    %27 = vector.broadcast %26 : vector<128x1xi32> to vector<128x256xi32>
    %28 = arith.cmpi eq, %27, %2 : vector<128x256xi32>
    %cst_13 = arith.constant 1.000000e+00 : f32
    %cst_14 = arith.constant 0.000000e+00 : f32
    %29 = vector.broadcast %cst_13 : f32 to vector<128x256xf32>
    %30 = vector.broadcast %cst_14 : f32 to vector<128x256xf32>
    %31 = arith.select %28, %29, %30 : vector<128x256xi1>, vector<128x256xf32>
    %32 = arith.truncf %31 : vector<128x256xf32> to vector<128x256xbf16>
    %cst_15 = arith.constant dense<0.000000e+00> : vector<128x16xf32>
    %33 = tpu.matmul %32, %1, %cst_15 {dimension_numbers = #tpu.dot_dimension_numbers<[1], [0], [0], [1], [0, 0, 1, 1], [], []>} : vector<128x256xbf16>, vector<256x16xbf16>, vector<128x16xf32> -> vector<128x16xf32>
    %34 = arith.truncf %33 : vector<128x16xf32> to vector<128x16xbf16>
    %c32 = arith.constant 32 : index
    %c0_16 = arith.constant 0 : index
    %35 = vector.load %arg3[%c32, %c0_16] : memref<128x128xbf16, #tpu.memory_space<vmem>>, vector<16x128xbf16>
    %cst_17 = arith.constant dense<0.000000e+00> : vector<128x128xf32>
    %36 = tpu.matmul %34, %35, %cst_17 {dimension_numbers = #tpu.dot_dimension_numbers<[1], [0], [0], [1], [0, 0, 1, 1], [], []>} : vector<128x16xbf16>, vector<16x128xbf16>, vector<128x128xf32> -> vector<128x128xf32>
    %37 = arith.addf %25, %36 : vector<128x128xf32>
    %38 = vector.extract_strided_slice %0 {offsets = [0, 3], sizes = [128, 1], strides = [1, 1]} : vector<128x8xi32> to vector<128x1xi32>
    %39 = vector.broadcast %38 : vector<128x1xi32> to vector<128x256xi32>
    %40 = arith.cmpi eq, %39, %2 : vector<128x256xi32>
    %cst_18 = arith.constant 1.000000e+00 : f32
    %cst_19 = arith.constant 0.000000e+00 : f32
    %41 = vector.broadcast %cst_18 : f32 to vector<128x256xf32>
    %42 = vector.broadcast %cst_19 : f32 to vector<128x256xf32>
    %43 = arith.select %40, %41, %42 : vector<128x256xi1>, vector<128x256xf32>
    %44 = arith.truncf %43 : vector<128x256xf32> to vector<128x256xbf16>
    %cst_20 = arith.constant dense<0.000000e+00> : vector<128x16xf32>
    %45 = tpu.matmul %44, %1, %cst_20 {dimension_numbers = #tpu.dot_dimension_numbers<[1], [0], [0], [1], [0, 0, 1, 1], [], []>} : vector<128x256xbf16>, vector<256x16xbf16>, vector<128x16xf32> -> vector<128x16xf32>
    %46 = arith.truncf %45 : vector<128x16xf32> to vector<128x16xbf16>
    %c48 = arith.constant 48 : index
    %c0_21 = arith.constant 0 : index
    %47 = vector.load %arg3[%c48, %c0_21] : memref<128x128xbf16, #tpu.memory_space<vmem>>, vector<16x128xbf16>
    %cst_22 = arith.constant dense<0.000000e+00> : vector<128x128xf32>
    %48 = tpu.matmul %46, %47, %cst_22 {dimension_numbers = #tpu.dot_dimension_numbers<[1], [0], [0], [1], [0, 0, 1, 1], [], []>} : vector<128x16xbf16>, vector<16x128xbf16>, vector<128x128xf32> -> vector<128x128xf32>
    %49 = arith.addf %37, %48 : vector<128x128xf32>
    %50 = vector.extract_strided_slice %0 {offsets = [0, 4], sizes = [128, 1], strides = [1, 1]} : vector<128x8xi32> to vector<128x1xi32>
    %51 = vector.broadcast %50 : vector<128x1xi32> to vector<128x256xi32>
    %52 = arith.cmpi eq, %51, %2 : vector<128x256xi32>
    %cst_23 = arith.constant 1.000000e+00 : f32
    %cst_24 = arith.constant 0.000000e+00 : f32
    %53 = vector.broadcast %cst_23 : f32 to vector<128x256xf32>
    %54 = vector.broadcast %cst_24 : f32 to vector<128x256xf32>
    %55 = arith.select %52, %53, %54 : vector<128x256xi1>, vector<128x256xf32>
    %56 = arith.truncf %55 : vector<128x256xf32> to vector<128x256xbf16>
    %cst_25 = arith.constant dense<0.000000e+00> : vector<128x16xf32>
    %57 = tpu.matmul %56, %1, %cst_25 {dimension_numbers = #tpu.dot_dimension_numbers<[1], [0], [0], [1], [0, 0, 1, 1], [], []>} : vector<128x256xbf16>, vector<256x16xbf16>, vector<128x16xf32> -> vector<128x16xf32>
    %58 = arith.truncf %57 : vector<128x16xf32> to vector<128x16xbf16>
    %c64 = arith.constant 64 : index
    %c0_26 = arith.constant 0 : index
    %59 = vector.load %arg3[%c64, %c0_26] : memref<128x128xbf16, #tpu.memory_space<vmem>>, vector<16x128xbf16>
    %cst_27 = arith.constant dense<0.000000e+00> : vector<128x128xf32>
    %60 = tpu.matmul %58, %59, %cst_27 {dimension_numbers = #tpu.dot_dimension_numbers<[1], [0], [0], [1], [0, 0, 1, 1], [], []>} : vector<128x16xbf16>, vector<16x128xbf16>, vector<128x128xf32> -> vector<128x128xf32>
    %61 = arith.addf %49, %60 : vector<128x128xf32>
    %62 = vector.extract_strided_slice %0 {offsets = [0, 5], sizes = [128, 1], strides = [1, 1]} : vector<128x8xi32> to vector<128x1xi32>
    %63 = vector.broadcast %62 : vector<128x1xi32> to vector<128x256xi32>
    %64 = arith.cmpi eq, %63, %2 : vector<128x256xi32>
    %cst_28 = arith.constant 1.000000e+00 : f32
    %cst_29 = arith.constant 0.000000e+00 : f32
    %65 = vector.broadcast %cst_28 : f32 to vector<128x256xf32>
    %66 = vector.broadcast %cst_29 : f32 to vector<128x256xf32>
    %67 = arith.select %64, %65, %66 : vector<128x256xi1>, vector<128x256xf32>
    %68 = arith.truncf %67 : vector<128x256xf32> to vector<128x256xbf16>
    %cst_30 = arith.constant dense<0.000000e+00> : vector<128x16xf32>
    %69 = tpu.matmul %68, %1, %cst_30 {dimension_numbers = #tpu.dot_dimension_numbers<[1], [0], [0], [1], [0, 0, 1, 1], [], []>} : vector<128x256xbf16>, vector<256x16xbf16>, vector<128x16xf32> -> vector<128x16xf32>
    %70 = arith.truncf %69 : vector<128x16xf32> to vector<128x16xbf16>
    %c80 = arith.constant 80 : index
    %c0_31 = arith.constant 0 : index
    %71 = vector.load %arg3[%c80, %c0_31] : memref<128x128xbf16, #tpu.memory_space<vmem>>, vector<16x128xbf16>
    %cst_32 = arith.constant dense<0.000000e+00> : vector<128x128xf32>
    %72 = tpu.matmul %70, %71, %cst_32 {dimension_numbers = #tpu.dot_dimension_numbers<[1], [0], [0], [1], [0, 0, 1, 1], [], []>} : vector<128x16xbf16>, vector<16x128xbf16>, vector<128x128xf32> -> vector<128x128xf32>
    %73 = arith.addf %61, %72 : vector<128x128xf32>
    %74 = vector.extract_strided_slice %0 {offsets = [0, 6], sizes = [128, 1], strides = [1, 1]} : vector<128x8xi32> to vector<128x1xi32>
    %75 = vector.broadcast %74 : vector<128x1xi32> to vector<128x256xi32>
    %76 = arith.cmpi eq, %75, %2 : vector<128x256xi32>
    %cst_33 = arith.constant 1.000000e+00 : f32
    %cst_34 = arith.constant 0.000000e+00 : f32
    %77 = vector.broadcast %cst_33 : f32 to vector<128x256xf32>
    %78 = vector.broadcast %cst_34 : f32 to vector<128x256xf32>
    %79 = arith.select %76, %77, %78 : vector<128x256xi1>, vector<128x256xf32>
    %80 = arith.truncf %79 : vector<128x256xf32> to vector<128x256xbf16>
    %cst_35 = arith.constant dense<0.000000e+00> : vector<128x16xf32>
    %81 = tpu.matmul %80, %1, %cst_35 {dimension_numbers = #tpu.dot_dimension_numbers<[1], [0], [0], [1], [0, 0, 1, 1], [], []>} : vector<128x256xbf16>, vector<256x16xbf16>, vector<128x16xf32> -> vector<128x16xf32>
    %82 = arith.truncf %81 : vector<128x16xf32> to vector<128x16xbf16>
    %c96 = arith.constant 96 : index
    %c0_36 = arith.constant 0 : index
    %83 = vector.load %arg3[%c96, %c0_36] : memref<128x128xbf16, #tpu.memory_space<vmem>>, vector<16x128xbf16>
    %cst_37 = arith.constant dense<0.000000e+00> : vector<128x128xf32>
    %84 = tpu.matmul %82, %83, %cst_37 {dimension_numbers = #tpu.dot_dimension_numbers<[1], [0], [0], [1], [0, 0, 1, 1], [], []>} : vector<128x16xbf16>, vector<16x128xbf16>, vector<128x128xf32> -> vector<128x128xf32>
    %85 = arith.addf %73, %84 : vector<128x128xf32>
    %86 = vector.extract_strided_slice %0 {offsets = [0, 7], sizes = [128, 1], strides = [1, 1]} : vector<128x8xi32> to vector<128x1xi32>
    %87 = vector.broadcast %86 : vector<128x1xi32> to vector<128x256xi32>
    %88 = arith.cmpi eq, %87, %2 : vector<128x256xi32>
    %cst_38 = arith.constant 1.000000e+00 : f32
    %cst_39 = arith.constant 0.000000e+00 : f32
    %89 = vector.broadcast %cst_38 : f32 to vector<128x256xf32>
    %90 = vector.broadcast %cst_39 : f32 to vector<128x256xf32>
    %91 = arith.select %88, %89, %90 : vector<128x256xi1>, vector<128x256xf32>
    %92 = arith.truncf %91 : vector<128x256xf32> to vector<128x256xbf16>
    %cst_40 = arith.constant dense<0.000000e+00> : vector<128x16xf32>
    %93 = tpu.matmul %92, %1, %cst_40 {dimension_numbers = #tpu.dot_dimension_numbers<[1], [0], [0], [1], [0, 0, 1, 1], [], []>} : vector<128x256xbf16>, vector<256x16xbf16>, vector<128x16xf32> -> vector<128x16xf32>
    %94 = arith.truncf %93 : vector<128x16xf32> to vector<128x16xbf16>
    %c112 = arith.constant 112 : index
    %c0_41 = arith.constant 0 : index
    %95 = vector.load %arg3[%c112, %c0_41] : memref<128x128xbf16, #tpu.memory_space<vmem>>, vector<16x128xbf16>
    %cst_42 = arith.constant dense<0.000000e+00> : vector<128x128xf32>
    %96 = tpu.matmul %94, %95, %cst_42 {dimension_numbers = #tpu.dot_dimension_numbers<[1], [0], [0], [1], [0, 0, 1, 1], [], []>} : vector<128x16xbf16>, vector<16x128xbf16>, vector<128x128xf32> -> vector<128x128xf32>
    %97 = arith.addf %85, %96 : vector<128x128xf32>
    %c0_43 = arith.constant 0 : index
    %c0_44 = arith.constant 0 : index
    %98 = vector.load %arg4[%c0_43, %c0_44] : memref<1x128xf32, #tpu.memory_space<vmem>>, vector<1x128xf32>
    %99 = vector.broadcast %98 : vector<1x128xf32> to vector<128x128xf32>
    %100 = arith.addf %97, %99 : vector<128x128xf32>
    %cst_45 = arith.constant 0.000000e+00 : f32
    %101 = vector.broadcast %cst_45 : f32 to vector<128x128xf32>
    %102 = arith.maximumf %100, %101 : vector<128x128xf32>
    %103 = arith.truncf %102 : vector<128x128xf32> to vector<128x128xbf16>
    %c0_46 = arith.constant 0 : index
    %c0_47 = arith.constant 0 : index
    %104 = vector.load %arg5[%c0_46, %c0_47] : memref<128x256xbf16, #tpu.memory_space<vmem>>, vector<128x256xbf16>
    %cst_48 = arith.constant dense<0.000000e+00> : vector<128x256xf32>
    %105 = tpu.matmul %103, %104, %cst_48 {dimension_numbers = #tpu.dot_dimension_numbers<[1], [0], [0], [1], [0, 0, 1, 1], [], []>} : vector<128x128xbf16>, vector<128x256xbf16>, vector<128x256xf32> -> vector<128x256xf32>
    %c0_49 = arith.constant 0 : index
    %c0_50 = arith.constant 0 : index
    %106 = vector.load %arg6[%c0_49, %c0_50] : memref<1x256xf32, #tpu.memory_space<vmem>>, vector<1x256xf32>
    %107 = vector.broadcast %106 : vector<1x256xf32> to vector<128x256xf32>
    %108 = arith.addf %105, %107 : vector<128x256xf32>
    %cst_51 = arith.constant dense<0xFF800000> : vector<128xf32>
    %109 = vector.multi_reduction <maximumf>, %108, %cst_51 [1] : vector<128x256xf32> to vector<128xf32>
    %110 = vector.shape_cast %109 : vector<128xf32> to vector<128x1xf32>
    %111 = vector.broadcast %110 : vector<128x1xf32> to vector<128x256xf32>
    %112 = arith.subf %108, %111 : vector<128x256xf32>
    %113 = math.exp %112 : vector<128x256xf32>
    %cst_52 = arith.constant dense<0.000000e+00> : vector<128xf32>
    %114 = vector.multi_reduction <add>, %113, %cst_52 [1] : vector<128x256xf32> to vector<128xf32>
    %115 = vector.shape_cast %114 : vector<128xf32> to vector<128x1xf32>
    %116 = math.log %115 : vector<128x1xf32>
    %117 = vector.broadcast %116 : vector<128x1xf32> to vector<128x256xf32>
    %118 = arith.subf %112, %117 : vector<128x256xf32>
    %c0_53 = arith.constant 0 : index
    %c0_54 = arith.constant 0 : index
    %119 = vector.load %arg7[%c0_53, %c0_54] : memref<128x256xf32, #tpu.memory_space<vmem>>, vector<128x256xf32>
    tpu.vector_store %arg7[%c0_53, %c0_54], %118 {strides = array<i32>} : memref<128x256xf32, #tpu.memory_space<vmem>>, vector<128x256xf32>,
    return
  }
  func.func @transform_0(%arg0: i32) -> (i32, i32) {
    %c0_i32 = arith.constant 0 : i32
    %c0_i32_0 = arith.constant 0 : i32
    return %arg0, %c0_i32 : i32, i32
  }
  func.func @transform_1(%arg0: i32) -> (i32, i32) {
    %c0_i32 = arith.constant 0 : i32
    %c0_i32_0 = arith.constant 0 : i32
    %c0_i32_1 = arith.constant 0 : i32
    return %c0_i32, %c0_i32_0 : i32, i32
  }
  func.func @transform_2(%arg0: i32) -> (i32, i32) {
    %c0_i32 = arith.constant 0 : i32
    %c0_i32_0 = arith.constant 0 : i32
    %c0_i32_1 = arith.constant 0 : i32
    return %c0_i32, %c0_i32_0 : i32, i32
  }
  func.func @transform_3(%arg0: i32) -> (i32, i32) {
    %c0_i32 = arith.constant 0 : i32
    %c0_i32_0 = arith.constant 0 : i32
    %c0_i32_1 = arith.constant 0 : i32
    return %c0_i32, %c0_i32_0 : i32, i32
  }
  func.func @transform_4(%arg0: i32) -> (i32, i32) {
    %c0_i32 = arith.constant 0 : i32
    %c0_i32_0 = arith.constant 0 : i32
    %c0_i32_1 = arith.constant 0 : i32
    return %c0_i32, %c0_i32_0 : i32, i32
  }
  func.func @transform_5(%arg0: i32) -> (i32, i32) {
    %c0_i32 = arith.constant 0 : i32
    %c0_i32_0 = arith.constant 0 : i32
    %c0_i32_1 = arith.constant 0 : i32
    return %c0_i32, %c0_i32_0 : i32, i32
  }
  func.func @transform_6(%arg0: i32) -> (i32, i32) {
    %c0_i32 = arith.constant 0 : i32
    %c0_i32_0 = arith.constant 0 : i32
    return %arg0, %c0_i32 : i32, i32
  }
}

</mosaic_0001>

<bundles_post_ra>
// kernel: ngram_forward.1
= control target key start
LH: loop header
LB: loop body
LE: loop exit
PB: predicated region body
PF: predicated region fallthrough
CT: control target
= control target key end

     0   :  { %11 = vsyncpa [#allocation3], 0  ;;  %s7736_s0 = inlined_call_operand.vmem [shape: s32[1024,8], index: 0, kind: input, shape index: {}]   ;;  %s7737_s1 = inlined_call_operand.vmem [shape: bf16[256,16], index: 1, kind: input, shape index: {}]   ;;  %s7738_s2 = inlined_call_operand.vmem [shape: bf16[128,128], index: 2, kind: input, shape index: {}]   ;;  %s7739_s3 = inlined_call_operand.vmem [shape: f32[1,128], index: 3, kind: input, shape index: {}]   ;;  %s7740_s4 = inlined_call_operand.vmem [shape: bf16[128,256], index: 4, kind: input, shape index: {}]   ;;  %s7741_s5 = inlined_call_operand.vmem [shape: f32[1,256], index: 5, kind: input, shape index: {}]   ;;  %s7742_s6 = inlined_call_operand.hbm [shape: f32[1024,256], index: 6, kind: output, shape index: {}]  }
   0x1   :  { %13 = vsyncpa [#allocation3 + $0x1], 0  ;;  %s5657_s21 = smov 0   ;;  %s5659_s22 = smov 0  }
   0x2   :  { %s5661_s23 = smov 0   ;;  %s5663_s24 = smov 0  }
   0x3 LB: > { %s5678_s25 = sadd.s32 4294967295, %s5608_s24   ;;  %s4027_s26 = sadd.s32 4294967294, %s5608_s24   ;;  %s5608_s24 = sphi %s5663_s24, %s7883_s24   ;;  %s5604_s23 = sphi %s5661_s23, %s7882_s23   ;;  %s5600_s22 = sphi %s5659_s22, %s7881_s22   ;;  %s5596_s21 = sphi %s5657_s21, %s7880_s21  }
   0x4   : > { %s5682_s27 = sadd.s32 1, %s5608_s24   ;;  %s157_s28 = sadd.s32 1, %s5604_s23 }
   0x5   : > { %s154_s29 = ssub.s32 %s5608_s24, %s5682_s27  ;;  %p167_p0 = scmp.ne.s32.totalorder %s5604_s23, %s5600_s22 }
   0x6   : > { %p155_p1 = scmp.eq.s32.totalorder %s154_s29, 0  ;;  %p168_p2 = scmp.eq.s32.totalorder %s5678_s25, 7 }
   0x7   : > { %p173_p3 = scmp.ne.s32.totalorder %s5600_s22, %s5596_s21  ;;  %p174_p4 = scmp.eq.s32.totalorder %s4027_s26, 7 }
   0x8   : > { %s5693_s30 = scalar_select %p155_p1, %s5604_s23, %s157_s28  }
   0x9   : > { %p5695_p5 = por %p168_p2, %p167_p0  ;;  %p5699_p6 = por %p174_p4, %p173_p3 }
   0xa   : > { %p4030_p7 = scmp.ge.s32.totalorder %s5608_s24, 1  ;;  %p216_p8 = scmp.lt.s32.totalorder %s5608_s24, 9 }
   0xc   : > { %p217_p9 = pnand %p4030_p7, %p216_p8 }
   0xe   : > { %220 = sbr.rel (%p217_p9) target bundleno = 1781 (0x6f5), region = 44 }
  0x15   : > { %s4032_s9 = sshll.u32 %s5678_s25, 4  ;;  %v7745_v0 = vmov 0   ;;  %v5711_v1 = vld [vmem:[%s7737_s1 + $0x40] sm:$0xff]   ;;  %v5722_v3 = vld [vmem:[%s7737_s1 + $0x48] sm:$0xff]   ;;  %v5742_v5 = vld [vmem:[%s7737_s1 + $0x50] sm:$0xff]   ;;  %v5611_v24 = vmov 1   ;;  %v7744_v36 = vlaneseq }
  0x16   : > { %5310 = vset.pattern.permute.xlu1 %v7745_v0  ;;  %5309 = vset.pattern.permute.xlu0 %v7745_v0  ;;  %p247_p10 = scmp.lt.s32.totalorder %s4032_s9, 127  ;;  %v5716_v2 = vld [vmem:[%s7737_s1] sm:$0xff]   ;;  %v5731_v4 = vld [vmem:[%s7737_s1 + $0x8] sm:$0xff]   ;;  %v5762_v10 = vld [vmem:[%s7737_s1 + $0x10] sm:$0xff]   ;;  %v5612_v34 = vmov 2   ;;  %v5613_v35 = vmov 3  }
  0x17   : > { %5131 = vmatprep.subr.bf16.mxu1 %v5711_v1  ;;  %4403 = vmatprep.subr.bf16.mxu0 %v5711_v1  ;;  %v5778_v13 = vld [vmem:[%s7737_s1 + $0x58] sm:$0xff]   ;;  %v5791_v15 = vld [vmem:[%s7737_s1 + $0x60] sm:$0xff]   ;;  %v5813_v19 = vld [vmem:[%s7737_s1 + $0x68] sm:$0xff]   ;;  %v5939_v37 = vand.u32 127, %v7744_v36  ;;  %v5614_v43 = vmov 1.0|1.0  }
  0x18   : > { %s7885_s9 = smov (!%p247_p10, %s4032_s9), 127  ;;  %5139 = vmatpush3.bf16.msra.mxu1 %v5716_v2  ;;  %4404 = vmatpush3.bf16.msra.mxu0 %v5716_v2  ;;  %v5784_v14 = vld [vmem:[%s7737_s1 + $0x18] sm:$0xff]   ;;  %v5806_v18 = vld [vmem:[%s7737_s1 + $0x20] sm:$0xff]   ;;  %v5827_v22 = vld [vmem:[%s7737_s1 + $0x28] sm:$0xff]   ;;  %s243_s13 = sand.u32 1, %s5600_s22  }
  0x19   : > { %s4033_s16 = sshll.u32 %s7885_s9, 3  ;;  %5132 = vmatprep.subr.bf16.mxu1 %v5722_v3  ;;  %4405 = vmatprep.subr.bf16.mxu0 %v5722_v3  ;;  %v5833_v23 = vld [vmem:[%s7737_s1 + $0x70] sm:$0xff]   ;;  %v5854_v28 = vld [vmem:[%s7737_s1 + $0x78] sm:$0xff]   ;;  %v5943_v40 = vadd.s32 128, %v5939_v37  ;;  %s4031_s14 = sshll.u32 %s243_s13, 8 }
  0x1a   : > { %s5737_s26 = scalar_lea.vmem %s7736_s0, %s4033_s16  ;;  %v5847_v27 = vld [vmem:[%s7737_s1 + $0x30] sm:$0xff]   ;;  %v5869_v31 = vld [vmem:[%s7737_s1 + $0x38] sm:$0xff]   ;;  %s7620_s15 = scalar_lea.vmem [#allocation2], %s4031_s14 }
  0x1b   : > { %v5745_v6 = vld [vmem:[%s5737_s26 + $0x50] sm:$0xff]  ;;  %v5748_v7 = vld [vmem:[%s5737_s26 + $0x40] sm:$0xff]  ;;  %v5753_v8 = vld [vmem:[%s5737_s26 + $0x58] sm:$0xff]  ;;  %s4402_s16 = sshll.u32 %s5678_s25, 12  ;;  %s3965_s17 = sshll.u32 %s7620_s15, 4  ;;  %s7685_s17 = int_to_ptr.vmem [resolvable:$true] %s3965_s17 }
  0x1c   : > { %336 = vperm.xlu1 %5310, %v5745_v6   ;;  %330 = vperm.xlu0 %5309, %v5748_v7   ;;  %v5756_v9 = vld [vmem:[%s5737_s26 + $0x48] sm:$0xff]  ;;  %v5773_v12 = vld [vmem:[%s5737_s26 + $0x60] sm:$0xff]  ;;  %v5795_v16 = vld [vmem:[%s5737_s26 + $0x78] sm:$0xff]  ;;  %s7683_s20 = scalar_lea.hbm %s7742_s6, %s4402_s16  ;;  %s7695_s25 = scalar_lea.sflag [#allocation3], %s243_s13 }
  0x1d   : > { %5140 = vmatpush3.bf16.msra.mxu1 %v5731_v4  ;;  %4406 = vmatpush3.bf16.msra.mxu0 %v5731_v4  ;;  %v5768_v11 = vld [vmem:[%s5737_s26 + $0x68] sm:$0xff]  ;;  %v5800_v17 = vld [vmem:[%s5737_s26 + $0x70] sm:$0xff]  ;;  %v5822_v21 = vld [vmem:[%s5737_s26] sm:$0xff]  ;;  %s5546_s28 = scalar_lea.vmem %s7685_s17, 4096  ;;  %s5619_s29 = smov [#allocation2]  }
  0x1e   : > { %5133 = vmatprep.subr.bf16.mxu1 %v5742_v5  ;;  %4407 = vmatprep.subr.bf16.mxu0 %v5742_v5  ;;  %v5819_v20 = vld [vmem:[%s5737_s26 + $0x8] sm:$0xff]  ;;  %v5839_v25 = vld [vmem:[%s5737_s26 + $0x10] sm:$0xff]  ;;  %v5842_v26 = vld [vmem:[%s5737_s26 + $0x18] sm:$0xff]  ;;  %p5547_p11 = scmp.ne.s32.totalorder %s7685_s17, %s5546_s28  ;;  %s5550_s9 = sshll.u32 %s5619_s29, 4  ;;  %s5551_s9 = int_to_ptr.vmem [resolvable:$false] %s5550_s9 }
  0x1f   : > { %v5861_v29 = vld [vmem:[%s5737_s26 + $0x20] sm:$0xff]  ;;  %v5864_v30 = vld [vmem:[%s5737_s26 + $0x28] sm:$0xff]  ;;  %v5880_v32 = vld [vmem:[%s5737_s26 + $0x30] sm:$0xff]  ;;  %s5552_s10 = scalar_lea.vmem %s5551_s9, 8192  ;;  %p5553_p0 = scmp.lt.s32.totalorder %s7685_s17, %s5551_s9 }
  0x20   : > { %339 = vperm.xlu1 %5310, %v5753_v8   ;;  %333 = vperm.xlu0 %5309, %v5756_v9   ;;  %v5883_v33 = vld [vmem:[%s5737_s26 + $0x38] sm:$0xff]  ;;  %p5548_p12 = pnand %p5547_p11, %p5695_p5  ;;  %p5554_p1 = scmp.lt.s32.totalorder %s5552_s10, %s5546_s28 }
  0x21   : > { %5141 = vmatpush3.bf16.msra.mxu1 %v5762_v10  ;;  %4408 = vmatpush3.bf16.msra.mxu0 %v5762_v10 }
  0x22   : > { %5134 = vmatprep.subr.bf16.mxu1 %v5778_v13  ;;  %4409 = vmatprep.subr.bf16.mxu0 %v5778_v13  ;;  %p5549_p13 = pneg %p5548_p12  ;;  %p5555_p2 = por %p5554_p1, %p5553_p0 }
  0x24   : > { %345 = vperm.xlu1 %5310, %v5768_v11   ;;  %342 = vperm.xlu0 %5309, %v5773_v12   ;;  %p5556_p3 = pnand %p5555_p2, %p5549_p13 }
  0x25   : > { %5142 = vmatpush3.bf16.msra.mxu1 %v5784_v14  ;;  %4410 = vmatpush3.bf16.msra.mxu0 %v5784_v14 }
  0x26   : > { %5135 = vmatprep.subr.bf16.mxu1 %v5791_v15  ;;  %4411 = vmatprep.subr.bf16.mxu0 %v5791_v15 }
  0x28   : > { %351 = vperm.xlu1 %5310, %v5795_v16   ;;  %348 = vperm.xlu0 %5309, %v5800_v17  }
  0x29   : > { %5143 = vmatpush3.bf16.msra.mxu1 %v5806_v18  ;;  %4412 = vmatpush3.bf16.msra.mxu0 %v5806_v18 }
  0x2a   : > { %5136 = vmatprep.subr.bf16.mxu1 %v5813_v19  ;;  %4413 = vmatprep.subr.bf16.mxu0 %v5813_v19 }
  0x2c   : > { %5312 = vset.pattern.permute.xlu1 %v5611_v24  ;;  %5311 = vset.pattern.permute.xlu0 %v5611_v24 }
  0x2d   : > { %640 = vperm.xlu1 %5312, %v5819_v20   ;;  %637 = vperm.xlu0 %5311, %v5822_v21  }
  0x2e   : > { %5144 = vmatpush3.bf16.msra.mxu1 %v5827_v22  ;;  %4414 = vmatpush3.bf16.msra.mxu0 %v5827_v22 }
  0x2f   : > { %5137 = vmatprep.subr.bf16.mxu1 %v5833_v23  ;;  %4415 = vmatprep.subr.bf16.mxu0 %v5833_v23 }
  0x31   : > { %643 = vperm.xlu1 %5312, %v5839_v25   ;;  %646 = vperm.xlu0 %5311, %v5842_v26  }
  0x32   : > { %5145 = vmatpush3.bf16.msra.mxu1 %v5847_v27  ;;  %4416 = vmatpush3.bf16.msra.mxu0 %v5847_v27 }
  0x33   : > { %5138 = vmatprep.subr.bf16.mxu1 %v5854_v28  ;;  %4417 = vmatprep.subr.bf16.mxu0 %v5854_v28 }
  0x35   : > { %649 = vperm.xlu1 %5312, %v5861_v29   ;;  %652 = vperm.xlu0 %5311, %v5864_v30  }
  0x36   : > { %5146 = vmatpush3.bf16.msra.mxu1 %v5869_v31  ;;  %4418 = vmatpush3.bf16.msra.mxu0 %v5869_v31 }
  0x37   : > { %4467 = vmatprep.subr.bf16.mxu1 %v5711_v1 }
  0x39   : > { %655 = vperm.xlu1 %5312, %v5880_v32   ;;  %658 = vperm.xlu0 %5311, %v5883_v33  }
  0x3d   : > { %661 = vperm.xlu1 %5312, %v5748_v7   ;;  %664 = vperm.xlu0 %5311, %v5756_v9  }
  0x41   : > { %667 = vperm.xlu1 %5312, %v5745_v6   ;;  %670 = vperm.xlu0 %5311, %v5753_v8  }
  0x45   : > { %673 = vperm.xlu1 %5312, %v5773_v12   ;;  %676 = vperm.xlu0 %5311, %v5768_v11  }
  0x49   : > { %679 = vperm.xlu1 %5312, %v5800_v17   ;;  %682 = vperm.xlu0 %5311, %v5795_v16  }
  0x4d   : > { %5313 = vset.pattern.permute.xlu1 %v5612_v34  ;;  %5314 = vset.pattern.permute.xlu0 %v5612_v34 }
  0x4e   : > { %1127 = vperm.xlu1 %5313, %v5822_v21   ;;  %1130 = vperm.xlu0 %5314, %v5819_v20  }
  0x52   : > { %1133 = vperm.xlu1 %5313, %v5839_v25   ;;  %5315 = vset.pattern.permute.xlu0 %v7745_v0 }
  0x53   : > { %306 = vperm.xlu0 %5315, %v5822_v21  }
  0x56   : > { %1136 = vperm.xlu1 %5313, %v5842_v26  }
  0x57   : > { %5318 = vset.pattern.permute.xlu0 %v5612_v34 }
  0x58   : > { %1142 = vperm.xlu0 %5318, %v5864_v30  }
  0x5a   : > { %5316 = vset.pattern.permute.xlu1 %v7745_v0 }
  0x5b   : > { %309 = vperm.xlu1 %5316, %v5819_v20  }
  0x5c   : > { %1145 = vperm.xlu0 %5318, %v5880_v32  }
  0x5f   : > { %5317 = vset.pattern.permute.xlu1 %v5612_v34 }
  0x60   : > { %1139 = vperm.xlu1 %5317, %v5861_v29   ;;  %5321 = vset.pattern.permute.xlu0 %v7745_v0 }
  0x61   : > { %318 = vperm.xlu0 %5321, %v5861_v29  }
  0x64   : > { %5319 = vset.pattern.permute.xlu1 %v7745_v0 }
  0x65   : > { %312 = vperm.xlu1 %5319, %v5839_v25   ;;  %5324 = vset.pattern.permute.xlu0 %v5612_v34 }
  0x66   : > { %1154 = vperm.xlu0 %5324, %v5756_v9  }
  0x69   : > { %315 = vperm.xlu1 %5319, %v5842_v26  }
  0x6a   : > { %1157 = vperm.xlu0 %5324, %v5745_v6  }
  0x6d   : > { %5320 = vset.pattern.permute.xlu1 %v5612_v34 }
  0x6e   : > { %1148 = vperm.xlu1 %5320, %v5883_v33   ;;  %1163 = vperm.xlu0 %5324, %v5773_v12  }
  0x72   : > { %5322 = vset.pattern.permute.xlu1 %v7745_v0  ;;  %1169 = vperm.xlu0 %5324, %v5800_v17  }
  0x73   : > { %321 = vperm.xlu1 %5322, %v5864_v30  }
  0x76   : > { %5327 = vset.pattern.permute.xlu0 %v5613_v35 }
  0x77   : > { %5323 = vset.pattern.permute.xlu1 %v5612_v34  ;;  %1505 = vperm.xlu0 %5327, %v5822_v21  }
  0x78   : > { %1151 = vperm.xlu1 %5323, %v5748_v7  }
  0x7b   : > { %1514 = vperm.xlu0 %5327, %v5842_v26  }
  0x7c   : > { %5325 = vset.pattern.permute.xlu1 %v7745_v0 }
  0x7d   : > { %324 = vperm.xlu1 %5325, %v5880_v32  }
  0x7f   : > { %1520 = vperm.xlu0 %5327, %v5864_v30  }
  0x81   : > { %327 = vperm.xlu1 %5325, %v5883_v33  }
  0x83   : > { %1526 = vperm.xlu0 %5327, %v5883_v33  }
  0x85   : > { %5326 = vset.pattern.permute.xlu1 %v5612_v34 }
  0x86   : > { %1160 = vperm.xlu1 %5326, %v5753_v8  }
  0x87   : > { %1532 = vperm.xlu0 %5327, %v5756_v9  }
  0x8a   : > { %1166 = vperm.xlu1 %5326, %v5768_v11  }
  0x8b   : > { %1538 = vperm.xlu0 %5327, %v5753_v8  }
  0x8e   : > { %1172 = vperm.xlu1 %5326, %v5795_v16  }
  0x8f   : > { %1544 = vperm.xlu0 %5327, %v5768_v11  }
  0x92   : > { %5328 = vset.pattern.permute.xlu1 %v5613_v35 }
  0x93   : > { %1508 = vperm.xlu1 %5328, %v5819_v20   ;;  %1550 = vperm.xlu0 %5327, %v5795_v16  }
  0x97   : > { %1511 = vperm.xlu1 %5328, %v5839_v25  }
  0x9b   : > { %v337_v38 = vpop.permute.xlu1 %336  ;;  %v331_v39 = vpop.permute.xlu0 %330  ;;  %1517 = vperm.xlu1 %5328, %v5861_v29  }
  0x9c   : > { %vm374_vm0 = vcmp.eq.s32.totalorder %v337_v38, %v5943_v40  ;;  %vm370_vm3 = vcmp.eq.s32.totalorder %v331_v39, %v5943_v40  ;;  %vm369_vm5 = vcmp.eq.s32.totalorder %v331_v39, %v5939_v37  ;;  %vm373_vm9 = vcmp.eq.s32.totalorder %v337_v38, %v5939_v37 }
  0x9f   : > { %v340_v41 = vpop.permute.xlu1 %339  ;;  %v334_v42 = vpop.permute.xlu0 %333  ;;  %1523 = vperm.xlu1 %5328, %v5880_v32  }
  0xa0   : > { %vm376_vm1 = vcmp.eq.s32.totalorder %v340_v41, %v5943_v40  ;;  %vm371_vm2 = vcmp.eq.s32.totalorder %v334_v42, %v5939_v37  ;;  %vm372_vm4 = vcmp.eq.s32.totalorder %v334_v42, %v5943_v40  ;;  %vm375_vm10 = vcmp.eq.s32.totalorder %v340_v41, %v5939_v37 }
  0xa1   : > { %vm4066_vm6 = vmpackc.low %vm372_vm4, %vm370_vm3 }
  0xa2   : > { %4067 = vmatprep.mubr.msk.bf16.mxu1 %vm4066_vm6, %v5614_v43  ;;  %vm4068_vm7 = vmpackc.low %vm371_vm2, %vm369_vm5 }
  0xa3   : > { %v346_v44 = vpop.permute.xlu1 %345  ;;  %4069 = vmatmul.mubr.msk.bf16.vlgmr.msra.gmra.mrb[0].mxu1 %vm4068_vm7, %v5614_v43  ;;  %v343_v45 = vpop.permute.xlu0 %342  ;;  %vm4070_vm8 = vmpackc.low %vm376_vm1, %vm374_vm0  ;;  %1529 = vperm.xlu1 %5328, %v5748_v7  }
  0xa4   : > { %4468 = vmatpush3.bf16.msra.mxu1 %v5716_v2  ;;  %4071 = vmatprep.mubr.msk.bf16.mxu1 %vm4070_vm8, %v5614_v43  ;;  %vm380_vm11 = vcmp.eq.s32.totalorder %v346_v44, %v5943_v40  ;;  %vm378_vm12 = vcmp.eq.s32.totalorder %v343_v45, %v5943_v40  ;;  %vm4072_vm13 = vmpackc.low %vm375_vm10, %vm373_vm9  ;;  %vm379_vm15 = vcmp.eq.s32.totalorder %v346_v44, %v5939_v37 }
  0xa5   : > { %4469 = vmatprep.subr.bf16.mxu1 %v5722_v3  ;;  %vm4074_vm14 = vmpackc.low %vm380_vm11, %vm378_vm12  ;;  %vm377_vm0 = vcmp.eq.s32.totalorder %v343_v45, %v5939_v37 }
  0xa6   : > { %vm4076_vm3 = vmpackc.low %vm379_vm15, %vm377_vm0 }
  0xa7   : > { %v352_v46 = vpop.permute.xlu1 %351  ;;  %v349_v47 = vpop.permute.xlu0 %348  ;;  %1535 = vperm.xlu1 %5328, %v5745_v6  }
  0xa8   : > { %4470 = vmatpush3.bf16.msra.mxu1 %v5731_v4  ;;  %vm384_vm1 = vcmp.eq.s32.totalorder %v352_v46, %v5943_v40  ;;  %vm382_vm2 = vcmp.eq.s32.totalorder %v349_v47, %v5943_v40  ;;  %vm383_vm7 = vcmp.eq.s32.totalorder %v352_v46, %v5939_v37  ;;  %vm381_vm8 = vcmp.eq.s32.totalorder %v349_v47, %v5939_v37 }
  0xa9   : > { %4471 = vmatprep.subr.bf16.mxu1 %v5742_v5  ;;  %vm4078_vm4 = vmpackc.low %vm384_vm1, %vm382_vm2 }
  0xaa   : > { %vm4080_vm10 = vmpackc.low %vm383_vm7, %vm381_vm8 }
  0xab   : > { %4073 = vmatmul.mubr.msk.bf16.gmra.mrb[4].mxu1 %vm4072_vm13, %v5614_v43  ;;  %1541 = vperm.xlu1 %5328, %v5773_v12  }
  0xac   : > { %4472 = vmatpush3.bf16.msra.mxu1 %v5762_v10  ;;  %4075 = vmatprep.mubr.msk.bf16.mxu1 %vm4074_vm14, %v5614_v43  ;;  %v641_v48 = vpop.permute.xlu1 %640  ;;  %v638_v49 = vpop.permute.xlu0 %637 }
  0xad   : > { %4473 = vmatprep.subr.bf16.mxu1 %v5778_v13  ;;  %vm687_vm5 = vcmp.eq.s32.totalorder %v641_v48, %v5943_v40  ;;  %vm685_vm6 = vcmp.eq.s32.totalorder %v638_v49, %v5943_v40  ;;  %vm686_vm11 = vcmp.eq.s32.totalorder %v641_v48, %v5939_v37  ;;  %vm684_vm12 = vcmp.eq.s32.totalorder %v638_v49, %v5939_v37 }
  0xae   : > { %vm4082_vm9 = vmpackc.low %vm687_vm5, %vm685_vm6  ;;  %v5615_v49 = vmov 5  }
  0xaf   : > { %1547 = vperm.xlu1 %5328, %v5800_v17   ;;  %vm4084_vm13 = vmpackc.low %vm686_vm11, %vm684_vm12  ;;  %5330 = vset.pattern.permute.xlu0 %v5615_v49 }
  0xb0   : > { %4474 = vmatpush3.bf16.msra.mxu1 %v5784_v14  ;;  %v644_v50 = vpop.permute.xlu1 %643  ;;  %v647_v51 = vpop.permute.xlu0 %646  ;;  %2264 = vperm.xlu0 %5330, %v5819_v20  }
  0xb1   : > { %4475 = vmatprep.subr.bf16.mxu1 %v5791_v15  ;;  %vm689_vm14 = vcmp.eq.s32.totalorder %v644_v50, %v5943_v40  ;;  %vm691_vm15 = vcmp.eq.s32.totalorder %v647_v51, %v5943_v40  ;;  %vm688_vm1 = vcmp.eq.s32.totalorder %v644_v50, %v5939_v37  ;;  %vm690_vm2 = vcmp.eq.s32.totalorder %v647_v51, %v5939_v37 }
  0xb2   : > { %vm4086_vm0 = vmpackc.low %vm691_vm15, %vm689_vm14  ;;  %v5616_v51 = vmov 4  }
  0xb3   : > { %4077 = vmatmul.mubr.msk.bf16.gmra.mrb[8].mxu1 %vm4076_vm3, %v5614_v43  ;;  %vm4088_vm5 = vmpackc.low %vm690_vm2, %vm688_vm1  ;;  %5329 = vset.pattern.permute.xlu1 %v5615_v49 }
  0xb4   : > { %4476 = vmatpush3.bf16.msra.mxu1 %v5806_v18  ;;  %4079 = vmatprep.mubr.msk.bf16.mxu1 %vm4078_vm4, %v5614_v43  ;;  %v650_v52 = vpop.permute.xlu1 %649  ;;  %v653_v53 = vpop.permute.xlu0 %652 }
  0xb5   : > { %4477 = vmatprep.subr.bf16.mxu1 %v5813_v19  ;;  %vm693_vm3 = vcmp.eq.s32.totalorder %v650_v52, %v5943_v40  ;;  %vm695_vm4 = vcmp.eq.s32.totalorder %v653_v53, %v5943_v40  ;;  %vm692_vm7 = vcmp.eq.s32.totalorder %v650_v52, %v5939_v37  ;;  %vm694_vm8 = vcmp.eq.s32.totalorder %v653_v53, %v5939_v37  ;;  %v6345_v53 = vld [vmem:[%s5737_s26 + $0x78] sm:$0xff] }
  0xb6   : > { %vm4090_vm6 = vmpackc.low %vm695_vm4, %vm693_vm3  ;;  %2261 = vperm.xlu1 %5329, %v5822_v21   ;;  %5333 = vset.pattern.permute.xlu0 %v5616_v51 }
  0xb7   : > { %vm4092_vm11 = vmpackc.low %vm694_vm8, %vm692_vm7  ;;  %1889 = vperm.xlu0 %5333, %v5839_v25  }
  0xb8   : > { %4478 = vmatpush3.bf16.msra.mxu1 %v5827_v22  ;;  %v5988_v54 = vpop.permute.xlu1 %655  ;;  %v5990_v55 = vpop.permute.xlu0 %658 }
  0xb9   : > { %4479 = vmatprep.subr.bf16.mxu1 %v5833_v23  ;;  %vm698_vm14 = vcmp.eq.s32.totalorder %v5990_v55, %v5939_v37 }
  0xba   : > { %5331 = vset.pattern.permute.xlu1 %v5616_v51 }
  0xbb   : > { %4081 = vmatmul.mubr.msk.bf16.gmra.mrb[12].mxu1 %vm4080_vm10, %v5614_v43  ;;  %vm699_vm10 = vcmp.eq.s32.totalorder %v5990_v55, %v5943_v40  ;;  %1883 = vperm.xlu1 %5331, %v5822_v21   ;;  %v6300_v21 = vld [vmem:[%s7737_s1 + $0x48] sm:$0xff]   ;;  %v6357_v55 = vld [vmem:[%s7737_s1 + $0x60] sm:$0xff]  }
  0xbc   : > { %4480 = vmatpush3.bf16.msra.mxu1 %v5847_v27  ;;  %v5995_v56 = vpop.permute.xlu1 %661  ;;  %v5997_v57 = vpop.permute.xlu0 %664  ;;  %4083 = vmatprep.mubr.msk.bf16.mxu1 %vm4082_vm9, %v5614_v43  ;;  %vm697_vm9 = vcmp.eq.s32.totalorder %v5988_v54, %v5943_v40 }
  0xbd   : > { %4481 = vmatprep.subr.bf16.mxu1 %v5854_v28  ;;  %vm4094_vm12 = vmpackc.low %vm699_vm10, %vm697_vm9  ;;  %vm701_vm15 = vcmp.eq.s32.totalorder %v5995_v56, %v5943_v40  ;;  %vm700_vm9 = vcmp.eq.s32.totalorder %v5995_v56, %v5939_v37  ;;  %vm702_vm10 = vcmp.eq.s32.totalorder %v5997_v57, %v5939_v37  ;;  %5334 = vset.pattern.permute.xlu0 %v5615_v49  ;;  %v5617_v56 = vmov 6  }
  0xbe   : > { %2267 = vperm.xlu0 %5334, %v5839_v25   ;;  %v6312_v25 = vld [vmem:[%s7737_s1 + $0x8] sm:$0xff]  }
  0xbf   : > { %1886 = vperm.xlu1 %5331, %v5819_v20   ;;  %v6294_v20 = vld [vmem:[%s7737_s1] sm:$0xff]  }
  0xc0   : > { %4482 = vmatpush3.bf16.msra.mxu1 %v5869_v31  ;;  %v6006_v58 = vpop.permute.xlu1 %667  ;;  %v6008_v59 = vpop.permute.xlu0 %670 }
  0xc1   : > { %4549 = vmatprep.subr.bf16.mxu1 %v5711_v1 }
  0xc2   : > { %2276 = vperm.xlu0 %5334, %v5864_v30  }
  0xc3   : > { %4085 = vmatmul.mubr.msk.bf16.vlgmr.msra.gmra.mrb[16].mxu1 %vm4084_vm13, %v5614_v43  ;;  %vm696_vm13 = vcmp.eq.s32.totalorder %v5988_v54, %v5939_v37  ;;  %5332 = vset.pattern.permute.xlu1 %v5615_v49  ;;  %v6351_v54 = vld [vmem:[%s7737_s1 + $0x18] sm:$0xff]  }
  0xc4   : > { %4550 = vmatpush3.bf16.msra.mxu1 %v5716_v2  ;;  %v6013_v60 = vpop.permute.xlu1 %673  ;;  %4087 = vmatprep.mubr.msk.bf16.mxu1 %vm4086_vm0, %v5614_v43  ;;  %v6017_v61 = vpop.permute.xlu0 %676  ;;  %vm703_vm0 = vcmp.eq.s32.totalorder %v5997_v57, %v5943_v40  ;;  %vm4096_vm2 = vmpackc.low %vm698_vm14, %vm696_vm13  ;;  %v6365_v57 = vld [vmem:[%s5737_s26 + $0x8] sm:$0xff] }
  0xc5   : > { %4551 = vmatprep.subr.bf16.mxu1 %v5722_v3  ;;  %vm4098_vm4 = vmpackc.low %vm703_vm0, %vm701_vm15  ;;  %vm704_vm15 = vcmp.eq.s32.totalorder %v6006_v58, %v5939_v37  ;;  %vm706_vm0 = vcmp.eq.s32.totalorder %v6008_v59, %v5939_v37  ;;  %2270 = vperm.xlu1 %5332, %v5842_v26  }
  0xc6   : > { %vm4100_vm13 = vmpackc.low %vm702_vm10, %vm700_vm9  ;;  %2279 = vperm.xlu0 %5334, %v5880_v32  }
  0xc8   : > { %4552 = vmatpush3.bf16.msra.mxu1 %v5731_v4  ;;  %v6024_v62 = vpop.permute.xlu1 %679  ;;  %v6028_v63 = vpop.permute.xlu0 %682 }
  0xc9   : > { %4553 = vmatprep.subr.bf16.mxu1 %v5742_v5  ;;  %5335 = vset.pattern.permute.xlu1 %v5616_v51 }
  0xca   : > { %1892 = vperm.xlu1 %5335, %v5842_v26   ;;  %2288 = vperm.xlu0 %5334, %v5756_v9   ;;  %v6318_v26 = vld [vmem:[%s7737_s1 + $0x50] sm:$0xff]  }
  0xcb   : > { %4089 = vmatmul.mubr.msk.bf16.gmra.mrb[20].mxu1 %vm4088_vm5, %v5614_v43 }
  0xcc   : > { %4091 = vmatprep.mubr.msk.bf16.mxu1 %vm4090_vm6, %v5614_v43  ;;  %4554 = vmatpush3.bf16.msra.mxu1 %v5762_v10 }
  0xcd   : > { %4555 = vmatprep.subr.bf16.mxu1 %v5778_v13  ;;  %v6033_v8 = vpop.permute.xlu1 %1127  ;;  %v6042_v12 = vpop.permute.xlu0 %1130 }
  0xce   : > { %5336 = vset.pattern.permute.xlu1 %v5615_v49  ;;  %5341 = vset.pattern.permute.xlu0 %v5616_v51 }
  0xcf   : > { %2273 = vperm.xlu1 %5336, %v5861_v29   ;;  %1901 = vperm.xlu0 %5341, %v5880_v32  }
  0xd0   : > { %4556 = vmatpush3.bf16.msra.mxu1 %v5784_v14 }
  0xd1   : > { %v6044_v16 = vpop.permute.xlu1 %1133  ;;  %4557 = vmatprep.subr.bf16.mxu1 %v5791_v15 }
  0xd2   : > { %v307_v34 = vpop.permute.xlu0 %306 }
  0xd3   : > { %4093 = vmatmul.mubr.msk.bf16.gmra.mrb[24].mxu1 %vm4092_vm11, %v5614_v43  ;;  %vm354_vm1 = vcmp.eq.s32.totalorder %v307_v34, %v5943_v40  ;;  %vm353_vm3 = vcmp.eq.s32.totalorder %v307_v34, %v5939_v37  ;;  %vm705_vm11 = vcmp.eq.s32.totalorder %v6006_v58, %v5943_v40  ;;  %5337 = vset.pattern.permute.xlu1 %v5616_v51  ;;  %v6371_v58 = vld [vmem:[%s7737_s1 + $0x20] sm:$0xff]   ;;  %v6421_v34 = vld [vmem:[%s7737_s1 + $0x30] sm:$0xff]  }
  0xd4   : > { %4095 = vmatprep.mubr.msk.bf16.mxu1 %vm4094_vm12, %v5614_v43  ;;  %4558 = vmatpush3.bf16.msra.mxu1 %v5806_v18  ;;  %vm707_vm12 = vcmp.eq.s32.totalorder %v6008_v59, %v5943_v40 }
  0xd5   : > { %v6050_v24 = vpop.permute.xlu1 %1136  ;;  %4559 = vmatprep.subr.bf16.mxu1 %v5813_v19  ;;  %vm4102_vm14 = vmpackc.low %vm707_vm12, %vm705_vm11  ;;  %vm708_vm11 = vcmp.eq.s32.totalorder %v6013_v60, %v5939_v37  ;;  %vm710_vm12 = vcmp.eq.s32.totalorder %v6017_v61, %v5939_v37  ;;  %1895 = vperm.xlu1 %5337, %v5861_v29  }
  0xd6   : > { %1913 = vperm.xlu0 %5341, %v5745_v6  }
  0xd7   : > { %v6085_v39 = vpop.permute.xlu0 %1142 }
  0xd8   : > { %4560 = vmatpush3.bf16.msra.mxu1 %v5827_v22 }
  0xd9   : > { %4561 = vmatprep.subr.bf16.mxu1 %v5833_v23  ;;  %1898 = vperm.xlu1 %5337, %v5864_v30   ;;  %v6336_v30 = vld [vmem:[%s7737_s1 + $0x58] sm:$0xff]  }
  0xda   : > { %v310_v35 = vpop.permute.xlu1 %309  ;;  %5344 = vset.pattern.permute.xlu0 %v5615_v49 }
  0xdb   : > { %4097 = vmatmul.mubr.msk.bf16.gmra.mrb[28].mxu1 %vm4096_vm2, %v5614_v43  ;;  %vm355_vm5 = vcmp.eq.s32.totalorder %v310_v35, %v5939_v37  ;;  %vm356_vm6 = vcmp.eq.s32.totalorder %v310_v35, %v5943_v40  ;;  %vm711_vm2 = vcmp.eq.s32.totalorder %v6017_v61, %v5943_v40  ;;  %v6099_v44 = vpop.permute.xlu0 %1145  ;;  %2291 = vperm.xlu0 %5344, %v5745_v6   ;;  %v6379_v61 = vld [vmem:[%s7737_s1 + $0x68] sm:$0xff]   ;;  %v6431_v35 = vld [vmem:[%s5737_s26 + $0x18] sm:$0xff] }
  0xdc   : > { %4099 = vmatprep.mubr.msk.bf16.mxu1 %vm4098_vm4, %v5614_v43  ;;  %vm4050_vm7 = vmpackc.low %vm356_vm6, %vm354_vm1  ;;  %4562 = vmatpush3.bf16.msra.mxu1 %v5847_v27  ;;  %vm709_vm1 = vcmp.eq.s32.totalorder %v6013_v60, %v5943_v40 }
  0xdd   : > { %4051 = vmatprep.mubr.msk.bf16.mxu0 %vm4050_vm7, %v5614_v43  ;;  %vm4052_vm8 = vmpackc.low %vm355_vm5, %vm353_vm3  ;;  %4563 = vmatprep.subr.bf16.mxu1 %v5854_v28 }
  0xde   : > { %4053 = vmatmul.mubr.msk.bf16.vlgmr.msra.gmra.mrb[0].mxu0 %vm4052_vm8, %v5614_v43  ;;  %vm4104_vm4 = vmpackc.low %vm706_vm0, %vm704_vm15  ;;  %5338 = vset.pattern.permute.xlu1 %v5615_v49 }
  0xdf   : > { %v6077_v38 = vpop.permute.xlu1 %1139  ;;  %vm4106_vm6 = vmpackc.low %vm711_vm2, %vm709_vm1  ;;  %2282 = vperm.xlu1 %5338, %v5883_v33   ;;  %2300 = vperm.xlu0 %5344, %v5768_v11   ;;  %v6255_v11 = vld [vmem:[%s5737_s26 + $0x40] sm:$0xff] }
  0xe0   : > { %4564 = vmatpush3.bf16.msra.mxu1 %v5869_v31  ;;  %v319_v46 = vpop.permute.xlu0 %318  ;;  %vm4108_vm0 = vmpackc.low %vm710_vm12, %vm708_vm11 }
  0xe1   : > { %4622 = vmatprep.subr.bf16.mxu1 %v5711_v1  ;;  %vm362_vm15 = vcmp.eq.s32.totalorder %v319_v46, %v5943_v40  ;;  %vm361_vm1 = vcmp.eq.s32.totalorder %v319_v46, %v5939_v37  ;;  %v6462_v46 = vld [vmem:[%s5737_s26 + $0x38] sm:$0xff] }
  0xe3   : > { %4101 = vmatmul.mubr.msk.bf16.gmra.mrb[32].mxu1 %vm4100_vm13, %v5614_v43  ;;  %vm713_vm13 = vcmp.eq.s32.totalorder %v6024_v62, %v5943_v40  ;;  %5339 = vset.pattern.permute.xlu1 %v5616_v51 }
  0xe4   : > { %4103 = vmatprep.mubr.msk.bf16.mxu1 %vm4102_vm14, %v5614_v43  ;;  %v313_v41 = vpop.permute.xlu1 %312  ;;  %vm715_vm14 = vcmp.eq.s32.totalorder %v6028_v63, %v5943_v40  ;;  %1904 = vperm.xlu1 %5339, %v5883_v33  }
  0xe5   : > { %vm358_vm3 = vcmp.eq.s32.totalorder %v313_v41, %v5943_v40  ;;  %vm357_vm5 = vcmp.eq.s32.totalorder %v313_v41, %v5939_v37  ;;  %vm4110_vm2 = vmpackc.low %vm715_vm14, %vm713_vm13  ;;  %vm1174_vm13 = vcmp.eq.s32.totalorder %v6033_v8, %v5939_v37  ;;  %vm1176_vm14 = vcmp.eq.s32.totalorder %v6042_v12, %v5939_v37  ;;  %2303 = vperm.xlu0 %5344, %v5800_v17   ;;  %v6450_v41 = vld [vmem:[%s5737_s26 + $0x28] sm:$0xff] }
  0xe8   : > { %v316_v42 = vpop.permute.xlu1 %315  ;;  %5340 = vset.pattern.permute.xlu1 %v5615_v49 }
  0xe9   : > { %vm359_vm7 = vcmp.eq.s32.totalorder %v316_v42, %v5939_v37  ;;  %vm360_vm8 = vcmp.eq.s32.totalorder %v316_v42, %v5943_v40  ;;  %2285 = vperm.xlu1 %5340, %v5748_v7   ;;  %5349 = vset.pattern.permute.xlu0 %v5616_v51  ;;  %v6263_v7 = vld [vmem:[%s5737_s26 + $0x48] sm:$0xff]  ;;  %v6454_v42 = vld [vmem:[%s5737_s26 + $0x50] sm:$0xff] }
  0xea   : > { %vm4054_vm9 = vmpackc.low %vm360_vm8, %vm358_vm3  ;;  %vm714_vm8 = vcmp.eq.s32.totalorder %v6028_v63, %v5939_v37  ;;  %1925 = vperm.xlu0 %5349, %v5800_v17   ;;  %v6390_v63 = vld [vmem:[%s5737_s26] sm:$0xff] }
  0xeb   : > { %4105 = vmatmul.mubr.msk.bf16.gmra.mrb[36].mxu1 %vm4104_vm4, %v5614_v43  ;;  %4055 = vmatprep.mubr.msk.bf16.mxu0 %vm4054_vm9, %v5614_v43  ;;  %vm4056_vm10 = vmpackc.low %vm359_vm7, %vm357_vm5  ;;  %vm712_vm7 = vcmp.eq.s32.totalorder %v6024_v62, %v5939_v37  ;;  %vm1175_vm9 = vcmp.eq.s32.totalorder %v6033_v8, %v5943_v40  ;;  %v6387_v62 = vld [vmem:[%s7738_s2] sm:$0xff]   ;;  %v6400_v8 = vld [vmem:[%s7737_s1 + $0x28] sm:$0xff]  }
  0xec   : > { %4107 = vmatprep.mubr.msk.bf16.mxu1 %vm4106_vm6, %v5614_v43  ;;  %4057 = vmatmul.mubr.msk.bf16.gmra.mrb[4].mxu0 %vm4056_vm10, %v5614_v43  ;;  %vm1177_vm10 = vcmp.eq.s32.totalorder %v6042_v12, %v5943_v40  ;;  %vm4112_vm11 = vmpackc.low %vm714_vm8, %vm712_vm7  ;;  %v6406_v12 = vld [vmem:[%s7737_s1 + $0x70] sm:$0xff]  }
  0xed   : > { %v6107_v45 = vpop.permute.xlu1 %1148  ;;  %vm4132_vm12 = vmpackc.low %vm1177_vm10, %vm1175_vm9  ;;  %vm1178_vm9 = vcmp.eq.s32.totalorder %v6044_v16, %v5939_v37  ;;  %vm1180_vm10 = vcmp.eq.s32.totalorder %v6050_v24, %v5939_v37  ;;  %5342 = vset.pattern.permute.xlu1 %v5616_v51 }
  0xee   : > { %1907 = vperm.xlu1 %5342, %v6255_v11   ;;  %5352 = vset.pattern.permute.xlu0 %v5617_v56 }
  0xef   : > { %2642 = vperm.xlu0 %5352, %v6365_v57  }
  0xf2   : > { %v322_v47 = vpop.permute.xlu1 %321  ;;  %1910 = vperm.xlu1 %5342, %v6263_v7  }
  0xf3   : > { %4109 = vmatmul.mubr.msk.bf16.gmra.mrb[40].mxu1 %vm4108_vm0, %v5614_v43  ;;  %vm363_vm3 = vcmp.eq.s32.totalorder %v322_v47, %v5939_v37  ;;  %vm364_vm4 = vcmp.eq.s32.totalorder %v322_v47, %v5943_v40  ;;  %vm1181_vm0 = vcmp.eq.s32.totalorder %v6050_v24, %v5943_v40  ;;  %2651 = vperm.xlu0 %5352, %v5861_v29   ;;  %v6410_v29 = vld [vmem:[%s5737_s26 + $0x10] sm:$0xff] }
  0xf4   : > { %4111 = vmatprep.mubr.msk.bf16.mxu1 %vm4110_vm2, %v5614_v43  ;;  %vm4058_vm5 = vmpackc.low %vm364_vm4, %vm362_vm15  ;;  %vm1179_vm15 = vcmp.eq.s32.totalorder %v6044_v16, %v5943_v40 }
  0xf5   : > { %4059 = vmatprep.mubr.msk.bf16.mxu0 %vm4058_vm5, %v5614_v43  ;;  %vm4060_vm6 = vmpackc.low %vm363_vm3, %vm361_vm1 }
  0xf6   : > { %4061 = vmatmul.mubr.msk.bf16.gmra.mrb[8].mxu0 %vm4060_vm6, %v5614_v43  ;;  %vm4134_vm2 = vmpackc.low %vm1176_vm14, %vm1174_vm13  ;;  %5343 = vset.pattern.permute.xlu1 %v5615_v49 }
  0xf7   : > { %v6129_v48 = vpop.permute.xlu1 %1151  ;;  %vm4136_vm4 = vmpackc.low %vm1181_vm0, %vm1179_vm15  ;;  %vm1182_vm15 = vcmp.eq.s32.totalorder %v6077_v38, %v5939_v37  ;;  %vm1184_vm0 = vcmp.eq.s32.totalorder %v6085_v39, %v5939_v37  ;;  %2657 = vperm.xlu0 %5352, %v5880_v32   ;;  %v6427_v32 = vld [vmem:[%s7737_s1 + $0x78] sm:$0xff]  }
  0xf8   : > { %vm4138_vm13 = vmpackc.low %vm1180_vm10, %vm1178_vm9 }
  0xfb   : > { %4113 = vmatmul.mubr.msk.bf16.gmra.mrb[44].mxu1 %vm4112_vm11, %v5614_v43  ;;  %vm1183_vm11 = vcmp.eq.s32.totalorder %v6077_v38, %v5943_v40  ;;  %2663 = vperm.xlu0 %5352, %v6255_v11   ;;  %v6440_v38 = vld [vmem:[%s7737_s1 + $0x38] sm:$0xff]  }
  0xfc   : > { %4133 = vmatprep.mubr.msk.bf16.mxu1 %vm4132_vm12, %v5614_v43  ;;  %v325_v50 = vpop.permute.xlu1 %324  ;;  %vm1185_vm12 = vcmp.eq.s32.totalorder %v6085_v39, %v5943_v40  ;;  %v6446_v39 = vld [vmem:[%s7737_s1 + $0x40] sm:$0xff]  }
  0xfd   : > { %vm366_vm1 = vcmp.eq.s32.totalorder %v325_v50, %v5943_v40  ;;  %vm365_vm3 = vcmp.eq.s32.totalorder %v325_v50, %v5939_v37  ;;  %vm4140_vm14 = vmpackc.low %vm1185_vm12, %vm1183_vm11  ;;  %vm1190_vm11 = vcmp.eq.s32.totalorder %v6129_v48, %v5939_v37 }
  0xff   : > { %2669 = vperm.xlu0 %5352, %v6454_v42  }
 0x100   : > { %v328_v52 = vpop.permute.xlu1 %327 }
 0x101   : > { %vm367_vm5 = vcmp.eq.s32.totalorder %v328_v52, %v5939_v37  ;;  %vm368_vm6 = vcmp.eq.s32.totalorder %v328_v52, %v5943_v40 }
 0x102   : > { %vm4062_vm7 = vmpackc.low %vm368_vm6, %vm366_vm1  ;;  %vm1189_vm1 = vcmp.eq.s32.totalorder %v6107_v45, %v5943_v40 }
 0x103   : > { %4135 = vmatmul.mubr.msk.bf16.vlgmr.msra.gmra.mrb[48].mxu1 %vm4134_vm2, %v5614_v43  ;;  %4063 = vmatprep.mubr.msk.bf16.mxu0 %vm4062_vm7, %v5614_v43  ;;  %vm4064_vm8 = vmpackc.low %vm367_vm5, %vm365_vm3  ;;  %vm1187_vm2 = vcmp.eq.s32.totalorder %v6099_v44, %v5943_v40  ;;  %vm1191_vm5 = vcmp.eq.s32.totalorder %v6129_v48, %v5943_v40  ;;  %vm1188_vm7 = vcmp.eq.s32.totalorder %v6107_v45, %v5939_v37 }
 0x104   : > { %4623 = vmatpush3.bf16.msra.mxu1 %v5716_v2  ;;  %4137 = vmatprep.mubr.msk.bf16.mxu1 %vm4136_vm4, %v5614_v43  ;;  %vm4142_vm3 = vmpackc.low %vm1184_vm0, %vm1182_vm15  ;;  %v1155_v2 = vpop.permute.xlu0 %1154 }
 0x105   : > { %4624 = vmatprep.subr.bf16.mxu1 %v5722_v3  ;;  %4065 = vmatmul.mubr.msk.bf16.gmra.mrb[12].mxu0 %vm4064_vm8, %v5614_v43  ;;  %vm4144_vm4 = vmpackc.low %vm1189_vm1, %vm1187_vm2  ;;  %vm1193_vm6 = vcmp.eq.s32.totalorder %v1155_v2, %v5943_v40  ;;  %vm1186_vm8 = vcmp.eq.s32.totalorder %v6099_v44, %v5939_v37  ;;  %vm1192_vm12 = vcmp.eq.s32.totalorder %v1155_v2, %v5939_v37  ;;  %v1161_v3 = vpop.permute.xlu1 %1160 }
 0x106   : > { %vm4148_vm9 = vmpackc.low %vm1193_vm6, %vm1191_vm5  ;;  %vm1196_vm1 = vcmp.eq.s32.totalorder %v1161_v3, %v5939_v37 }
 0x107   : > { %vm4146_vm10 = vmpackc.low %vm1188_vm7, %vm1186_vm8 }
 0x108   : > { %4625 = vmatpush3.bf16.msra.mxu1 %v5731_v4  ;;  %v1158_v4 = vpop.permute.xlu0 %1157  ;;  %vm4150_vm15 = vmpackc.low %vm1192_vm12, %vm1190_vm11 }
 0x109   : > { %4626 = vmatprep.subr.bf16.mxu1 %v5742_v5  ;;  %v5371_v5 = vld [vmem:[%s7738_s2 + $0x8] sm:$0xff]   ;;  %vm1194_vm2 = vcmp.eq.s32.totalorder %v1158_v4, %v5939_v37 }
 0x10a   : > { %4987 = vmatprep.subr.bf16.mxu0 %v5371_v5  ;;  %vm4154_vm5 = vmpackc.low %vm1196_vm1, %vm1194_vm2 }
 0x10b   : > { %4139 = vmatmul.mubr.msk.bf16.gmra.mrb[52].mxu1 %vm4138_vm13, %v5614_v43  ;;  %vm1197_vm13 = vcmp.eq.s32.totalorder %v1161_v3, %v5943_v40  ;;  %4988 = vmatpush3.bf16.msra.mxu0 %v5371_v5 }
 0x10c   : > { %4141 = vmatprep.mubr.msk.bf16.mxu1 %vm4140_vm14, %v5614_v43  ;;  %4627 = vmatpush3.bf16.msra.mxu1 %v5762_v10  ;;  %vm1195_vm14 = vcmp.eq.s32.totalorder %v1158_v4, %v5943_v40  ;;  %v1164_v9 = vpop.permute.xlu0 %1163 }
 0x10d   : > { %4628 = vmatprep.subr.bf16.mxu1 %v5778_v13  ;;  %vm4152_vm0 = vmpackc.low %vm1197_vm13, %vm1195_vm14  ;;  %vm1198_vm8 = vcmp.eq.s32.totalorder %v1164_v9, %v5939_v37  ;;  %5005 = vmatprep.subr.bf16.mxu0 %v6387_v62 }
 0x110   : > { %4629 = vmatpush3.bf16.msra.mxu1 %v5784_v14  ;;  %v1170_v10 = vpop.permute.xlu0 %1169 }
 0x111   : > { %4630 = vmatprep.subr.bf16.mxu1 %v5791_v15  ;;  %v6273_v15 = vld [vmem:[%s5737_s26 + $0x58] sm:$0xff] }
 0x112   : > { %2294 = vperm.xlu1 %5343, %v6273_v15  }
 0x113   : > { %4143 = vmatmul.mubr.msk.bf16.gmra.mrb[56].mxu1 %vm4142_vm3, %v5614_v43 }
 0x114   : > { %4145 = vmatprep.mubr.msk.bf16.mxu1 %vm4144_vm4, %v5614_v43  ;;  %4631 = vmatpush3.bf16.msra.mxu1 %v5806_v18  ;;  %vm1199_vm4 = vcmp.eq.s32.totalorder %v1164_v9, %v5943_v40  ;;  %v1506_v14 = vpop.permute.xlu0 %1505 }
 0x115   : > { %4632 = vmatprep.subr.bf16.mxu1 %v5813_v19  ;;  %vm1553_vm14 = vcmp.eq.s32.totalorder %v1506_v14, %v5943_v40  ;;  %v6286_v19 = vld [vmem:[%s5737_s26 + $0x60] sm:$0xff] }
 0x116   : > { %5345 = vset.pattern.permute.xlu1 %v5616_v51  ;;  %2675 = vperm.xlu0 %5352, %v6286_v19  }
 0x117   : > { %1916 = vperm.xlu1 %5345, %v6273_v15  }
 0x118   : > { %4633 = vmatpush3.bf16.msra.mxu1 %v5827_v22  ;;  %v1515_v18 = vpop.permute.xlu0 %1514 }
 0x119   : > { %4634 = vmatprep.subr.bf16.mxu1 %v5833_v23 }
 0x11b   : > { %4147 = vmatmul.mubr.msk.bf16.gmra.mrb[60].mxu1 %vm4146_vm10, %v5614_v43  ;;  %vm1203_vm10 = vcmp.eq.s32.totalorder %v1170_v10, %v5943_v40  ;;  %5346 = vset.pattern.permute.xlu1 %v5615_v49 }
 0x11c   : > { %4149 = vmatprep.mubr.msk.bf16.mxu1 %vm4148_vm9, %v5614_v43  ;;  %4635 = vmatpush3.bf16.msra.mxu1 %v5847_v27  ;;  %v1521_v23 = vpop.permute.xlu0 %1520  ;;  %v6323_v27 = vld [vmem:[%s5737_s26 + $0x68] sm:$0xff] }
 0x11d   : > { %4636 = vmatprep.subr.bf16.mxu1 %v5854_v28  ;;  %2297 = vperm.xlu1 %5346, %v6286_v19   ;;  %v6330_v28 = vld [vmem:[%s7737_s1 + $0x10] sm:$0xff]  }
 0x120   : > { %4637 = vmatpush3.bf16.msra.mxu1 %v5869_v31  ;;  %v1527_v33 = vpop.permute.xlu0 %1526 }
 0x121   : > { %4768 = vmatprep.subr.bf16.mxu1 %v5711_v1  ;;  %v1167_v1 = vpop.permute.xlu1 %1166  ;;  %5347 = vset.pattern.permute.xlu1 %v5616_v51 }
 0x122   : > { %vm1201_vm3 = vcmp.eq.s32.totalorder %v1167_v1, %v5943_v40  ;;  %vm1200_vm7 = vcmp.eq.s32.totalorder %v1167_v1, %v5939_v37  ;;  %1919 = vperm.xlu1 %5347, %v6286_v19  }
 0x123   : > { %4151 = vmatmul.mubr.msk.bf16.gmra.mrb[64].mxu1 %vm4150_vm15, %v5614_v43  ;;  %vm4156_vm6 = vmpackc.low %vm1201_vm3, %vm1199_vm4  ;;  %vm1552_vm4 = vcmp.eq.s32.totalorder %v1506_v14, %v5939_v37 }
 0x124   : > { %4153 = vmatprep.mubr.msk.bf16.mxu1 %vm4152_vm0, %v5614_v43  ;;  %vm4158_vm11 = vmpackc.low %vm1200_vm7, %vm1198_vm8  ;;  %vm1202_vm0 = vcmp.eq.s32.totalorder %v1170_v10, %v5939_v37  ;;  %vm1559_vm7 = vcmp.eq.s32.totalorder %v1515_v18, %v5943_v40  ;;  %v1533_v60 = vpop.permute.xlu0 %1532 }
 0x125   : > { %v1173_v6 = vpop.permute.xlu1 %1172 }
 0x126   : > { %vm1205_vm9 = vcmp.eq.s32.totalorder %v1173_v6, %v5943_v40  ;;  %vm1204_vm15 = vcmp.eq.s32.totalorder %v1173_v6, %v5939_v37  ;;  %1922 = vperm.xlu1 %5347, %v6323_v27  }
 0x127   : > { %vm4160_vm12 = vmpackc.low %vm1205_vm9, %vm1203_vm10  ;;  %vm1558_vm10 = vcmp.eq.s32.totalorder %v1515_v18, %v5939_v37 }
 0x128   : > { %vm4162_vm2 = vmpackc.low %vm1204_vm15, %vm1202_vm0  ;;  %vm1562_vm0 = vcmp.eq.s32.totalorder %v1521_v23, %v5939_v37  ;;  %v1539_v24 = vpop.permute.xlu0 %1538 }
 0x129   : > { %v1509_v13 = vpop.permute.xlu1 %1508 }
 0x12a   : > { %vm1555_vm13 = vcmp.eq.s32.totalorder %v1509_v13, %v5943_v40  ;;  %vm1554_vm3 = vcmp.eq.s32.totalorder %v1509_v13, %v5939_v37  ;;  %5348 = vset.pattern.permute.xlu1 %v5615_v49  ;;  %v6470_v49 = vld [vmem:[%s5737_s26 + $0x70] sm:$0xff] }
 0x12b   : > { %4155 = vmatmul.mubr.msk.bf16.gmra.mrb[68].mxu1 %vm4154_vm5, %v5614_v43  ;;  %vm4173_vm1 = vmpackc.low %vm1555_vm13, %vm1553_vm14  ;;  %2306 = vperm.xlu1 %5348, %v6345_v53  }
 0x12c   : > { %4157 = vmatprep.mubr.msk.bf16.mxu1 %vm4156_vm6, %v5614_v43  ;;  %vm4175_vm5 = vmpackc.low %vm1554_vm3, %vm1552_vm4  ;;  %v1545_v45 = vpop.permute.xlu0 %1544  ;;  %2681 = vperm.xlu0 %5352, %v6470_v49  }
 0x12d   : > { %v1512_v17 = vpop.permute.xlu1 %1511 }
 0x12e   : > { %vm1557_vm6 = vcmp.eq.s32.totalorder %v1512_v17, %v5943_v40  ;;  %vm1556_vm9 = vcmp.eq.s32.totalorder %v1512_v17, %v5939_v37 }
 0x12f   : > { %vm4177_vm8 = vmpackc.low %vm1559_vm7, %vm1557_vm6  ;;  %5350 = vset.pattern.permute.xlu1 %v5616_v51  ;;  %vm1566_vm6 = vcmp.eq.s32.totalorder %v1527_v33, %v5939_v37 }
 0x130   : > { %vm4179_vm13 = vmpackc.low %vm1558_vm10, %vm1556_vm9  ;;  %1928 = vperm.xlu1 %5350, %v6345_v53   ;;  %v1551_v48 = vpop.permute.xlu0 %1550 }
 0x131   : > { %v1518_v22 = vpop.permute.xlu1 %1517 }
 0x132   : > { %vm1560_vm15 = vcmp.eq.s32.totalorder %v1518_v22, %v5939_v37 }
 0x133   : > { %4159 = vmatmul.mubr.msk.bf16.gmra.mrb[72].mxu1 %vm4158_vm11, %v5614_v43  ;;  %vm1561_vm11 = vcmp.eq.s32.totalorder %v1518_v22, %v5943_v40  ;;  %vm4183_vm3 = vmpackc.low %vm1562_vm0, %vm1560_vm15 }
 0x134   : > { %4161 = vmatprep.mubr.msk.bf16.mxu1 %vm4160_vm12, %v5614_v43  ;;  %vm1563_vm12 = vcmp.eq.s32.totalorder %v1521_v23, %v5943_v40  ;;  %5351 = vset.pattern.permute.xlu1 %v5617_v56 }
 0x135   : > { %vm4181_vm14 = vmpackc.low %vm1563_vm12, %vm1561_vm11  ;;  %v1524_v31 = vpop.permute.xlu1 %1523  ;;  %2639 = vperm.xlu1 %5351, %v6390_v63   ;;  %vm1570_vm12 = vcmp.eq.s32.totalorder %v1533_v60, %v5939_v37 }
 0x139   : > { %v1530_v59 = vpop.permute.xlu1 %1529  ;;  %2645 = vperm.xlu1 %5351, %v6410_v29  }
 0x13a   : > { %vm1569_vm7 = vcmp.eq.s32.totalorder %v1530_v59, %v5943_v40  ;;  %vm1568_vm11 = vcmp.eq.s32.totalorder %v1530_v59, %v5939_v37 }
 0x13b   : > { %4163 = vmatmul.mubr.msk.bf16.gmra.mrb[76].mxu1 %vm4162_vm2, %v5614_v43  ;;  %vm1567_vm2 = vcmp.eq.s32.totalorder %v1527_v33, %v5943_v40  ;;  %vm4191_vm15 = vmpackc.low %vm1570_vm12, %vm1568_vm11 }
 0x13c   : > { %4174 = vmatprep.mubr.msk.bf16.mxu1 %vm4173_vm1, %v5614_v43  ;;  %vm1565_vm1 = vcmp.eq.s32.totalorder %v1524_v31, %v5943_v40 }
 0x13d   : > { %vm4185_vm4 = vmpackc.low %vm1567_vm2, %vm1565_vm1  ;;  %v1536_v16 = vpop.permute.xlu1 %1535  ;;  %2648 = vperm.xlu1 %5351, %v6431_v35   ;;  %vm1574_vm2 = vcmp.eq.s32.totalorder %v1539_v24, %v5939_v37 }
 0x13e   : > { %vm1572_vm1 = vcmp.eq.s32.totalorder %v1536_v16, %v5939_v37 }
 0x141   : > { %2654 = vperm.xlu1 %5351, %v6450_v41   ;;  %v1542_v44 = vpop.permute.xlu1 %1541 }
 0x143   : > { %4176 = vmatmul.mubr.msk.bf16.vlgmr.msra.gmra.mrb[80].mxu1 %vm4175_vm5, %v5614_v43  ;;  %vm1564_vm5 = vcmp.eq.s32.totalorder %v1524_v31, %v5939_v37 }
 0x144   : > { %4178 = vmatprep.mubr.msk.bf16.mxu1 %vm4177_vm8, %v5614_v43  ;;  %4769 = vmatpush3.bf16.msra.mxu1 %v6294_v20  ;;  %vm1571_vm8 = vcmp.eq.s32.totalorder %v1533_v60, %v5943_v40  ;;  %vm4187_vm9 = vmpackc.low %vm1566_vm6, %vm1564_vm5 }
 0x145   : > { %4770 = vmatprep.subr.bf16.mxu1 %v6300_v21  ;;  %vm4189_vm10 = vmpackc.low %vm1571_vm8, %vm1569_vm7  ;;  %2660 = vperm.xlu1 %5351, %v6462_v46   ;;  %v1548_v47 = vpop.permute.xlu1 %1547  ;;  %vm1576_vm7 = vcmp.eq.s32.totalorder %v1542_v44, %v5939_v37  ;;  %vm1578_vm8 = vcmp.eq.s32.totalorder %v1545_v45, %v5939_v37 }
 0x146   : > { %vm4195_vm5 = vmpackc.low %vm1574_vm2, %vm1572_vm1 }
 0x147   : > { %vm4199_vm11 = vmpackc.low %vm1578_vm8, %vm1576_vm7  ;;  %vm7743_vm7 = vcmask 130048  }
 0x148   : > { %4771 = vmatpush3.bf16.msra.mxu1 %v6312_v25 }
 0x149   : > { %4772 = vmatprep.subr.bf16.mxu1 %v6318_v26  ;;  %2666 = vperm.xlu1 %5351, %v6263_v7   ;;  %v2262_v18 = vpop.permute.xlu1 %2261 }
 0x14a   : > { %vm2308_vm1 = vcmp.eq.s32.totalorder %v2262_v18, %v5939_v37 }
 0x14b   : > { %4180 = vmatmul.mubr.msk.bf16.gmra.mrb[84].mxu1 %vm4179_vm13, %v5614_v43  ;;  %vm1573_vm13 = vcmp.eq.s32.totalorder %v1536_v16, %v5943_v40  ;;  %v6765_v16 = vld [vmem:[%s7738_s2 + $0x18] sm:$0xff]  }
 0x14c   : > { %4182 = vmatprep.mubr.msk.bf16.mxu1 %vm4181_vm14, %v5614_v43  ;;  %4773 = vmatpush3.bf16.msra.mxu1 %v6330_v28  ;;  %vm1575_vm14 = vcmp.eq.s32.totalorder %v1539_v24, %v5943_v40 }
 0x14d   : > { %4774 = vmatprep.subr.bf16.mxu1 %v6336_v30  ;;  %vm4193_vm0 = vmpackc.low %vm1575_vm14, %vm1573_vm13  ;;  %2672 = vperm.xlu1 %5351, %v6273_v15   ;;  %vm1580_vm13 = vcmp.eq.s32.totalorder %v1548_v47, %v5939_v37  ;;  %vm1582_vm14 = vcmp.eq.s32.totalorder %v1551_v48, %v5939_v37  ;;  %v6501_v60 = vpop.permute.xlu1 %1883 }
 0x150   : > { %4775 = vmatpush3.bf16.msra.mxu1 %v6351_v54 }
 0x151   : > { %4776 = vmatprep.subr.bf16.mxu1 %v6357_v55  ;;  %2678 = vperm.xlu1 %5351, %v6323_v27  }
 0x153   : > { %4184 = vmatmul.mubr.msk.bf16.gmra.mrb[88].mxu1 %vm4183_vm3, %v5614_v43  ;;  %vm1577_vm3 = vcmp.eq.s32.totalorder %v1542_v44, %v5943_v40 }
 0x154   : > { %4186 = vmatprep.mubr.msk.bf16.mxu1 %vm4185_vm4, %v5614_v43  ;;  %4777 = vmatpush3.bf16.msra.mxu1 %v6371_v58  ;;  %vm1579_vm4 = vcmp.eq.s32.totalorder %v1545_v45, %v5943_v40  ;;  %v6505_v45 = vpop.permute.xlu1 %1886 }
 0x155   : > { %4778 = vmatprep.subr.bf16.mxu1 %v6379_v61  ;;  %vm4197_vm6 = vmpackc.low %vm1579_vm4, %vm1577_vm3  ;;  %2684 = vperm.xlu1 %5351, %v6345_v53  }
 0x158   : > { %4779 = vmatpush3.bf16.msra.mxu1 %v6400_v8 }
 0x159   : > { %4780 = vmatprep.subr.bf16.mxu1 %v6406_v12 }
 0x15b   : > { %4188 = vmatmul.mubr.msk.bf16.gmra.mrb[92].mxu1 %vm4187_vm9, %v5614_v43  ;;  %vm1581_vm9 = vcmp.eq.s32.totalorder %v1548_v47, %v5943_v40 }
 0x15c   : > { %4190 = vmatprep.mubr.msk.bf16.mxu1 %vm4189_vm10, %v5614_v43  ;;  %4781 = vmatpush3.bf16.msra.mxu1 %v6421_v34  ;;  %vm1583_vm10 = vcmp.eq.s32.totalorder %v1551_v48, %v5943_v40 }
 0x15d   : > { %4782 = vmatprep.subr.bf16.mxu1 %v6427_v32  ;;  %vm4201_vm12 = vmpackc.low %vm1583_vm10, %vm1581_vm9 }
 0x160   : > { %4783 = vmatpush3.bf16.msra.mxu1 %v6440_v38 }
 0x161   : > { %4841 = vmatprep.subr.bf16.mxu1 %v6446_v39 }
 0x163   : > { %4192 = vmatmul.mubr.msk.bf16.gmra.mrb[96].mxu1 %vm4191_vm15, %v5614_v43  ;;  %vm4203_vm15 = vmpackc.low %vm1582_vm14, %vm1580_vm13 }
 0x164   : > { %4194 = vmatprep.mubr.msk.bf16.mxu1 %vm4193_vm0, %v5614_v43  ;;  %vm2309_vm0 = vcmp.eq.s32.totalorder %v2262_v18, %v5943_v40 }
 0x16b   : > { %4196 = vmatmul.mubr.msk.bf16.gmra.mrb[100].mxu1 %vm4195_vm5, %v5614_v43 }
 0x16c   : > { %4198 = vmatprep.mubr.msk.bf16.mxu1 %vm4197_vm6, %v5614_v43 }
 0x173   : > { %4200 = vmatmul.mubr.msk.bf16.gmra.mrb[104].mxu1 %vm4199_vm11, %v5614_v43 }
 0x174   : > { %4202 = vmatprep.mubr.msk.bf16.mxu1 %vm4201_vm12, %v5614_v43 }
 0x176   : > { %v4443_v50 = vpop.f32.mrb[0].mxu1 }
 0x177   : > { %v4444_v51 = vpop.f32.mrb[1].mxu1 }
 0x178   : > { %v6483_v52 = vadd.f32 %v4444_v51, %v4443_v50  ;;  %v4446_v2 = vpop.f32.mrb[2].mxu1 }
 0x179   : > { %v4447_v3 = vpop.f32.mrb[3].mxu1 }
 0x17a   : > { %v6485_v4 = vadd.f32 %v4447_v3, %v4446_v2  ;;  %v2271_v2 = vpop.permute.xlu1 %2270 }
 0x17b   : > { %4204 = vmatmul.mubr.msk.bf16.gmra.mrb[108].mxu1 %vm4203_vm15, %v5614_v43  ;;  %vm2315_vm13 = vcmp.eq.s32.totalorder %v2271_v2, %v5943_v40  ;;  %vm2314_vm14 = vcmp.eq.s32.totalorder %v2271_v2, %v5939_v37 }
 0x17c   : > { %v630_v5 = vpack.c.bf16 %v6485_v4, %v6483_v52 }
 0x17e   : > { %v4449_v1 = vpop.f32.mrb[4].mxu1 }
 0x17f   : > { %v4450_v9 = vpop.f32.mrb[5].mxu1 }
 0x180   : > { %v6491_v6 = vadd.f32 %v4450_v9, %v4449_v1  ;;  %v4452_v10 = vpop.f32.mrb[6].mxu1  ;;  %v5618_v1 = vmov 7  }
 0x181   : > { %v4453_v13 = vpop.f32.mrb[7].mxu1  ;;  %5354 = vset.pattern.permute.xlu1 %v5618_v1  ;;  %5353 = vset.pattern.permute.xlu0 %v5618_v1 }
 0x182   : > { %v6493_v14 = vadd.f32 %v4453_v13, %v4452_v10  ;;  %v2265_v10 = vpop.permute.xlu0 %2264  ;;  %3020 = vperm.xlu1 %5354, %v6365_v57   ;;  %3017 = vperm.xlu0 %5353, %v6390_v63  }
 0x183   : > { %vm2310_vm2 = vcmp.eq.s32.totalorder %v2265_v10, %v5939_v37  ;;  %vm2311_vm3 = vcmp.eq.s32.totalorder %v2265_v10, %v5943_v40 }
 0x184   : > { %v631_v17 = vpack.c.bf16 %v6493_v14, %v6491_v6  ;;  %vm4255_vm4 = vmpackc.low %vm2311_vm3, %vm2309_vm0 }
 0x185   : > { %vm4257_vm5 = vmpackc.low %vm2310_vm2, %vm2308_vm1  ;;  %4256 = vmatprep.mubr.msk.bf16.mxu1 %vm4255_vm4, %v5614_v43 }
 0x186   : > { %v4455_v22 = vpop.f32.mrb[8].mxu1  ;;  %4258 = vmatmul.mubr.msk.bf16.vlgmr.msra.gmra.mrb[112].mxu1 %vm4257_vm5, %v5614_v43  ;;  %3023 = vperm.xlu1 %5354, %v6410_v29   ;;  %v1890_v63 = vpop.permute.xlu0 %1889 }
 0x187   : > { %v4456_v23 = vpop.f32.mrb[9].mxu1  ;;  %3026 = vperm.xlu0 %5353, %v6431_v35   ;;  %4842 = vmatpush3.bf16.msra.mxu1 %v6294_v20  ;;  %vm1934_vm9 = vcmp.eq.s32.totalorder %v1890_v63, %v5939_v37  ;;  %vm1935_vm10 = vcmp.eq.s32.totalorder %v1890_v63, %v5943_v40  ;;  %v5529_v35 = vld [vmem:[%s5737_s26 + $0x20] sm:$0xff] }
 0x188   : > { %v6497_v31 = vadd.f32 %v4456_v23, %v4455_v22  ;;  %v4458_v33 = vpop.f32.mrb[10].mxu1  ;;  %v1893_v22 = vpop.permute.xlu1 %1892  ;;  %4843 = vmatprep.subr.bf16.mxu1 %v6300_v21 }
 0x189   : > { %v4459_v56 = vpop.f32.mrb[11].mxu1  ;;  %vm1936_vm6 = vcmp.eq.s32.totalorder %v1893_v22, %v5939_v37  ;;  %vm1937_vm8 = vcmp.eq.s32.totalorder %v1893_v22, %v5943_v40 }
 0x18a   : > { %v6499_v59 = vadd.f32 %v4459_v56, %v4458_v33  ;;  %vm6533_vm11 = vmpackc.low %vm1936_vm6, %vm1934_vm9  ;;  %3029 = vperm.xlu1 %5354, %v5529_v35  }
 0x18b   : > { %vm6538_vm12 = vmpackc.low %vm1937_vm8, %vm1935_vm10  ;;  %3032 = vperm.xlu0 %5353, %v6450_v41   ;;  %4844 = vmatpush3.bf16.msra.mxu1 %v6312_v25 }
 0x18c   : > { %v6526_v57 = vpop.permute.xlu1 %2273  ;;  %4845 = vmatprep.subr.bf16.mxu1 %v6318_v26 }
 0x18d   : > { %vm2317_vm8 = vcmp.eq.s32.totalorder %v6526_v57, %v5943_v40  ;;  %vm2316_vm10 = vcmp.eq.s32.totalorder %v6526_v57, %v5939_v37 }
 0x18e   : > { %v4461_v24 = vpop.f32.mrb[12].mxu1 }
 0x18f   : > { %v4462_v44 = vpop.f32.mrb[13].mxu1  ;;  %3038 = vperm.xlu0 %5353, %v6462_v46   ;;  %4846 = vmatpush3.bf16.msra.mxu1 %v6330_v28 }
 0x190   : > { %v6507_v47 = vadd.f32 %v4462_v44, %v4461_v24  ;;  %v4464_v48 = vpop.f32.mrb[14].mxu1  ;;  %v1896_v1 = vpop.permute.xlu1 %1895  ;;  %4847 = vmatprep.subr.bf16.mxu1 %v6336_v30 }
 0x191   : > { %v4465_v50 = vpop.f32.mrb[15].mxu1  ;;  %vm1939_vm1 = vcmp.eq.s32.totalorder %v1896_v1, %v5943_v40  ;;  %vm1938_vm3 = vcmp.eq.s32.totalorder %v1896_v1, %v5939_v37 }
 0x192   : > { %v6509_v51 = vadd.f32 %v4465_v50, %v4464_v48 }
 0x193   : > { %3044 = vperm.xlu0 %5353, %v6263_v7   ;;  %4848 = vmatpush3.bf16.msra.mxu1 %v6351_v54 }
 0x194   : > { %v1899_v41 = vpop.permute.xlu1 %1898  ;;  %4849 = vmatprep.subr.bf16.mxu1 %v6357_v55 }
 0x195   : > { %vm1940_vm5 = vcmp.eq.s32.totalorder %v1899_v41, %v5939_v37  ;;  %vm1941_vm6 = vcmp.eq.s32.totalorder %v1899_v41, %v5943_v40 }
 0x196   : > { %v4483_v9 = vpop.f32.mrb[16].mxu1  ;;  %vm6567_vm9 = vmpackc.low %vm1941_vm6, %vm1939_vm1 }
 0x197   : > { %v4484_v13 = vpop.f32.mrb[17].mxu1  ;;  %3050 = vperm.xlu0 %5353, %v6273_v15   ;;  %4850 = vmatpush3.bf16.msra.mxu1 %v6371_v58 }
 0x198   : > { %v4485_v23 = vadd.f32 %v4484_v13, %v4483_v9  ;;  %v4486_v33 = vpop.f32.mrb[18].mxu1  ;;  %v2268_v13 = vpop.permute.xlu0 %2267  ;;  %4851 = vmatprep.subr.bf16.mxu1 %v6379_v61 }
 0x199   : > { %v4487_v56 = vpop.f32.mrb[19].mxu1  ;;  %vm2312_vm15 = vcmp.eq.s32.totalorder %v2268_v13, %v5939_v37  ;;  %vm2313_vm0 = vcmp.eq.s32.totalorder %v2268_v13, %v5943_v40  ;;  %v2283_v35 = vpop.permute.xlu1 %2282 }
 0x19a   : > { %v4488_v24 = vadd.f32 %v4487_v56, %v4486_v33  ;;  %vm4259_vm2 = vmpackc.low %vm2315_vm13, %vm2313_vm0  ;;  %v5530_v33 = vld [vmem:[%s5737_s26 + $0x30] sm:$0xff] }
 0x19b   : > { %3035 = vperm.xlu1 %5354, %v5530_v33   ;;  %vm4261_vm4 = vmpackc.low %vm2314_vm14, %vm2312_vm15  ;;  %4260 = vmatprep.mubr.msk.bf16.mxu1 %vm4259_vm2, %v5614_v43  ;;  %v6558_v56 = vld [vmem:[%s7738_s2 + $0x10] sm:$0xff]   ;;  %vm2323_vm2 = vcmp.eq.s32.totalorder %v2283_v35, %v5943_v40 }
 0x19c   : > { %v861_v18 = vpack.c.bf16 %v4488_v24, %v4485_v23  ;;  %4262 = vmatmul.mubr.msk.bf16.gmra.mrb[116].mxu1 %vm4261_vm4, %v5614_v43  ;;  %vm6577_vm13 = vmpackc.low %vm1940_vm5, %vm1938_vm3  ;;  %vm2322_vm3 = vcmp.eq.s32.totalorder %v2283_v35, %v5939_v37  ;;  %3056 = vperm.xlu0 %5353, %v6323_v27  }
 0x19d   : > { %4852 = vmatpush3.bf16.msra.mxu1 %v6400_v8 }
 0x19e   : > { %v4489_v29 = vpop.f32.mrb[20].mxu1  ;;  %4989 = vmatprep.mubr.msk.bf16.mxu0 %vm7743_vm7, %v861_v18  ;;  %v2277_v18 = vpop.permute.xlu0 %2276  ;;  %4853 = vmatprep.subr.bf16.mxu1 %v6406_v12 }
 0x19f   : > { %v4490_v50 = vpop.f32.mrb[21].mxu1  ;;  %3041 = vperm.xlu1 %5354, %v6255_v11   ;;  %vm2318_vm14 = vcmp.eq.s32.totalorder %v2277_v18, %v5939_v37  ;;  %vm2319_vm15 = vcmp.eq.s32.totalorder %v2277_v18, %v5943_v40 }
 0x1a0   : > { %v4491_v9 = vadd.f32 %v4490_v50, %v4489_v29  ;;  %v4492_v10 = vpop.f32.mrb[22].mxu1  ;;  %vm4263_vm0 = vmpackc.low %vm2319_vm15, %vm2317_vm8  ;;  %3062 = vperm.xlu0 %5353, %v6345_v53  }
 0x1a1   : > { %v4493_v22 = vpop.f32.mrb[23].mxu1  ;;  %vm4265_vm1 = vmpackc.low %vm2318_vm14, %vm2316_vm10  ;;  %4264 = vmatprep.mubr.msk.bf16.mxu1 %vm4263_vm0, %v5614_v43  ;;  %4854 = vmatpush3.bf16.msra.mxu1 %v6421_v34 }
 0x1a2   : > { %v4494_v23 = vadd.f32 %v4493_v22, %v4492_v10  ;;  %v2280_v10 = vpop.permute.xlu0 %2279  ;;  %4855 = vmatprep.subr.bf16.mxu1 %v6427_v32 }
 0x1a3   : > { %3047 = vperm.xlu1 %5354, %v6454_v42   ;;  %vm2320_vm4 = vcmp.eq.s32.totalorder %v2280_v10, %v5939_v37  ;;  %vm2321_vm5 = vcmp.eq.s32.totalorder %v2280_v10, %v5943_v40 }
 0x1a4   : > { %v862_v2 = vpack.c.bf16 %v4494_v23, %v4491_v9  ;;  %4266 = vmatmul.mubr.msk.bf16.gmra.mrb[120].mxu1 %vm4265_vm1, %v5614_v43  ;;  %vm4267_vm6 = vmpackc.low %vm2323_vm2, %vm2321_vm5 }
 0x1a5   : > { %vm4269_vm8 = vmpackc.low %vm2322_vm3, %vm2320_vm4  ;;  %4268 = vmatprep.mubr.msk.bf16.mxu1 %vm4267_vm6, %v5614_v43  ;;  %4856 = vmatpush3.bf16.msra.mxu1 %v6440_v38 }
 0x1a6   : > { %v4495_v46 = vpop.f32.mrb[24].mxu1  ;;  %4990 = vmatmul.mubr.msk.bf16.vlgmr.msra.gmra.mrb[16].mxu0 %vm7743_vm7, %v862_v2  ;;  %v2289_v35 = vpop.permute.xlu0 %2288  ;;  %4914 = vmatprep.subr.bf16.mxu1 %v6446_v39 }
 0x1a7   : > { %v4496_v29 = vpop.f32.mrb[25].mxu1  ;;  %5006 = vmatpush3.bf16.msra.mxu0 %v6387_v62  ;;  %v6598_v62 = vpop.permute.xlu1 %1904  ;;  %3053 = vperm.xlu1 %5354, %v6286_v19   ;;  %vm2326_vm15 = vcmp.eq.s32.totalorder %v2289_v35, %v5939_v37  ;;  %vm2327_vm0 = vcmp.eq.s32.totalorder %v2289_v35, %v5943_v40 }
 0x1a8   : > { %v4497_v50 = vadd.f32 %v4496_v29, %v4495_v46  ;;  %v4498_v9 = vpop.f32.mrb[26].mxu1  ;;  %5023 = vmatprep.subr.bf16.mxu0 %v6558_v56  ;;  %vm1945_vm4 = vcmp.eq.s32.totalorder %v6598_v62, %v5943_v40 }
 0x1a9   : > { %v4499_v11 = vpop.f32.mrb[27].mxu1 }
 0x1aa   : > { %v4500_v7 = vadd.f32 %v4499_v11, %v4498_v9  ;;  %v1902_v10 = vpop.permute.xlu0 %1901 }
 0x1ab   : > { %v2286_v13 = vpop.permute.xlu1 %2285  ;;  %3059 = vperm.xlu1 %5354, %v6470_v49  }
 0x1ac   : > { %v863_v1 = vpack.c.bf16 %v4500_v7, %v4497_v50  ;;  %vm2325_vm10 = vcmp.eq.s32.totalorder %v2286_v13, %v5943_v40  ;;  %4270 = vmatmul.mubr.msk.bf16.gmra.mrb[124].mxu1 %vm4269_vm8, %v5614_v43  ;;  %vm2324_vm14 = vcmp.eq.s32.totalorder %v2286_v13, %v5939_v37 }
 0x1ad   : > { %vm4271_vm2 = vmpackc.low %vm2327_vm0, %vm2325_vm10  ;;  %vm1944_vm10 = vcmp.eq.s32.totalorder %v6598_v62, %v5939_v37  ;;  %v7767_v62 = vmov 0 }
 0x1ae   : > { %v4501_v57 = vpop.f32.mrb[28].mxu1  ;;  %4993 = vmatprep.mubr.msk.bf16.mxu0 %vm7743_vm7, %v863_v1  ;;  %4272 = vmatprep.mubr.msk.bf16.mxu1 %vm4271_vm2, %v5614_v43  ;;  %vm6643_vm5 = vmpackc.low %vm2326_vm15, %vm2324_vm14  ;;  %vm1942_vm14 = vcmp.eq.s32.totalorder %v1902_v10, %v5939_v37  ;;  %vm1943_vm15 = vcmp.eq.s32.totalorder %v1902_v10, %v5943_v40 }
 0x1af   : > { %v4502_v42 = vpop.f32.mrb[29].mxu1  ;;  %v1908_v46 = vpop.permute.xlu1 %1907 }
 0x1b0   : > { %v4503_v15 = vadd.f32 %v4502_v42, %v4501_v57  ;;  %v4504_v22 = vpop.f32.mrb[30].mxu1  ;;  %vm1947_vm1 = vcmp.eq.s32.totalorder %v1908_v46, %v5943_v40  ;;  %vm1946_vm3 = vcmp.eq.s32.totalorder %v1908_v46, %v5939_v37 }
 0x1b1   : > { %v4505_v23 = vpop.f32.mrb[31].mxu1  ;;  %v4419_v33 = vpop.f32.mrb[0].mxu0 }
 0x1b2   : > { %v4506_v19 = vadd.f32 %v4505_v23, %v4504_v22  ;;  %v4420_v41 = vpop.f32.mrb[1].mxu0  ;;  %v7765_v22 = vmov 0 }
 0x1b3   : > { %v6617_v27 = vadd.f32 %v4420_v41, %v4419_v33  ;;  %v4422_v2 = vpop.f32.mrb[2].mxu0  ;;  %v1911_v11 = vpop.permute.xlu1 %1910  ;;  %v7769_v33 = vmov 0 }
 0x1b4   : > { %v864_v18 = vpack.c.bf16 %v4506_v19, %v4503_v15  ;;  %v4423_v29 = vpop.f32.mrb[3].mxu0  ;;  %vm1948_vm6 = vcmp.eq.s32.totalorder %v1911_v11, %v5939_v37  ;;  %vm1949_vm8 = vcmp.eq.s32.totalorder %v1911_v11, %v5943_v40  ;;  %v7763_v15 = vmov 0  ;;  %4274 = vmatmul.mubr.msk.bf16.gmra.mrb[128].mxu1 %vm6643_vm5, %v5614_v43  ;;  %v1914_v41 = vpop.permute.xlu0 %1913 }
 0x1b5   : > { %v6622_v50 = vadd.f32 %v4423_v29, %v4422_v2  ;;  %vm6653_vm0 = vmpackc.low %vm1949_vm8, %vm1947_vm1 }
 0x1b6   : > { %v4507_v49 = vpop.f32.mrb[32].mxu1  ;;  %4994 = vmatmul.mubr.msk.bf16.gmra.mrb[20].mxu0 %vm7743_vm7, %v864_v18  ;;  %v7764_v15 = vsel %vm6653_vm0, 4294967295, %v7763_v15  ;;  %vm6662_vm2 = vmpackc.low %vm1948_vm6, %vm1946_vm3  ;;  %vm7771_vm3 = vcmask 130048   ;;  %vm1950_vm6 = vcmp.eq.s32.totalorder %v1914_v41, %v5939_v37 }
 0x1b7   : > { %v4508_v53 = vpop.f32.mrb[33].mxu1  ;;  %v626_v9 = vpack.c.bf16 %v6622_v50, %v6617_v27  ;;  %v7766_v22 = vsel %vm6662_vm2, 4294967295, %v7765_v22  ;;  %vm6667_vm7 = vmpackc.low %vm1945_vm4, %vm1943_vm15  ;;  %v2295_v19 = vpop.permute.xlu1 %2294  ;;  %vm1951_vm4 = vcmp.eq.s32.totalorder %v1914_v41, %v5943_v40  ;;  %v7786_v50 = vmov 0 }
 0x1b8   : > { %v4509_v7 = vadd.f32 %v4508_v53, %v4507_v49  ;;  %v4510_v1 = vpop.f32.mrb[34].mxu1  ;;  %v7768_v62 = vsel %vm6667_vm7, 4294967295, %v7767_v62  ;;  %vm6671_vm1 = vmpackc.low %vm1944_vm10, %vm1942_vm14  ;;  %vm2331_vm5 = vcmp.eq.s32.totalorder %v2295_v19, %v5943_v40  ;;  %vm2330_vm14 = vcmp.eq.s32.totalorder %v2295_v19, %v5939_v37 }
 0x1b9   : > { %v4511_v42 = vpop.f32.mrb[35].mxu1  ;;  %v7770_v33 = vsel %vm6671_vm1, 4294967295, %v7769_v33  ;;  %vm7776_vm1 = vcmask 130048  }
 0x1ba   : > { %v4512_v13 = vadd.f32 %v4511_v42, %v4510_v1 }
 0x1bb   : > { %v1917_v57 = vpop.permute.xlu1 %1916 }
 0x1bc   : > { %v865_v23 = vpack.c.bf16 %v4512_v13, %v4509_v7  ;;  %vm1952_vm8 = vcmp.eq.s32.totalorder %v1917_v57, %v5939_v37  ;;  %vm1953_vm10 = vcmp.eq.s32.totalorder %v1917_v57, %v5943_v40  ;;  %v2292_v13 = vpop.permute.xlu0 %2291 }
 0x1bd   : > { %vm6689_vm15 = vmpackc.low %vm1953_vm10, %vm1951_vm4  ;;  %vm2329_vm2 = vcmp.eq.s32.totalorder %v2292_v13, %v5943_v40 }
 0x1be   : > { %v4513_v2 = vpop.f32.mrb[36].mxu1  ;;  %4997 = vmatprep.mubr.msk.bf16.mxu0 %vm7771_vm3, %v865_v23  ;;  %vm2328_vm3 = vcmp.eq.s32.totalorder %v2292_v13, %v5939_v37  ;;  %vm6697_vm0 = vmpackc.low %vm1952_vm8, %vm1950_vm6 }
 0x1bf   : > { %v4514_v46 = vpop.f32.mrb[37].mxu1  ;;  %v4425_v18 = vpop.f32.mrb[4].mxu0  ;;  %vm4275_vm7 = vmpackc.low %vm2331_vm5, %vm2329_vm2 }
 0x1c0   : > { %v4515_v29 = vadd.f32 %v4514_v46, %v4513_v2  ;;  %v4516_v35 = vpop.f32.mrb[38].mxu1  ;;  %v4426_v49 = vpop.f32.mrb[5].mxu0  ;;  %v7774_v46 = vmov 0  ;;  %vm4277_vm4 = vmpackc.low %vm2330_vm14, %vm2328_vm3  ;;  %4276 = vmatprep.mubr.msk.bf16.mxu1 %vm4275_vm7, %v5614_v43  ;;  %vm7777_vm14 = vcmask 130048  }
 0x1c1   : > { %v4517_v53 = vpop.f32.mrb[39].mxu1  ;;  %v6679_v11 = vadd.f32 %v4426_v49, %v4425_v18  ;;  %v4428_v7 = vpop.f32.mrb[6].mxu0  ;;  %v7775_v46 = vsel %vm6697_vm0, 4294967295, %v7774_v46  ;;  %4278 = vmatmul.mubr.msk.bf16.gmra.mrb[132].mxu1 %vm4277_vm4, %v5614_v43 }
 0x1c2   : > { %v4518_v1 = vadd.f32 %v4517_v53, %v4516_v35  ;;  %v4429_v10 = vpop.f32.mrb[7].mxu0  ;;  %v2298_v19 = vpop.permute.xlu1 %2297 }
 0x1c3   : > { %v6683_v42 = vadd.f32 %v4429_v10, %v4428_v7  ;;  %vm2333_vm10 = vcmp.eq.s32.totalorder %v2298_v19, %v5943_v40  ;;  %v2301_v35 = vpop.permute.xlu0 %2300  ;;  %vm2332_vm2 = vcmp.eq.s32.totalorder %v2298_v19, %v5939_v37 }
 0x1c4   : > { %v866_v23 = vpack.c.bf16 %v4518_v1, %v4515_v29  ;;  %vm2335_vm6 = vcmp.eq.s32.totalorder %v2301_v35, %v5943_v40 }
 0x1c5   : > { %v627_v41 = vpack.c.bf16 %v6683_v42, %v6679_v11  ;;  %vm4279_vm8 = vmpackc.low %vm2335_vm6, %vm2333_vm10 }
 0x1c6   : > { %v4519_v18 = vpop.f32.mrb[40].mxu1  ;;  %4998 = vmatmul.mubr.msk.bf16.gmra.mrb[24].mxu0 %vm7776_vm1, %v866_v23  ;;  %v1920_v13 = vpop.permute.xlu1 %1919  ;;  %vm2334_vm1 = vcmp.eq.s32.totalorder %v2301_v35, %v5939_v37  ;;  %4280 = vmatprep.mubr.msk.bf16.mxu1 %vm4279_vm8, %v5614_v43 }
 0x1c7   : > { %v4520_v29 = vpop.f32.mrb[41].mxu1  ;;  %vm1955_vm7 = vcmp.eq.s32.totalorder %v1920_v13, %v5943_v40  ;;  %vm4281_vm5 = vmpackc.low %vm2334_vm1, %vm2332_vm2  ;;  %vm1954_vm3 = vcmp.eq.s32.totalorder %v1920_v13, %v5939_v37 }
 0x1c8   : > { %v4521_v49 = vadd.f32 %v4520_v29, %v4519_v18  ;;  %v4522_v53 = vpop.f32.mrb[42].mxu1 }
 0x1c9   : > { %v4523_v7 = vpop.f32.mrb[43].mxu1  ;;  %v4431_v1 = vpop.f32.mrb[8].mxu0  ;;  %4282 = vmatmul.mubr.msk.bf16.gmra.mrb[136].mxu1 %vm4281_vm5, %v5614_v43 }
 0x1ca   : > { %v4524_v10 = vadd.f32 %v4523_v7, %v4522_v53  ;;  %v4432_v57 = vpop.f32.mrb[9].mxu0  ;;  %v1923_v19 = vpop.permute.xlu1 %1922 }
 0x1cb   : > { %v6709_v23 = vadd.f32 %v4432_v57, %v4431_v1  ;;  %v4434_v18 = vpop.f32.mrb[10].mxu0  ;;  %vm1956_vm4 = vcmp.eq.s32.totalorder %v1923_v19, %v5939_v37  ;;  %vm1957_vm10 = vcmp.eq.s32.totalorder %v1923_v19, %v5943_v40  ;;  %v7778_v1 = vmov 0 }
 0x1cc   : > { %v867_v29 = vpack.c.bf16 %v4524_v10, %v4521_v49  ;;  %v4435_v36 = vpop.f32.mrb[11].mxu0  ;;  %v2304_v49 = vpop.permute.xlu0 %2303  ;;  %vm6720_vm6 = vmpackc.low %vm1957_vm10, %vm1955_vm7  ;;  %v7780_v57 = vmov 0 }
 0x1cd   : > { %v6711_v0 = vadd.f32 %v4435_v36, %v4434_v18  ;;  %v7779_v1 = vsel %vm6720_vm6, 4294967295, %v7778_v1  ;;  %vm6725_vm8 = vmpackc.low %vm1956_vm4, %vm1954_vm3  ;;  %vm2337_vm2 = vcmp.eq.s32.totalorder %v2304_v49, %v5943_v40  ;;  %vm2336_vm1 = vcmp.eq.s32.totalorder %v2304_v49, %v5939_v37 }
 0x1ce   : > { %v4525_v3 = vpop.f32.mrb[44].mxu1  ;;  %5001 = vmatprep.mubr.msk.bf16.mxu0 %vm7777_vm14, %v867_v29  ;;  %v7781_v57 = vsel %vm6725_vm8, 4294967295, %v7780_v57  ;;  %v2307_v13 = vpop.permute.xlu1 %2306  ;;  %vm7782_vm3 = vcmask 130048  }
 0x1cf   : > { %v4526_v53 = vpop.f32.mrb[45].mxu1  ;;  %v628_v35 = vpack.c.bf16 %v6711_v0, %v6709_v23  ;;  %vm2338_vm14 = vcmp.eq.s32.totalorder %v2307_v13, %v5939_v37  ;;  %vm2339_vm7 = vcmp.eq.s32.totalorder %v2307_v13, %v5943_v40  ;;  %vm7783_vm8 = vmmov %vm7782_vm3 }
 0x1d0   : > { %v4527_v36 = vadd.f32 %v4526_v53, %v4525_v3  ;;  %v4528_v7 = vpop.f32.mrb[46].mxu1  ;;  %v1926_v3 = vpop.permute.xlu0 %1925  ;;  %vm4283_vm10 = vmpackc.low %vm2339_vm7, %vm2337_vm2 }
 0x1d1   : > { %v4529_v10 = vpop.f32.mrb[47].mxu1  ;;  %vm4285_vm6 = vmpackc.low %vm2338_vm14, %vm2336_vm1  ;;  %4284 = vmatprep.mubr.msk.bf16.mxu1 %vm4283_vm10, %v5614_v43  ;;  %vm1959_vm5 = vcmp.eq.s32.totalorder %v1926_v3, %v5943_v40  ;;  %vm1958_vm4 = vcmp.eq.s32.totalorder %v1926_v3, %v5939_v37 }
 0x1d2   : > { %v4530_v0 = vadd.f32 %v4529_v10, %v4528_v7  ;;  %v1929_v29 = vpop.permute.xlu1 %1928  ;;  %4286 = vmatmul.mubr.msk.bf16.gmra.mrb[140].mxu1 %vm4285_vm6, %v5614_v43 }
 0x1d3   : > { %vm1960_vm0 = vcmp.eq.s32.totalorder %v1929_v29, %v5939_v37  ;;  %vm1961_vm2 = vcmp.eq.s32.totalorder %v1929_v29, %v5943_v40 }
 0x1d4   : > { %v868_v23 = vpack.c.bf16 %v4530_v0, %v4527_v36  ;;  %v2643_v53 = vpop.permute.xlu0 %2642  ;;  %vm6746_vm1 = vmpackc.low %vm1961_vm2, %vm1959_vm5 }
 0x1d5   : > { %vm6750_vm14 = vmpackc.low %vm1960_vm0, %vm1958_vm4  ;;  %vm2688_vm7 = vcmp.eq.s32.totalorder %v2643_v53, %v5939_v37 }
 0x1d6   : > { %5002 = vmatmul.mubr.msk.bf16.gmra.mrb[28].mxu0 %vm7782_vm3, %v868_v23  ;;  %v4565_v18 = vpop.f32.mrb[48].mxu1  ;;  %v7787_v50 = vsel %vm6750_vm14, 4294967295, %v7786_v50  ;;  %v2640_v23 = vpop.permute.xlu1 %2639  ;;  %vm7788_vm4 = vmmov %vm7782_vm3  ;;  %vm7799_vm14 = vcmask 130048  }
 0x1d7   : > { %5007 = vmatprep.mubr.msk.bf16.mxu0 %vm7783_vm8, %v626_v9  ;;  %v4566_v19 = vpop.f32.mrb[49].mxu1  ;;  %vm2689_vm8 = vcmp.eq.s32.totalorder %v2643_v53, %v5943_v40  ;;  %vm2686_vm6 = vcmp.eq.s32.totalorder %v2640_v23, %v5939_v37  ;;  %vm2687_vm10 = vcmp.eq.s32.totalorder %v2640_v23, %v5943_v40 }
 0x1d8   : > { %v6743_v49 = vadd.f32 %v4566_v19, %v4565_v18  ;;  %v4568_v36 = vpop.f32.mrb[50].mxu1  ;;  %v4437_v7 = vpop.f32.mrb[12].mxu0  ;;  %vm4296_vm0 = vmpackc.low %vm2689_vm8, %vm2687_vm10 }
 0x1d9   : > { %v4569_v0 = vpop.f32.mrb[51].mxu1  ;;  %v4438_v27 = vpop.f32.mrb[13].mxu0  ;;  %vm4298_vm5 = vmpackc.low %vm2688_vm7, %vm2686_vm6  ;;  %4297 = vmatprep.mubr.msk.bf16.mxu1 %vm4296_vm0, %v5614_v43 }
 0x1da   : > { %v6755_v9 = vadd.f32 %v4569_v0, %v4568_v36  ;;  %v4439_v13 = vadd.f32 %v4438_v27, %v4437_v7  ;;  %v4440_v3 = vpop.f32.mrb[14].mxu0  ;;  %v2646_v7 = vpop.permute.xlu1 %2645  ;;  %4299 = vmatmul.mubr.msk.bf16.vlgmr.msra.gmra.mrb[144].mxu1 %vm4298_vm5, %v5614_v43  ;;  %vm7789_vm5 = vmmov %vm7782_vm3 }
 0x1db   : > { %v4441_v18 = vpop.f32.mrb[15].mxu0  ;;  %vm2691_vm2 = vcmp.eq.s32.totalorder %v2646_v7, %v5943_v40  ;;  %4915 = vmatpush3.bf16.msra.mxu1 %v6294_v20  ;;  %vm2690_vm8 = vcmp.eq.s32.totalorder %v2646_v7, %v5939_v37 }
 0x1dc   : > { %v1351_v29 = vpack.c.bf16 %v6755_v9, %v6743_v49  ;;  %v4442_v19 = vadd.f32 %v4441_v18, %v4440_v3  ;;  %4916 = vmatprep.subr.bf16.mxu1 %v6300_v21 }
 0x1de   : > { %5008 = vmatmul.mubr.msk.bf16.vlgmr.msra.gmra.mrb[16].mxu0 %vm7782_vm3, %v627_v41  ;;  %v4571_v53 = vpop.f32.mrb[52].mxu1  ;;  %v629_v36 = vpack.c.bf16 %v4442_v19, %v4439_v13  ;;  %v2649_v42 = vpop.permute.xlu1 %2648  ;;  %v7791_v19 = vpack.c.bf16 %v6499_v59, %v6497_v31 }
 0x1df   : > { %v4572_v0 = vpop.f32.mrb[53].mxu1  ;;  %5011 = vmatprep.mubr.msk.bf16.mxu0 %vm7788_vm4, %v628_v35  ;;  %5024 = vmatpush3.bf16.msra.mxu0 %v6558_v56  ;;  %vm2692_vm7 = vcmp.eq.s32.totalorder %v2649_v42, %v5939_v37  ;;  %vm2693_vm6 = vcmp.eq.s32.totalorder %v2649_v42, %v5943_v40  ;;  %v2652_v35 = vpop.permute.xlu0 %2651 }
 0x1e0   : > { %v6774_v27 = vadd.f32 %v4572_v0, %v4571_v53  ;;  %v4574_v3 = vpop.f32.mrb[54].mxu1  ;;  %5041 = vmatprep.subr.bf16.mxu0 %v6765_v16  ;;  %vm4300_vm10 = vmpackc.low %vm2693_vm6, %vm2691_vm2  ;;  %4917 = vmatpush3.bf16.msra.mxu1 %v6312_v25  ;;  %vm2695_vm2 = vcmp.eq.s32.totalorder %v2652_v35, %v5943_v40  ;;  %vm2694_vm6 = vcmp.eq.s32.totalorder %v2652_v35, %v5939_v37 }
 0x1e1   : > { %v4575_v23 = vpop.f32.mrb[55].mxu1  ;;  %vm4302_vm0 = vmpackc.low %vm2692_vm7, %vm2690_vm8  ;;  %4301 = vmatprep.mubr.msk.bf16.mxu1 %vm4300_vm10, %v5614_v43  ;;  %4918 = vmatprep.subr.bf16.mxu1 %v6318_v26 }
 0x1e2   : > { %v6780_v11 = vadd.f32 %v4575_v23, %v4574_v3  ;;  %v2655_v41 = vpop.permute.xlu1 %2654  ;;  %4303 = vmatmul.mubr.msk.bf16.gmra.mrb[148].mxu1 %vm4302_vm0, %v5614_v43 }
 0x1e3   : > { %vm2697_vm4 = vcmp.eq.s32.totalorder %v2655_v41, %v5943_v40  ;;  %vm2696_vm7 = vcmp.eq.s32.totalorder %v2655_v41, %v5939_v37 }
 0x1e4   : > { %v1352_v56 = vpack.c.bf16 %v6780_v11, %v6774_v27  ;;  %vm4304_vm8 = vmpackc.low %vm2697_vm4, %vm2695_vm2  ;;  %4919 = vmatpush3.bf16.msra.mxu1 %v6330_v28 }
 0x1e5   : > { %4305 = vmatprep.mubr.msk.bf16.mxu1 %vm4304_vm8, %v5614_v43  ;;  %4920 = vmatprep.subr.bf16.mxu1 %v6336_v30  ;;  %vm4306_vm10 = vmpackc.low %vm2696_vm7, %vm2694_vm6 }
 0x1e6   : > { %5012 = vmatmul.mubr.msk.bf16.gmra.mrb[20].mxu0 %vm7789_vm5, %v629_v36  ;;  %v4577_v20 = vpop.f32.mrb[56].mxu1  ;;  %v2661_v52 = vpop.permute.xlu1 %2660  ;;  %vm7790_vm5 = vmmov %vm7782_vm3 }
 0x1e7   : > { %5015 = vmatprep.mubr.msk.bf16.mxu0 %vm7782_vm3, %v630_v5  ;;  %v4578_v21 = vpop.f32.mrb[57].mxu1  ;;  %vm2701_vm0 = vcmp.eq.s32.totalorder %v2661_v52, %v5943_v40  ;;  %v2658_v5 = vpop.permute.xlu0 %2657  ;;  %vm2700_vm8 = vcmp.eq.s32.totalorder %v2661_v52, %v5939_v37 }
 0x1e8   : > { %v6797_v13 = vadd.f32 %v4578_v21, %v4577_v20  ;;  %v4580_v18 = vpop.f32.mrb[58].mxu1  ;;  %4921 = vmatpush3.bf16.msra.mxu1 %v6351_v54  ;;  %vm2699_vm4 = vcmp.eq.s32.totalorder %v2658_v5, %v5943_v40  ;;  %vm2698_vm7 = vcmp.eq.s32.totalorder %v2658_v5, %v5939_v37 }
 0x1e9   : > { %v4581_v25 = vpop.f32.mrb[59].mxu1  ;;  %4922 = vmatprep.subr.bf16.mxu1 %v6357_v55  ;;  %vm4308_vm2 = vmpackc.low %vm2701_vm0, %vm2699_vm4 }
 0x1ea   : > { %v4582_v26 = vadd.f32 %v4581_v25, %v4580_v18  ;;  %4307 = vmatmul.mubr.msk.bf16.gmra.mrb[152].mxu1 %vm4306_vm10, %v5614_v43  ;;  %v2667_v55 = vpop.permute.xlu1 %2666  ;;  %vm4310_vm6 = vmpackc.low %vm2700_vm8, %vm2698_vm7 }
 0x1eb   : > { %4309 = vmatprep.mubr.msk.bf16.mxu1 %vm4308_vm2, %v5614_v43  ;;  %vm7793_vm10 = vmmov %vm7782_vm3  ;;  %v2664_v31 = vpop.permute.xlu0 %2663  ;;  %vm2704_vm2 = vcmp.eq.s32.totalorder %v2667_v55, %v5939_v37 }
 0x1ec   : > { %v1353_v4 = vpack.c.bf16 %v4582_v26, %v6797_v13  ;;  %4923 = vmatpush3.bf16.msra.mxu1 %v6371_v58  ;;  %vm7794_vm0 = vmmov %vm7782_vm3  ;;  %vm2702_vm8 = vcmp.eq.s32.totalorder %v2664_v31, %v5939_v37 }
 0x1ed   : > { %4924 = vmatprep.subr.bf16.mxu1 %v6379_v61  ;;  %vm4314_vm7 = vmpackc.low %vm2704_vm2, %vm2702_vm8 }
 0x1ee   : > { %5016 = vmatmul.mubr.msk.bf16.gmra.mrb[24].mxu0 %vm7790_vm5, %v631_v17  ;;  %v4583_v28 = vpop.f32.mrb[60].mxu1  ;;  %vm2705_vm5 = vcmp.eq.s32.totalorder %v2667_v55, %v5943_v40  ;;  %v7792_v17 = vpack.c.bf16 %v6509_v51, %v6507_v47 }
 0x1ef   : > { %5019 = vmatprep.mubr.msk.bf16.mxu0 %vm7782_vm3, %v7791_v19  ;;  %v4584_v30 = vpop.f32.mrb[61].mxu1  ;;  %vm2703_vm3 = vcmp.eq.s32.totalorder %v2664_v31, %v5943_v40 }
 0x1f0   : > { %v4585_v53 = vadd.f32 %v4584_v30, %v4583_v28  ;;  %v4586_v36 = vpop.f32.mrb[62].mxu1  ;;  %4925 = vmatpush3.bf16.msra.mxu1 %v6400_v8  ;;  %vm4312_vm4 = vmpackc.low %vm2705_vm5, %vm2703_vm3 }
 0x1f1   : > { %v4587_v54 = vpop.f32.mrb[63].mxu1  ;;  %4926 = vmatprep.subr.bf16.mxu1 %v6406_v12  ;;  %v2673_v12 = vpop.permute.xlu1 %2672  ;;  %vm7796_vm5 = vmmov %vm7794_vm0 }
 0x1f2   : > { %v4588_v6 = vadd.f32 %v4587_v54, %v4586_v36  ;;  %4311 = vmatmul.mubr.msk.bf16.gmra.mrb[156].mxu1 %vm4310_vm6, %v5614_v43  ;;  %vm7795_vm6 = vmmov %vm7794_vm0 }
 0x1f3   : > { %4313 = vmatprep.mubr.msk.bf16.mxu1 %vm4312_vm4, %v5614_v43  ;;  %vm2708_vm4 = vcmp.eq.s32.totalorder %v2673_v12, %v5939_v37 }
 0x1f4   : > { %v1354_v14 = vpack.c.bf16 %v4588_v6, %v4585_v53  ;;  %4927 = vmatpush3.bf16.msra.mxu1 %v6421_v34  ;;  %v2670_v34 = vpop.permute.xlu0 %2669 }
 0x1f5   : > { %4928 = vmatprep.subr.bf16.mxu1 %v6427_v32  ;;  %vm2706_vm2 = vcmp.eq.s32.totalorder %v2670_v34, %v5939_v37  ;;  %v2679_v27 = vpop.permute.xlu1 %2678 }
 0x1f6   : > { %5020 = vmatmul.mubr.msk.bf16.gmra.mrb[28].mxu0 %vm7793_vm10, %v7792_v17  ;;  %v4589_v58 = vpop.f32.mrb[64].mxu1  ;;  %vm2709_vm10 = vcmp.eq.s32.totalorder %v2673_v12, %v5943_v40  ;;  %vm4318_vm8 = vmpackc.low %vm2708_vm4, %vm2706_vm2 }
 0x1f7   : > { %v4590_v59 = vpop.f32.mrb[65].mxu1  ;;  %5025 = vmatprep.mubr.msk.bf16.mxu0 %vm7794_vm0, %v1351_v29  ;;  %vm2707_vm0 = vcmp.eq.s32.totalorder %v2670_v34, %v5943_v40 }
 0x1f8   : > { %v4591_v61 = vadd.f32 %v4590_v59, %v4589_v58  ;;  %v4592_v7 = vpop.f32.mrb[66].mxu1  ;;  %4929 = vmatpush3.bf16.msra.mxu1 %v6440_v38  ;;  %vm4316_vm3 = vmpackc.low %vm2709_vm10, %vm2707_vm0 }
 0x1f9   : > { %v4593_v8 = vpop.f32.mrb[67].mxu1  ;;  %v2685_v41 = vpop.permute.xlu1 %2684 }
 0x1fa   : > { %v4594_v47 = vadd.f32 %v4593_v8, %v4592_v7  ;;  %4315 = vmatmul.mubr.msk.bf16.gmra.mrb[160].mxu1 %vm4314_vm7, %v5614_v43  ;;  %vm7797_vm7 = vmmov %vm7796_vm5 }
 0x1fb   : > { %4317 = vmatprep.mubr.msk.bf16.mxu1 %vm4316_vm3, %v5614_v43  ;;  %vm2712_vm3 = vcmp.eq.s32.totalorder %v2679_v27, %v5939_v37 }
 0x1fc   : > { %v1355_v51 = vpack.c.bf16 %v4594_v47, %v4591_v61 }
 0x1fe   : > { %v4595_v49 = vpop.f32.mrb[68].mxu1  ;;  %5026 = vmatmul.mubr.msk.bf16.vlgmr.msra.gmra.mrb[16].mxu0 %vm7795_vm6, %v1352_v56  ;;  %vm2713_vm6 = vcmp.eq.s32.totalorder %v2679_v27, %v5943_v40  ;;  %v5532_v27 = vld [vmem:[%s7737_s1 + $0x48] sm:$0xff]  }
 0x1ff   : > { %v4596_v9 = vpop.f32.mrb[69].mxu1  ;;  %5029 = vmatprep.mubr.msk.bf16.mxu0 %vm7796_vm5, %v1353_v4  ;;  %5042 = vmatpush3.bf16.msra.mxu0 %v6765_v16 }
 0x200   : > { %v4597_v32 = vadd.f32 %v4596_v9, %v4595_v49  ;;  %v4598_v29 = vpop.f32.mrb[70].mxu1  ;;  %4695 = vmatprep.subr.bf16.mxu0 %v6446_v39  ;;  %v2676_v39 = vpop.permute.xlu0 %2675 }
 0x201   : > { %v4599_v38 = vpop.f32.mrb[71].mxu1  ;;  %vm2711_vm10 = vcmp.eq.s32.totalorder %v2676_v39, %v5943_v40  ;;  %vm2710_vm4 = vcmp.eq.s32.totalorder %v2676_v39, %v5939_v37  ;;  %v3021_v5 = vpop.permute.xlu1 %3020 }
 0x202   : > { %v4600_v0 = vadd.f32 %v4599_v38, %v4598_v29  ;;  %4319 = vmatmul.mubr.msk.bf16.gmra.mrb[164].mxu1 %vm4318_vm8, %v5614_v43  ;;  %vm4320_vm0 = vmpackc.low %vm2713_vm6, %vm2711_vm10 }
 0x203   : > { %4321 = vmatprep.mubr.msk.bf16.mxu1 %vm4320_vm0, %v5614_v43  ;;  %vm4322_vm2 = vmpackc.low %vm2712_vm3, %vm2710_vm4  ;;  %vm2716_vm0 = vcmp.eq.s32.totalorder %v2685_v41, %v5939_v37 }
 0x204   : > { %v1356_v3 = vpack.c.bf16 %v4600_v0, %v4597_v32  ;;  %v2682_v13 = vpop.permute.xlu0 %2681  ;;  %vm7798_vm8 = vmmov %vm7797_vm7  ;;  %v5531_v32 = vld [vmem:[%s7737_s1] sm:$0xff]  }
 0x205   : > { %vm2715_vm6 = vcmp.eq.s32.totalorder %v2682_v13, %v5943_v40  ;;  %vm2714_vm3 = vcmp.eq.s32.totalorder %v2682_v13, %v5939_v37  ;;  %v3024_v55 = vpop.permute.xlu1 %3023 }
 0x206   : > { %v4601_v16 = vpop.f32.mrb[72].mxu1  ;;  %5030 = vmatmul.mubr.msk.bf16.gmra.mrb[20].mxu0 %vm7796_vm5, %v1354_v14  ;;  %vm2717_vm5 = vcmp.eq.s32.totalorder %v2685_v41, %v5943_v40  ;;  %vm4326_vm4 = vmpackc.low %vm2716_vm0, %vm2714_vm3  ;;  %vm3069_vm0 = vcmp.eq.s32.totalorder %v3024_v55, %v5943_v40  ;;  %v5535_v41 = vld [vmem:[%s7737_s1 + $0x10] sm:$0xff]  }
 0x207   : > { %v4602_v23 = vpop.f32.mrb[73].mxu1  ;;  %5033 = vmatprep.mubr.msk.bf16.mxu0 %vm7797_vm7, %v1355_v51  ;;  %vm4324_vm10 = vmpackc.low %vm2717_vm5, %vm2715_vm6  ;;  %vm3066_vm6 = vcmp.eq.s32.totalorder %v3021_v5, %v5939_v37 }
 0x208   : > { %v4603_v11 = vadd.f32 %v4602_v23, %v4601_v16  ;;  %v4604_v42 = vpop.f32.mrb[74].mxu1  ;;  %v3018_v30 = vpop.permute.xlu0 %3017  ;;  %v5533_v23 = vld [vmem:[%s7737_s1 + $0x8] sm:$0xff]  }
 0x209   : > { %v4605_v56 = vpop.f32.mrb[75].mxu1  ;;  %v3030_v61 = vpop.permute.xlu1 %3029 }
 0x20a   : > { %v4606_v20 = vadd.f32 %v4605_v56, %v4604_v42  ;;  %4323 = vmatmul.mubr.msk.bf16.gmra.mrb[168].mxu1 %vm4322_vm2, %v5614_v43  ;;  %vm3065_vm2 = vcmp.eq.s32.totalorder %v3018_v30, %v5943_v40  ;;  %v5534_v42 = vld [vmem:[%s7737_s1 + $0x50] sm:$0xff]  }
 0x20b   : > { %4325 = vmatprep.mubr.msk.bf16.mxu1 %vm4324_vm10, %v5614_v43  ;;  %vm3064_vm10 = vcmp.eq.s32.totalorder %v3018_v30, %v5939_v37 }
 0x20c   : > { %v1357_v21 = vpack.c.bf16 %v4606_v20, %v4603_v11  ;;  %v3027_v17 = vpop.permute.xlu0 %3026 }
 0x20d   : > { %vm3071_vm3 = vcmp.eq.s32.totalorder %v3027_v17, %v5943_v40 }
 0x20e   : > { %v4607_v35 = vpop.f32.mrb[76].mxu1  ;;  %5034 = vmatmul.mubr.msk.bf16.gmra.mrb[24].mxu0 %vm7797_vm7, %v1356_v3 }
 0x20f   : > { %v4608_v18 = vpop.f32.mrb[77].mxu1  ;;  %5037 = vmatprep.mubr.msk.bf16.mxu0 %vm7798_vm8, %v1357_v21  ;;  %vm3067_vm8 = vcmp.eq.s32.totalorder %v3021_v5, %v5943_v40  ;;  %v5538_v5 = vld [vmem:[%s7737_s1 + $0x60] sm:$0xff]  }
 0x210   : > { %v4609_v25 = vadd.f32 %v4608_v18, %v4607_v35  ;;  %v4610_v26 = vpop.f32.mrb[78].mxu1  ;;  %vm4337_vm5 = vmpackc.low %vm3067_vm8, %vm3065_vm2  ;;  %v3033_v47 = vpop.permute.xlu0 %3032  ;;  %vm3068_vm8 = vcmp.eq.s32.totalorder %v3024_v55, %v5939_v37  ;;  %vm3070_vm2 = vcmp.eq.s32.totalorder %v3027_v17, %v5939_v37  ;;  %v5536_v18 = vld [vmem:[%s7737_s1 + $0x58] sm:$0xff]   ;;  %v5540_v55 = vld [vmem:[%s7737_s1 + $0x68] sm:$0xff]  }
 0x211   : > { %v4611_v52 = vpop.f32.mrb[79].mxu1 }
 0x212   : > { %v4612_v4 = vadd.f32 %v4611_v52, %v4610_v26  ;;  %4327 = vmatmul.mubr.msk.bf16.gmra.mrb[172].mxu1 %vm4326_vm4, %v5614_v43  ;;  %vm4341_vm4 = vmpackc.low %vm3071_vm3, %vm3069_vm0  ;;  %vm3072_vm3 = vcmp.eq.s32.totalorder %v3030_v61, %v5939_v37 }
 0x213   : > { %4338 = vmatprep.mubr.msk.bf16.mxu1 %vm4337_vm5, %v5614_v43  ;;  %vm3073_vm5 = vcmp.eq.s32.totalorder %v3030_v61, %v5943_v40  ;;  %v5542_v61 = vld [vmem:[%s7737_s1 + $0x70] sm:$0xff]  }
 0x214   : > { %v1358_v28 = vpack.c.bf16 %v4612_v4, %v4609_v25  ;;  %v3039_v3 = vpop.permute.xlu0 %3038  ;;  %v5537_v4 = vld [vmem:[%s7737_s1 + $0x18] sm:$0xff]  }
 0x216   : > { %5038 = vmatmul.mubr.msk.bf16.gmra.mrb[28].mxu0 %vm7797_vm7, %v1358_v28  ;;  %v4638_v19 = vpop.f32.mrb[80].mxu1  ;;  %vm4339_vm7 = vmpackc.low %vm3066_vm6, %vm3064_vm10  ;;  %vm7800_vm10 = vcmask 130048  }
 0x217   : > { %v4639_v53 = vpop.f32.mrb[81].mxu1  ;;  %vm4343_vm6 = vmpackc.low %vm3070_vm2, %vm3068_vm8  ;;  %vm3079_vm8 = vcmp.eq.s32.totalorder %v3039_v3, %v5943_v40 }
 0x218   : > { %v4640_v36 = vadd.f32 %v4639_v53, %v4638_v19  ;;  %v4641_v54 = vpop.f32.mrb[82].mxu1  ;;  %v3045_v25 = vpop.permute.xlu0 %3044  ;;  %v5539_v53 = vld [vmem:[%s7737_s1 + $0x20] sm:$0xff]  }
 0x219   : > { %v4642_v6 = vpop.f32.mrb[83].mxu1 }
 0x21a   : > { %v4643_v14 = vadd.f32 %v4642_v6, %v4641_v54  ;;  %4340 = vmatmul.mubr.msk.bf16.vlgmr.msra.gmra.mrb[176].mxu1 %vm4339_vm7, %v5614_v43  ;;  %v3036_v29 = vpop.permute.xlu1 %3035  ;;  %vm3074_vm7 = vcmp.eq.s32.totalorder %v3033_v47, %v5939_v37 }
 0x21b   : > { %4342 = vmatprep.mubr.msk.bf16.mxu1 %vm4341_vm4, %v5614_v43  ;;  %vm3077_vm4 = vcmp.eq.s32.totalorder %v3036_v29, %v5943_v40  ;;  %vm4347_vm2 = vmpackc.low %vm3074_vm7, %vm3072_vm3  ;;  %vm3083_vm3 = vcmp.eq.s32.totalorder %v3045_v25, %v5943_v40 }
 0x21c   : > { %v1729_v58 = vpack.c.bf16 %v4643_v14, %v4640_v36  ;;  %v3051_v14 = vpop.permute.xlu0 %3050 }
 0x21e   : > { %v4644_v31 = vpop.f32.mrb[84].mxu1  ;;  %5043 = vmatprep.mubr.msk.bf16.mxu0 %vm7799_vm14, %v1729_v58  ;;  %vm3075_vm14 = vcmp.eq.s32.totalorder %v3033_v47, %v5943_v40  ;;  %v3042_v21 = vpop.permute.xlu1 %3041  ;;  %v5543_v47 = vld [vmem:[%s7737_s1 + $0x30] sm:$0xff]  }
 0x21f   : > { %v4645_v59 = vpop.f32.mrb[85].mxu1  ;;  %vm4345_vm0 = vmpackc.low %vm3075_vm14, %vm3073_vm5 }
 0x220   : > { %v4646_v7 = vadd.f32 %v4645_v59, %v4644_v31  ;;  %v4647_v8 = vpop.f32.mrb[86].mxu1  ;;  %vm7801_vm5 = vmmov %vm7800_vm10  ;;  %v5541_v31 = vld [vmem:[%s7737_s1 + $0x28] sm:$0xff]  }
 0x221   : > { %v4648_v12 = vpop.f32.mrb[87].mxu1  ;;  %vm4349_vm14 = vmpackc.low %vm3079_vm8, %vm3077_vm4 }
 0x222   : > { %v4649_v51 = vadd.f32 %v4648_v12, %v4647_v8  ;;  %4344 = vmatmul.mubr.msk.bf16.gmra.mrb[180].mxu1 %vm4343_vm6, %v5614_v43  ;;  %vm3076_vm6 = vcmp.eq.s32.totalorder %v3036_v29, %v5939_v37  ;;  %vm7802_vm4 = vmmov %vm7801_vm5  ;;  %v3048_v36 = vpop.permute.xlu1 %3047 }
 0x223   : > { %4346 = vmatprep.mubr.msk.bf16.mxu1 %vm4345_vm0, %v5614_v43  ;;  %vm3081_vm0 = vcmp.eq.s32.totalorder %v3042_v21, %v5943_v40 }
 0x224   : > { %v1730_v49 = vpack.c.bf16 %v4649_v51, %v4646_v7  ;;  %vm4353_vm8 = vmpackc.low %vm3083_vm3, %vm3081_vm0 }
 0x225   : > { %vm7803_vm0 = vmmov %vm7802_vm4 }
 0x226   : > { %v4650_v34 = vpop.f32.mrb[88].mxu1  ;;  %5044 = vmatmul.mubr.msk.bf16.vlgmr.msra.gmra.mrb[16].mxu0 %vm7800_vm10, %v1730_v49  ;;  %vm3078_vm10 = vcmp.eq.s32.totalorder %v3039_v3, %v5939_v37  ;;  %v3054_v12 = vpop.permute.xlu1 %3053 }
 0x227   : > { %v4651_v9 = vpop.f32.mrb[89].mxu1  ;;  %4696 = vmatpush3.bf16.msra.mxu0 %v5531_v32  ;;  %vm4351_vm7 = vmpackc.low %vm3078_vm10, %vm3076_vm6  ;;  %vm3087_vm6 = vcmp.eq.s32.totalorder %v3051_v14, %v5943_v40  ;;  %v5375_v32 = vld [vmem:[%s7738_s2 + $0x20] sm:$0xff]  }
 0x228   : > { %v4652_v38 = vadd.f32 %v4651_v9, %v4650_v34  ;;  %v4653_v0 = vpop.f32.mrb[90].mxu1  ;;  %4697 = vmatprep.subr.bf16.mxu0 %v5532_v27  ;;  %v5544_v34 = vld [vmem:[%s7737_s1 + $0x78] sm:$0xff]   ;;  %v3057_v9 = vpop.permute.xlu0 %3056 }
 0x229   : > { %v4654_v16 = vpop.f32.mrb[91].mxu1 }
 0x22a   : > { %v4655_v39 = vadd.f32 %v4654_v16, %v4653_v0  ;;  %4348 = vmatmul.mubr.msk.bf16.gmra.mrb[184].mxu1 %vm4347_vm2, %v5614_v43  ;;  %vm3080_vm2 = vcmp.eq.s32.totalorder %v3042_v21, %v5939_v37  ;;  %v5545_v0 = vld [vmem:[%s7737_s1 + $0x38] sm:$0xff]  }
 0x22b   : > { %4698 = vmatpush3.bf16.msra.mxu0 %v5533_v23  ;;  %4350 = vmatprep.mubr.msk.bf16.mxu1 %vm4349_vm14, %v5614_v43  ;;  %vm3085_vm14 = vcmp.eq.s32.totalorder %v3048_v36, %v5943_v40 }
 0x22c   : > { %v1731_v11 = vpack.c.bf16 %v4655_v39, %v4652_v38  ;;  %4699 = vmatprep.subr.bf16.mxu0 %v5534_v42  ;;  %vm4357_vm3 = vmpackc.low %vm3087_vm6, %vm3085_vm14  ;;  %v3060_v39 = vpop.permute.xlu1 %3059  ;;  %v3063_v42 = vpop.permute.xlu0 %3062 }
 0x22d   : > { %vm7804_vm14 = vmmov %vm7803_vm0 }
 0x22e   : > { %v4656_v56 = vpop.f32.mrb[92].mxu1  ;;  %5047 = vmatprep.mubr.msk.bf16.mxu0 %vm7801_vm5, %v1731_v11  ;;  %vm3082_vm5 = vcmp.eq.s32.totalorder %v3045_v25, %v5939_v37 }
 0x22f   : > { %v4657_v20 = vpop.f32.mrb[93].mxu1  ;;  %4700 = vmatpush3.bf16.msra.mxu0 %v5535_v41  ;;  %vm4355_vm10 = vmpackc.low %vm3082_vm5, %vm3080_vm2  ;;  %vm3091_vm2 = vcmp.eq.s32.totalorder %v3057_v9, %v5943_v40 }
 0x230   : > { %v4658_v35 = vadd.f32 %v4657_v20, %v4656_v56  ;;  %v4659_v13 = vpop.f32.mrb[94].mxu1  ;;  %4701 = vmatprep.subr.bf16.mxu0 %v5536_v18 }
 0x231   : > { %v4660_v26 = vpop.f32.mrb[95].mxu1 }
 0x232   : > { %v4661_v52 = vadd.f32 %v4660_v26, %v4659_v13  ;;  %4352 = vmatmul.mubr.msk.bf16.gmra.mrb[188].mxu1 %vm4351_vm7, %v5614_v43  ;;  %vm3084_vm7 = vcmp.eq.s32.totalorder %v3048_v36, %v5939_v37 }
 0x233   : > { %4702 = vmatpush3.bf16.msra.mxu0 %v5537_v4  ;;  %4354 = vmatprep.mubr.msk.bf16.mxu1 %vm4353_vm8, %v5614_v43  ;;  %vm3089_vm8 = vcmp.eq.s32.totalorder %v3054_v12, %v5943_v40 }
 0x234   : > { %v1732_v28 = vpack.c.bf16 %v4661_v52, %v4658_v35  ;;  %4703 = vmatprep.subr.bf16.mxu0 %v5538_v5  ;;  %vm4361_vm6 = vmpackc.low %vm3091_vm2, %vm3089_vm8 }
 0x235   : > { %vm7805_vm8 = vmmov %vm7804_vm14 }
 0x236   : > { %v4662_v19 = vpop.f32.mrb[96].mxu1  ;;  %5048 = vmatmul.mubr.msk.bf16.gmra.mrb[20].mxu0 %vm7802_vm4, %v1732_v28  ;;  %vm3086_vm4 = vcmp.eq.s32.totalorder %v3051_v14, %v5939_v37 }
 0x237   : > { %v4663_v30 = vpop.f32.mrb[97].mxu1  ;;  %4704 = vmatpush3.bf16.msra.mxu0 %v5539_v53  ;;  %vm4359_vm5 = vmpackc.low %vm3086_vm4, %vm3084_vm7  ;;  %vm3095_vm7 = vcmp.eq.s32.totalorder %v3063_v42, %v5943_v40 }
 0x238   : > { %v4664_v54 = vadd.f32 %v4663_v30, %v4662_v19  ;;  %v4665_v6 = vpop.f32.mrb[98].mxu1  ;;  %4705 = vmatprep.subr.bf16.mxu0 %v5540_v55 }
 0x239   : > { %v4666_v17 = vpop.f32.mrb[99].mxu1 }
 0x23a   : > { %v4667_v58 = vadd.f32 %v4666_v17, %v4665_v6  ;;  %4356 = vmatmul.mubr.msk.bf16.gmra.mrb[192].mxu1 %vm4355_vm10, %v5614_v43  ;;  %vm3088_vm10 = vcmp.eq.s32.totalorder %v3054_v12, %v5939_v37 }
 0x23b   : > { %4706 = vmatpush3.bf16.msra.mxu0 %v5541_v31  ;;  %4358 = vmatprep.mubr.msk.bf16.mxu1 %vm4357_vm3, %v5614_v43  ;;  %vm3093_vm3 = vcmp.eq.s32.totalorder %v3060_v39, %v5943_v40 }
 0x23c   : > { %v1733_v59 = vpack.c.bf16 %v4667_v58, %v4664_v54  ;;  %4707 = vmatprep.subr.bf16.mxu0 %v5542_v61  ;;  %vm4365_vm2 = vmpackc.low %vm3095_vm7, %vm3093_vm3 }
 0x23d   : > { %vm7806_vm3 = vmmov %vm7805_vm8 }
 0x23e   : > { %v4668_v7 = vpop.f32.mrb[100].mxu1  ;;  %5051 = vmatprep.mubr.msk.bf16.mxu0 %vm7803_vm0, %v1733_v59  ;;  %vm3090_vm0 = vcmp.eq.s32.totalorder %v3057_v9, %v5939_v37 }
 0x23f   : > { %v4669_v8 = vpop.f32.mrb[101].mxu1  ;;  %4708 = vmatpush3.bf16.msra.mxu0 %v5543_v47  ;;  %vm4363_vm4 = vmpackc.low %vm3090_vm0, %vm3088_vm10  ;;  %vm1933_vm10 = vcmp.eq.s32.totalorder %v6505_v45, %v5943_v40 }
 0x240   : > { %v4670_v51 = vadd.f32 %v4669_v8, %v4668_v7  ;;  %v4671_v49 = vpop.f32.mrb[102].mxu1  ;;  %4709 = vmatprep.subr.bf16.mxu0 %v5544_v34 }
 0x241   : > { %v4672_v29 = vpop.f32.mrb[103].mxu1 }
 0x242   : > { %v4673_v38 = vadd.f32 %v4672_v29, %v4671_v49  ;;  %4360 = vmatmul.mubr.msk.bf16.gmra.mrb[196].mxu1 %vm4359_vm5, %v5614_v43  ;;  %vm3092_vm5 = vcmp.eq.s32.totalorder %v3060_v39, %v5939_v37 }
 0x243   : > { %4710 = vmatpush3.bf16.msra.mxu0 %v5545_v0  ;;  %4362 = vmatprep.mubr.msk.bf16.mxu1 %vm4361_vm6, %v5614_v43  ;;  %vm1931_vm6 = vcmp.eq.s32.totalorder %v6501_v60, %v5943_v40 }
 0x244   : > { %v1734_v27 = vpack.c.bf16 %v4673_v38, %v4670_v51  ;;  %5059 = vmatprep.subr.bf16.mxu0 %v5375_v32  ;;  %vm4214_vm7 = vmpackc.low %vm1933_vm10, %vm1931_vm6  ;;  %vm7814_vm6 = vnez %v7787_v50 }
 0x246   : > { %v4674_v3 = vpop.f32.mrb[104].mxu1  ;;  %5052 = vmatmul.mubr.msk.bf16.gmra.mrb[24].mxu0 %vm7804_vm14, %v1734_v27  ;;  %vm3094_vm14 = vcmp.eq.s32.totalorder %v3063_v42, %v5939_v37 }
 0x247   : > { %v4675_v16 = vpop.f32.mrb[105].mxu1  ;;  %vm4367_vm0 = vmpackc.low %vm3094_vm14, %vm3092_vm5  ;;  %vm7807_vm5 = vnez %v7768_v62  ;;  %vm7812_vm14 = vnez %v7779_v1 }
 0x248   : > { %v4676_v23 = vadd.f32 %v4675_v16, %v4674_v3  ;;  %v4677_v11 = vpop.f32.mrb[106].mxu1 }
 0x249   : > { %v4678_v56 = vpop.f32.mrb[107].mxu1 }
 0x24a   : > { %v4679_v20 = vadd.f32 %v4678_v56, %v4677_v11  ;;  %4364 = vmatmul.mubr.msk.bf16.gmra.mrb[200].mxu1 %vm4363_vm4, %v5614_v43  ;;  %vm1930_vm4 = vcmp.eq.s32.totalorder %v6501_v60, %v5939_v37 }
 0x24b   : > { %4366 = vmatprep.mubr.msk.bf16.mxu1 %vm4365_vm2, %v5614_v43 }
 0x24c   : > { %v1735_v41 = vpack.c.bf16 %v4679_v20, %v4676_v23 }
 0x24e   : > { %v4680_v21 = vpop.f32.mrb[108].mxu1  ;;  %5055 = vmatprep.mubr.msk.bf16.mxu0 %vm7805_vm8, %v1735_v41  ;;  %vm1932_vm8 = vcmp.eq.s32.totalorder %v6505_v45, %v5939_v37 }
 0x24f   : > { %v4681_v35 = vpop.f32.mrb[109].mxu1  ;;  %vm4216_vm2 = vmpackc.low %vm1932_vm8, %vm1930_vm4 }
 0x250   : > { %v4682_v13 = vadd.f32 %v4681_v35, %v4680_v21  ;;  %v4683_v18 = vpop.f32.mrb[110].mxu1 }
 0x251   : > { %v4684_v25 = vpop.f32.mrb[111].mxu1 }
 0x252   : > { %v4685_v26 = vadd.f32 %v4684_v25, %v4683_v18  ;;  %4368 = vmatmul.mubr.msk.bf16.gmra.mrb[204].mxu1 %vm4367_vm0, %v5614_v43 }
 0x254   : > { %v1736_v52 = vpack.c.bf16 %v4685_v26, %v4682_v13 }
 0x256   : > { %5056 = vmatmul.mubr.msk.bf16.gmra.mrb[28].mxu0 %vm7806_vm3, %v1736_v52 }
 0x257   : > { %4215 = vmatprep.mubr.msk.bf16.mxu0 %vm4214_vm7, %v5614_v43 }
 0x259   : > { %v4784_v40 = vpop.f32.mrb[112].mxu1 }
 0x25a   : > { %v4785_v37 = vpop.f32.mrb[113].mxu1 }
 0x25b   : > { %v7004_v60 = vadd.f32 %v4785_v37, %v4784_v40  ;;  %v4787_v45 = vpop.f32.mrb[114].mxu1 }
 0x25c   : > { %v4788_v48 = vpop.f32.mrb[115].mxu1 }
 0x25d   : > { %v7006_v44 = vadd.f32 %v4788_v48, %v4787_v45 }
 0x25e   : > { %4217 = vmatmul.mubr.msk.bf16.vlgmr.msra.gmra.mrb[32].mxu0 %vm4216_vm2, %v5614_v43 }
 0x25f   : > { %4219 = vmatprep.mubr.msk.bf16.mxu0 %vm6538_vm12, %v5614_v43  ;;  %5060 = vmatpush3.bf16.msra.mxu0 %v5375_v32  ;;  %vm7809_vm12 = vnez %v7764_v15 }
 0x266   : > { %4221 = vmatmul.mubr.msk.bf16.gmra.mrb[36].mxu0 %vm6533_vm11, %v5614_v43  ;;  %vm7808_vm11 = vnez %v7770_v33 }
 0x267   : > { %4223 = vmatprep.mubr.msk.bf16.mxu0 %vm6567_vm9, %v5614_v43  ;;  %vm7810_vm9 = vnez %v7766_v22 }
 0x26e   : > { %4225 = vmatmul.mubr.msk.bf16.gmra.mrb[40].mxu0 %vm6577_vm13, %v5614_v43  ;;  %vm7811_vm13 = vnez %v7775_v46 }
 0x26f   : > { %4227 = vmatprep.mubr.msk.bf16.mxu0 %vm7807_vm5, %v5614_v43  ;;  %v4790_v63 = vpop.f32.mrb[116].mxu1 }
 0x270   : > { %v4791_v62 = vpop.f32.mrb[117].mxu1 }
 0x271   : > { %v7016_v4 = vadd.f32 %v4791_v62, %v4790_v63  ;;  %v4793_v28 = vpop.f32.mrb[118].mxu1 }
 0x272   : > { %v4794_v5 = vpop.f32.mrb[119].mxu1 }
 0x273   : > { %v7018_v19 = vadd.f32 %v4794_v5, %v4793_v28 }
 0x276   : > { %4229 = vmatmul.mubr.msk.bf16.gmra.mrb[44].mxu0 %vm7808_vm11, %v5614_v43 }
 0x277   : > { %4231 = vmatprep.mubr.msk.bf16.mxu0 %vm7809_vm12, %v5614_v43  ;;  %v4796_v15 = vpop.f32.mrb[120].mxu1 }
 0x278   : > { %v4797_v33 = vpop.f32.mrb[121].mxu1 }
 0x279   : > { %v7028_v53 = vadd.f32 %v4797_v33, %v4796_v15  ;;  %v4799_v36 = vpop.f32.mrb[122].mxu1 }
 0x27a   : > { %v4800_v54 = vpop.f32.mrb[123].mxu1 }
 0x27b   : > { %v7030_v6 = vadd.f32 %v4800_v54, %v4799_v36 }
 0x27e   : > { %4233 = vmatmul.mubr.msk.bf16.gmra.mrb[48].mxu0 %vm7810_vm9, %v5614_v43 }
 0x27f   : > { %4235 = vmatprep.mubr.msk.bf16.mxu0 %vm6689_vm15, %v5614_v43  ;;  %v4802_v22 = vpop.f32.mrb[124].mxu1  ;;  %vm7813_vm15 = vnez %v7781_v57 }
 0x280   : > { %v4803_v2 = vpop.f32.mrb[125].mxu1 }
 0x281   : > { %v7040_v14 = vadd.f32 %v4803_v2, %v4802_v22  ;;  %v4805_v17 = vpop.f32.mrb[126].mxu1 }
 0x282   : > { %v4806_v58 = vpop.f32.mrb[127].mxu1 }
 0x283   : > { %v7042_v31 = vadd.f32 %v4806_v58, %v4805_v17  ;;  %v7098_v17 = vld [vmem:[%s7738_s2 + $0x28] sm:$0xff]  }
 0x284   : > { %5077 = vmatprep.subr.bf16.mxu0 %v7098_v17 }
 0x286   : > { %4237 = vmatmul.mubr.msk.bf16.gmra.mrb[52].mxu0 %vm7811_vm13, %v5614_v43 }
 0x287   : > { %4239 = vmatprep.mubr.msk.bf16.mxu0 %vm7812_vm14, %v5614_v43  ;;  %v4808_v46 = vpop.f32.mrb[128].mxu1 }
 0x288   : > { %v4809_v1 = vpop.f32.mrb[129].mxu1 }
 0x289   : > { %v7052_v61 = vadd.f32 %v4809_v1, %v4808_v46  ;;  %v4811_v7 = vpop.f32.mrb[130].mxu1 }
 0x28a   : > { %v4812_v8 = vpop.f32.mrb[131].mxu1 }
 0x28b   : > { %v7054_v47 = vadd.f32 %v4812_v8, %v4811_v7 }
 0x28e   : > { %4241 = vmatmul.mubr.msk.bf16.gmra.mrb[56].mxu0 %vm7813_vm15, %v5614_v43 }
 0x28f   : > { %4243 = vmatprep.mubr.msk.bf16.mxu0 %vm6746_vm1, %v5614_v43  ;;  %vm7819_vm1 = vmmov %vm7806_vm3 }
 0x290   : > { %vm7820_vm10 = vmmov %vm7819_vm1 }
 0x291   : > { %vm7821_vm0 = vmmov %vm7819_vm1 }
 0x292   : > { %vm7822_vm3 = vmmov %vm7821_vm0 }
 0x293   : > { %vm7823_vm7 = vmmov %vm7821_vm0 }
 0x294   : > { %v4814_v57 = vpop.f32.mrb[132].mxu1  ;;  %vm7824_vm4 = vmmov %vm7821_vm0 }
 0x295   : > { %v4815_v51 = vpop.f32.mrb[133].mxu1  ;;  %vm7825_vm8 = vmmov %vm7821_vm0 }
 0x296   : > { %4245 = vmatmul.mubr.msk.bf16.gmra.mrb[60].mxu0 %vm7814_vm6, %v5614_v43  ;;  %v7061_v49 = vadd.f32 %v4815_v51, %v4814_v57  ;;  %v4817_v10 = vpop.f32.mrb[134].mxu1  ;;  %vm7826_vm2 = vmmov %vm7821_vm0 }
 0x297   : > { %v4818_v34 = vpop.f32.mrb[135].mxu1  ;;  %vm7828_vm5 = vmmov %vm7821_vm0 }
 0x298   : > { %v7063_v9 = vadd.f32 %v4818_v34, %v4817_v10  ;;  %vm7830_vm11 = vmmov %vm7821_vm0 }
 0x299   : > { %vm7832_vm12 = vmmov %vm7821_vm0 }
 0x29a   : > { %vm7834_vm9 = vmmov %vm7821_vm0 }
 0x29b   : > { %vm7836_vm13 = vmmov %vm7821_vm0 }
 0x29c   : > { %v4820_v32 = vpop.f32.mrb[136].mxu1  ;;  %vm7838_vm14 = vmmov %vm7821_vm0 }
 0x29d   : > { %v4821_v29 = vpop.f32.mrb[137].mxu1  ;;  %vm7840_vm15 = vmmov %vm7821_vm0 }
 0x29e   : > { %v7067_v0 = vadd.f32 %v4821_v29, %v4820_v32  ;;  %v4823_v27 = vpop.f32.mrb[138].mxu1  ;;  %vm7842_vm6 = vmmov %vm7821_vm0 }
 0x29f   : > { %v4824_v3 = vpop.f32.mrb[139].mxu1 }
 0x2a0   : > { %v7069_v50 = vadd.f32 %v4824_v3, %v4823_v27 }
 0x2a5   : > { %v4826_v16 = vpop.f32.mrb[140].mxu1 }
 0x2a6   : > { %v4827_v43 = vpop.f32.mrb[141].mxu1 }
 0x2a7   : > { %v7071_v39 = vadd.f32 %v4827_v43, %v4826_v16  ;;  %v4829_v23 = vpop.f32.mrb[142].mxu1 }
 0x2a8   : > { %v4830_v42 = vpop.f32.mrb[143].mxu1 }
 0x2a9   : > { %v7075_v56 = vadd.f32 %v4830_v42, %v4829_v23 }
 0x2ad   : > { %v4857_v20 = vpop.f32.mrb[144].mxu1 }
 0x2ae   : > { %v4858_v41 = vpop.f32.mrb[145].mxu1 }
 0x2af   : > { %v7079_v35 = vadd.f32 %v4858_v41, %v4857_v20  ;;  %v4860_v13 = vpop.f32.mrb[146].mxu1 }
 0x2b0   : > { %v4861_v18 = vpop.f32.mrb[147].mxu1 }
 0x2b1   : > { %v7081_v26 = vadd.f32 %v4861_v18, %v4860_v13 }
 0x2b5   : > { %v4863_v25 = vpop.f32.mrb[148].mxu1 }
 0x2b6   : > { %v4864_v52 = vpop.f32.mrb[149].mxu1 }
 0x2b7   : > { %v7083_v40 = vadd.f32 %v4864_v52, %v4863_v25  ;;  %v4866_v37 = vpop.f32.mrb[150].mxu1 }
 0x2b8   : > { %v4867_v48 = vpop.f32.mrb[151].mxu1 }
 0x2b9   : > { %v7087_v63 = vadd.f32 %v4867_v48, %v4866_v37 }
 0x2bd   : > { %v4869_v62 = vpop.f32.mrb[152].mxu1 }
 0x2be   : > { %v4870_v28 = vpop.f32.mrb[153].mxu1 }
 0x2bf   : > { %v7091_v15 = vadd.f32 %v4870_v28, %v4869_v62  ;;  %v4872_v33 = vpop.f32.mrb[154].mxu1 }
 0x2c0   : > { %v4873_v36 = vpop.f32.mrb[155].mxu1 }
 0x2c1   : > { %v7093_v22 = vadd.f32 %v4873_v36, %v4872_v33 }
 0x2c5   : > { %v4875_v54 = vpop.f32.mrb[156].mxu1 }
 0x2c6   : > { %v4876_v2 = vpop.f32.mrb[157].mxu1 }
 0x2c7   : > { %v7100_v58 = vadd.f32 %v4876_v2, %v4875_v54  ;;  %v4878_v46 = vpop.f32.mrb[158].mxu1 }
 0x2c8   : > { %v4879_v7 = vpop.f32.mrb[159].mxu1 }
 0x2c9   : > { %v7105_v8 = vadd.f32 %v4879_v7, %v4878_v46 }
 0x2cd   : > { %v4881_v57 = vpop.f32.mrb[160].mxu1 }
 0x2ce   : > { %v4882_v51 = vpop.f32.mrb[161].mxu1 }
 0x2cf   : > { %v7109_v34 = vadd.f32 %v4882_v51, %v4881_v57  ;;  %v4884_v32 = vpop.f32.mrb[162].mxu1 }
 0x2d0   : > { %v4885_v29 = vpop.f32.mrb[163].mxu1 }
 0x2d1   : > { %v7111_v3 = vadd.f32 %v4885_v29, %v4884_v32 }
 0x2d5   : > { %v4887_v27 = vpop.f32.mrb[164].mxu1 }
 0x2d6   : > { %v4888_v16 = vpop.f32.mrb[165].mxu1 }
 0x2d7   : > { %v7113_v43 = vadd.f32 %v4888_v16, %v4887_v27  ;;  %v4890_v23 = vpop.f32.mrb[166].mxu1 }
 0x2d8   : > { %v4891_v20 = vpop.f32.mrb[167].mxu1 }
 0x2d9   : > { %v7117_v41 = vadd.f32 %v4891_v20, %v4890_v23 }
 0x2dd   : > { %v4893_v13 = vpop.f32.mrb[168].mxu1 }
 0x2de   : > { %v4894_v25 = vpop.f32.mrb[169].mxu1 }
 0x2df   : > { %v7121_v52 = vadd.f32 %v4894_v25, %v4893_v13  ;;  %v4896_v37 = vpop.f32.mrb[170].mxu1 }
 0x2e0   : > { %v4897_v48 = vpop.f32.mrb[171].mxu1 }
 0x2e1   : > { %v7123_v62 = vadd.f32 %v4897_v48, %v4896_v37 }
 0x2e5   : > { %v4899_v33 = vpop.f32.mrb[172].mxu1 }
 0x2e6   : > { %v4900_v36 = vpop.f32.mrb[173].mxu1 }
 0x2e7   : > { %v7127_v54 = vadd.f32 %v4900_v36, %v4899_v33  ;;  %v4902_v2 = vpop.f32.mrb[174].mxu1 }
 0x2e8   : > { %v4903_v46 = vpop.f32.mrb[175].mxu1 }
 0x2e9   : > { %v7129_v7 = vadd.f32 %v4903_v46, %v4902_v2 }
 0x2ed   : > { %v4930_v51 = vpop.f32.mrb[176].mxu1 }
 0x2ee   : > { %v4931_v32 = vpop.f32.mrb[177].mxu1 }
 0x2ef   : > { %v7133_v29 = vadd.f32 %v4931_v32, %v4930_v51  ;;  %v4933_v27 = vpop.f32.mrb[178].mxu1 }
 0x2f0   : > { %v4934_v16 = vpop.f32.mrb[179].mxu1 }
 0x2f1   : > { %v7135_v23 = vadd.f32 %v4934_v16, %v4933_v27 }
 0x2f5   : > { %v4936_v20 = vpop.f32.mrb[180].mxu1 }
 0x2f6   : > { %v4937_v13 = vpop.f32.mrb[181].mxu1 }
 0x2f7   : > { %v7139_v37 = vadd.f32 %v4937_v13, %v4936_v20  ;;  %v4939_v48 = vpop.f32.mrb[182].mxu1 }
 0x2f8   : > { %v4940_v33 = vpop.f32.mrb[183].mxu1 }
 0x2f9   : > { %v7141_v36 = vadd.f32 %v4940_v33, %v4939_v48 }
 0x2fd   : > { %v4942_v2 = vpop.f32.mrb[184].mxu1 }
 0x2fe   : > { %v4943_v46 = vpop.f32.mrb[185].mxu1 }
 0x2ff   : > { %v7145_v32 = vadd.f32 %v4943_v46, %v4942_v2  ;;  %v4945_v27 = vpop.f32.mrb[186].mxu1 }
 0x300   : > { %v4946_v16 = vpop.f32.mrb[187].mxu1 }
 0x301   : > { %v7147_v57 = vadd.f32 %v4946_v16, %v4945_v27 }
 0x305   : > { %v4948_v28 = vpop.f32.mrb[188].mxu1 }
 0x306   : > { %v4949_v18 = vpop.f32.mrb[189].mxu1 }
 0x307   : > { %v7151_v13 = vadd.f32 %v4949_v18, %v4948_v28  ;;  %v4951_v48 = vpop.f32.mrb[190].mxu1 }
 0x308   : > { %v4952_v33 = vpop.f32.mrb[191].mxu1 }
 0x309   : > { %v7153_v25 = vadd.f32 %v4952_v33, %v4951_v48 }
 0x30d   : > { %v4954_v42 = vpop.f32.mrb[192].mxu1 }
 0x30e   : > { %v4955_v10 = vpop.f32.mrb[193].mxu1 }
 0x30f   : > { %v7157_v46 = vadd.f32 %v4955_v10, %v4954_v42  ;;  %v4957_v27 = vpop.f32.mrb[194].mxu1 }
 0x310   : > { %v4958_v16 = vpop.f32.mrb[195].mxu1 }
 0x311   : > { %v7159_v51 = vadd.f32 %v4958_v16, %v4957_v27 }
 0x315   : > { %v4960_v1 = vpop.f32.mrb[196].mxu1 }
 0x316   : > { %v4961_v5 = vpop.f32.mrb[197].mxu1 }
 0x317   : > { %v7163_v28 = vadd.f32 %v4961_v5, %v4960_v1  ;;  %v4963_v48 = vpop.f32.mrb[198].mxu1 }
 0x318   : > { %v4964_v33 = vpop.f32.mrb[199].mxu1 }
 0x319   : > { %v7165_v20 = vadd.f32 %v4964_v33, %v4963_v48 }
 0x31d   : > { %v4966_v10 = vpop.f32.mrb[200].mxu1 }
 0x31e   : > { %v4967_v42 = vpop.f32.mrb[201].mxu1 }
 0x31f   : > { %v7169_v45 = vadd.f32 %v4967_v42, %v4966_v10  ;;  %v4969_v27 = vpop.f32.mrb[202].mxu1 }
 0x320   : > { %v4970_v16 = vpop.f32.mrb[203].mxu1 }
 0x321   : > { %7815 = vst [vmem:[#allocation5_spill] sm:$0xff] %v7169_v45  ;;  %v7171_v21 = vadd.f32 %v4970_v16, %v4969_v27 }
 0x323   : > { %7816 = vst [vmem:[#allocation6_spill] sm:$0xff] %v7171_v21 }
 0x325   : > { %v4972_v5 = vpop.f32.mrb[204].mxu1 }
 0x326   : > { %v4973_v1 = vpop.f32.mrb[205].mxu1 }
 0x327   : > { %v7175_v11 = vadd.f32 %v4973_v1, %v4972_v5  ;;  %v4975_v48 = vpop.f32.mrb[206].mxu1 }
 0x328   : > { %v4976_v33 = vpop.f32.mrb[207].mxu1 }
 0x329   : > { %7817 = vst [vmem:[#allocation7_spill] sm:$0xff] %v7175_v11  ;;  %v7177_v38 = vadd.f32 %v4976_v33, %v4975_v48  ;;  %v5377_v33 = vld [vmem:[%s7738_s2 + $0x30] sm:$0xff]  }
 0x32b   : > { %7818 = vst [vmem:[#allocation8_spill] sm:$0xff] %v7177_v38 }
 0x331   : > { %v4711_v2 = vpop.f32.mrb[32].mxu0 }
 0x332   : > { %v4712_v42 = vpop.f32.mrb[33].mxu0 }
 0x333   : > { %v4713_v12 = vadd.f32 %v4712_v42, %v4711_v2  ;;  %v4714_v59 = vpop.f32.mrb[34].mxu0 }
 0x334   : > { %v4715_v27 = vpop.f32.mrb[35].mxu0 }
 0x335   : > { %v4716_v16 = vadd.f32 %v4715_v27, %v4714_v59 }
 0x337   : > { %v2107_v55 = vpack.c.bf16 %v4716_v16, %v4713_v12 }
 0x339   : > { %v4717_v30 = vpop.f32.mrb[36].mxu0  ;;  %5061 = vmatprep.mubr.msk.bf16.mxu0 %vm7819_vm1, %v2107_v55  ;;  %vm7844_vm1 = vmmov %vm7821_vm0 }
 0x33a   : > { %v4718_v18 = vpop.f32.mrb[37].mxu0 }
 0x33b   : > { %v4719_v5 = vadd.f32 %v4718_v18, %v4717_v30  ;;  %v4720_v1 = vpop.f32.mrb[38].mxu0 }
 0x33c   : > { %v4721_v24 = vpop.f32.mrb[39].mxu0 }
 0x33d   : > { %v4722_v45 = vadd.f32 %v4721_v24, %v4720_v1 }
 0x33f   : > { %v2108_v48 = vpack.c.bf16 %v4722_v45, %v4719_v5 }
 0x341   : > { %v4723_v10 = vpop.f32.mrb[40].mxu0  ;;  %5062 = vmatmul.mubr.msk.bf16.vlgmr.msra.gmra.mrb[16].mxu0 %vm7820_vm10, %v2108_v48  ;;  %vm7846_vm10 = vmmov %vm7821_vm0 }
 0x342   : > { %v4724_v2 = vpop.f32.mrb[41].mxu0  ;;  %5078 = vmatpush3.bf16.msra.mxu0 %v7098_v17 }
 0x343   : > { %v4725_v59 = vadd.f32 %v4724_v2, %v4723_v10  ;;  %v4726_v12 = vpop.f32.mrb[42].mxu0  ;;  %5095 = vmatprep.subr.bf16.mxu0 %v5377_v33 }
 0x344   : > { %v4727_v55 = vpop.f32.mrb[43].mxu0 }
 0x345   : > { %v4728_v42 = vadd.f32 %v4727_v55, %v4726_v12 }
 0x347   : > { %v2109_v30 = vpack.c.bf16 %v4728_v42, %v4725_v59 }
 0x349   : > { %v4729_v18 = vpop.f32.mrb[44].mxu0  ;;  %5065 = vmatprep.mubr.msk.bf16.mxu0 %vm7821_vm0, %v2109_v30 }
 0x34a   : > { %v4730_v24 = vpop.f32.mrb[45].mxu0 }
 0x34b   : > { %v4731_v45 = vadd.f32 %v4730_v24, %v4729_v18  ;;  %v4732_v27 = vpop.f32.mrb[46].mxu0 }
 0x34c   : > { %v4733_v16 = vpop.f32.mrb[47].mxu0 }
 0x34d   : > { %v4734_v5 = vadd.f32 %v4733_v16, %v4732_v27 }
 0x34f   : > { %v2110_v1 = vpack.c.bf16 %v4734_v5, %v4731_v45 }
 0x351   : > { %v4735_v11 = vpop.f32.mrb[48].mxu0  ;;  %5066 = vmatmul.mubr.msk.bf16.gmra.mrb[20].mxu0 %vm7822_vm3, %v2110_v1  ;;  %vm7849_vm3 = vmmov %vm7821_vm0 }
 0x352   : > { %v4736_v48 = vpop.f32.mrb[49].mxu0 }
 0x353   : > { %v4737_v17 = vadd.f32 %v4736_v48, %v4735_v11  ;;  %v4738_v10 = vpop.f32.mrb[50].mxu0 }
 0x354   : > { %v4739_v2 = vpop.f32.mrb[51].mxu0 }
 0x355   : > { %v4740_v38 = vadd.f32 %v4739_v2, %v4738_v10 }
 0x357   : > { %v2111_v21 = vpack.c.bf16 %v4740_v38, %v4737_v17 }
 0x359   : > { %v4741_v12 = vpop.f32.mrb[52].mxu0  ;;  %5069 = vmatprep.mubr.msk.bf16.mxu0 %vm7823_vm7, %v2111_v21  ;;  %vm7851_vm7 = vmmov %vm7821_vm0 }
 0x35a   : > { %v4742_v59 = vpop.f32.mrb[53].mxu0 }
 0x35b   : > { %v4743_v55 = vadd.f32 %v4742_v59, %v4741_v12  ;;  %v4744_v42 = vpop.f32.mrb[54].mxu0 }
 0x35c   : > { %v4745_v30 = vpop.f32.mrb[55].mxu0 }
 0x35d   : > { %v4746_v18 = vadd.f32 %v4745_v30, %v4744_v42  ;;  %v5378_v42 = vld [vmem:[%s7738_s2 + $0x38] sm:$0xff]   ;;  %v7829_v30 = vpack.c.bf16 %v7018_v19, %v7016_v4  ;;  %v7837_v4 = vpack.c.bf16 %v7063_v9, %v7061_v49  ;;  %v7839_v19 = vpack.c.bf16 %v7069_v50, %v7067_v0 }
 0x35e   : > { %v7850_v49 = vpack.c.bf16 %v7111_v3, %v7109_v34  ;;  %v7852_v9 = vpack.c.bf16 %v7117_v41, %v7113_v43  ;;  %v7854_v0 = vpack.c.bf16 %v7123_v62, %v7121_v52  ;;  %v7856_v50 = vpack.c.bf16 %v7129_v7, %v7127_v54  ;;  %v5388_v3 = vld [vmem:[%s7740_s4 + $0x30] ss:$8 sps:$4 sm:$0xff]   ;;  %v5393_v43 = vld [vmem:[%s7740_s4 + $0x44] ss:$8 sps:$4 sm:$0xff]   ;;  %v5391_v41 = vld [vmem:[%s7740_s4 + $0x40] ss:$8 sps:$4 sm:$0xff]  }
 0x35f   : > { %v2112_v24 = vpack.c.bf16 %v4746_v18, %v4743_v55  ;;  %v7827_v55 = vpack.c.bf16 %v7006_v44, %v7004_v60  ;;  %v7831_v18 = vpack.c.bf16 %v7030_v6, %v7028_v53  ;;  %v7833_v60 = vpack.c.bf16 %v7042_v31, %v7040_v14  ;;  %v5381_v14 = vld [vmem:[%s7740_s4 + $0x4] ss:$8 sps:$4 sm:$0xff]   ;;  %v5396_v52 = vld [vmem:[%s7740_s4 + $0x54] ss:$8 sps:$4 sm:$0xff]  }
 0x360   : > { %v7835_v44 = vpack.c.bf16 %v7054_v47, %v7052_v61  ;;  %v7841_v53 = vpack.c.bf16 %v7075_v56, %v7071_v39  ;;  %v7843_v6 = vpack.c.bf16 %v7081_v26, %v7079_v35  ;;  %v7845_v31 = vpack.c.bf16 %v7087_v63, %v7083_v40  ;;  %v5379_v56 = vld [vmem:[%s7740_s4] ss:$8 sps:$4 sm:$0xff]   ;;  %v5384_v35 = vld [vmem:[%s7740_s4 + $0x14] ss:$8 sps:$4 sm:$0xff]   ;;  %v5382_v63 = vld [vmem:[%s7740_s4 + $0x10] ss:$8 sps:$4 sm:$0xff]  }
 0x361   : > { %v4747_v27 = vpop.f32.mrb[56].mxu0  ;;  %5070 = vmatmul.mubr.msk.bf16.gmra.mrb[24].mxu0 %vm7824_vm4, %v2112_v24  ;;  %v7847_v61 = vpack.c.bf16 %v7093_v22, %v7091_v15  ;;  %v7848_v47 = vpack.c.bf16 %v7105_v8, %v7100_v58  ;;  %vm7853_vm4 = vmmov %vm7821_vm0  ;;  %v7858_v39 = vpack.c.bf16 %v7135_v23, %v7133_v29  ;;  %v7860_v26 = vpack.c.bf16 %v7141_v36, %v7139_v37  ;;  %v5387_v15 = vld [vmem:[%s7740_s4 + $0x24] ss:$8 sps:$4 sm:$0xff]   ;;  %v5385_v22 = vld [vmem:[%s7740_s4 + $0x20] ss:$8 sps:$4 sm:$0xff]  }
 0x362   : > { %v4748_v45 = vpop.f32.mrb[57].mxu0  ;;  %v7862_v40 = vpack.c.bf16 %v7147_v57, %v7145_v32  ;;  %v5390_v58 = vld [vmem:[%s7740_s4 + $0x34] ss:$8 sps:$4 sm:$0xff]   ;;  %v7864_v8 = vpack.c.bf16 %v7153_v25, %v7151_v13  ;;  %v7866_v34 = vpack.c.bf16 %v7159_v51, %v7157_v46  ;;  %v7868_v62 = vpack.c.bf16 %v7165_v20, %v7163_v28  ;;  %v7870_v54 = vld [vmem:[#allocation6_spill] sm:$0xff]  ;;  %v7871_v7 = vld [vmem:[#allocation5_spill] sm:$0xff] }
 0x363   : > { %v4749_v16 = vadd.f32 %v4748_v45, %v4747_v27  ;;  %v4750_v5 = vpop.f32.mrb[58].mxu0  ;;  %v7872_v57 = vpack.c.bf16 %v7870_v54, %v7871_v7  ;;  %v5394_v29 = vld [vmem:[%s7740_s4 + $0x50] ss:$8 sps:$4 sm:$0xff]   ;;  %v7878_v36 = vmov 0   ;;  %v5399_v51 = vld [vmem:[%s7740_s4 + $0x64] ss:$8 sps:$4 sm:$0xff]  }
 0x364   : > { %v4751_v11 = vpop.f32.mrb[59].mxu0  ;;  %v7874_v23 = vld [vmem:[#allocation8_spill] sm:$0xff]  ;;  %v7875_v25 = vld [vmem:[#allocation7_spill] sm:$0xff]  ;;  %v5397_v32 = vld [vmem:[%s7740_s4 + $0x60] ss:$8 sps:$4 sm:$0xff]  }
 0x365   : > { %v4752_v1 = vadd.f32 %v4751_v11, %v4750_v5  ;;  %v7876_v37 = vpack.c.bf16 %v7874_v23, %v7875_v25  ;;  %v5402_v20 = vld [vmem:[%s7740_s4 + $0x74] ss:$8 sps:$4 sm:$0xff]   ;;  %v5400_v13 = vld [vmem:[%s7740_s4 + $0x70] ss:$8 sps:$4 sm:$0xff]   ;;  %v4378_v46 = vld [vmem:[%s7739_s3] ss:$0 sm:$0xff]  ;;  %v7879_v25 = vlaneseq }
 0x367   : > { %v2113_v48 = vpack.c.bf16 %v4752_v1, %v4749_v16 }
 0x369   : > { %v4753_v10 = vpop.f32.mrb[60].mxu0  ;;  %5073 = vmatprep.mubr.msk.bf16.mxu0 %vm7825_vm8, %v2113_v48  ;;  %vm7855_vm8 = vmmov %vm7821_vm0 }
 0x36a   : > { %v4754_v38 = vpop.f32.mrb[61].mxu0 }
 0x36b   : > { %v4755_v21 = vadd.f32 %v4754_v38, %v4753_v10  ;;  %v4756_v17 = vpop.f32.mrb[62].mxu0 }
 0x36c   : > { %v4757_v2 = vpop.f32.mrb[63].mxu0 }
 0x36d   : > { %v4758_v12 = vadd.f32 %v4757_v2, %v4756_v17 }
 0x36f   : > { %v2114_v59 = vpack.c.bf16 %v4758_v12, %v4755_v21 }
 0x371   : > { %5074 = vmatmul.mubr.msk.bf16.gmra.mrb[28].mxu0 %vm7826_vm2, %v2114_v59  ;;  %vm7857_vm2 = vmmov %vm7821_vm0 }
 0x372   : > { %5079 = vmatprep.mubr.msk.bf16.mxu0 %vm7828_vm5, %v7827_v55  ;;  %vm7859_vm5 = vmmov %vm7821_vm0 }
 0x379   : > { %5080 = vmatmul.mubr.msk.bf16.vlgmr.msra.gmra.mrb[16].mxu0 %vm7830_vm11, %v7829_v30  ;;  %vm7861_vm11 = vmmov %vm7821_vm0 }
 0x37a   : > { %5096 = vmatpush3.bf16.msra.mxu0 %v5377_v33  ;;  %5083 = vmatprep.mubr.msk.bf16.mxu0 %vm7832_vm12, %v7831_v18  ;;  %vm7863_vm12 = vmmov %vm7821_vm0 }
 0x37b   : > { %5113 = vmatprep.subr.bf16.mxu0 %v5378_v42 }
 0x381   : > { %5084 = vmatmul.mubr.msk.bf16.gmra.mrb[20].mxu0 %vm7834_vm9, %v7833_v60  ;;  %vm7865_vm9 = vmmov %vm7821_vm0 }
 0x382   : > { %5087 = vmatprep.mubr.msk.bf16.mxu0 %vm7836_vm13, %v7835_v44  ;;  %vm7867_vm13 = vmmov %vm7821_vm0 }
 0x389   : > { %5088 = vmatmul.mubr.msk.bf16.gmra.mrb[24].mxu0 %vm7838_vm14, %v7837_v4  ;;  %vm7869_vm14 = vmmov %vm7821_vm0 }
 0x38a   : > { %5091 = vmatprep.mubr.msk.bf16.mxu0 %vm7840_vm15, %v7839_v19  ;;  %vm7873_vm15 = vmmov %vm7821_vm0 }
 0x391   : > { %5092 = vmatmul.mubr.msk.bf16.gmra.mrb[28].mxu0 %vm7842_vm6, %v7841_v53  ;;  %vm7877_vm6 = vmmov %vm7821_vm0 }
 0x392   : > { %5097 = vmatprep.mubr.msk.bf16.mxu0 %vm7844_vm1, %v7843_v6 }
 0x399   : > { %5098 = vmatmul.mubr.msk.bf16.vlgmr.msra.gmra.mrb[16].mxu0 %vm7846_vm10, %v7845_v31 }
 0x39a   : > { %5114 = vmatpush3.bf16.msra.mxu0 %v5378_v42  ;;  %5101 = vmatprep.mubr.msk.bf16.mxu0 %vm7821_vm0, %v7847_v61 }
 0x39b   : > { %3549 = vmatprep.subr.bf16.mxu0 %v5381_v14 }
 0x3a1   : > { %5102 = vmatmul.mubr.msk.bf16.gmra.mrb[20].mxu0 %vm7849_vm3, %v7848_v47 }
 0x3a2   : > { %5105 = vmatprep.mubr.msk.bf16.mxu0 %vm7851_vm7, %v7850_v49 }
 0x3a9   : > { %5106 = vmatmul.mubr.msk.bf16.gmra.mrb[24].mxu0 %vm7853_vm4, %v7852_v9 }
 0x3aa   : > { %5109 = vmatprep.mubr.msk.bf16.mxu0 %vm7855_vm8, %v7854_v0 }
 0x3b1   : > { %5110 = vmatmul.mubr.msk.bf16.gmra.mrb[28].mxu0 %vm7857_vm2, %v7856_v50 }
 0x3b2   : > { %5115 = vmatprep.mubr.msk.bf16.mxu0 %vm7859_vm5, %v7858_v39 }
 0x3b9   : > { %5116 = vmatmul.mubr.msk.bf16.vlgmr.msra.gmra.mrb[16].mxu0 %vm7861_vm11, %v7860_v26 }
 0x3ba   : > { %5119 = vmatprep.mubr.msk.bf16.mxu0 %vm7863_vm12, %v7862_v40  ;;  %3550 = vmatpush1.bf16.msra.mxu0 %v5379_v56 }
 0x3bb   : > { %3551 = vmatprep.subr.bf16.mxu0 %v5384_v35 }
 0x3be   : > { %3552 = vmatpush1.bf16.msra.mxu0 %v5382_v63 }
 0x3bf   : > { %3553 = vmatprep.subr.bf16.mxu0 %v5387_v15 }
 0x3c1   : > { %5120 = vmatmul.mubr.msk.bf16.gmra.mrb[20].mxu0 %vm7865_vm9, %v7864_v8 }
 0x3c2   : > { %5123 = vmatprep.mubr.msk.bf16.mxu0 %vm7867_vm13, %v7866_v34  ;;  %3554 = vmatpush1.bf16.msra.mxu0 %v5385_v22 }
 0x3c3   : > { %3555 = vmatprep.subr.bf16.mxu0 %v5390_v58 }
 0x3c6   : > { %3556 = vmatpush1.bf16.msra.mxu0 %v5388_v3 }
 0x3c7   : > { %3557 = vmatprep.subr.bf16.mxu0 %v5393_v43 }
 0x3c9   : > { %5124 = vmatmul.mubr.msk.bf16.gmra.mrb[24].mxu0 %vm7869_vm14, %v7868_v62 }
 0x3ca   : > { %5127 = vmatprep.mubr.msk.bf16.mxu0 %vm7873_vm15, %v7872_v57  ;;  %3558 = vmatpush1.bf16.msra.mxu0 %v5391_v41 }
 0x3cb   : > { %3559 = vmatprep.subr.bf16.mxu0 %v5396_v52 }
 0x3ce   : > { %3560 = vmatpush1.bf16.msra.mxu0 %v5394_v29 }
 0x3cf   : > { %3561 = vmatprep.subr.bf16.mxu0 %v5399_v51 }
 0x3d1   : > { %5128 = vmatmul.mubr.msk.bf16.gmra.mrb[28].mxu0 %vm7877_vm6, %v7876_v37  ;;  %v3460_v37 = vshrl.u32 %v7879_v25, 7 }
 0x3d2   : > { %3581 = vmatprep.mubr.bf16.mxu0 %v7878_v36  ;;  %3562 = vmatpush1.bf16.msra.mxu0 %v5397_v32  ;;  %v3457_v32 = vld [vmem:[%s7741_s5] sm:$0x3] }
 0x3d3   : > { %3563 = vmatprep.subr.bf16.mxu0 %v5402_v20  ;;  %v3461_v51 = vsub.s32 0, %v3460_v37  ;;  %v3465_v20 = vsub.s32 1, %v3460_v37 }
 0x3d6   : > { %3564 = vmatpush1.bf16.msra.mxu0 %v5400_v13  ;;  %v7355_v13 = vrot.slane %v3457_v32, %v3461_v51 }
 0x48c   : > { %v5117_v28 = vpop.f32.mrb[16].mxu0 }
 0x48d   : > { %v3403_v33 = vadd.f32 %v5117_v28, %v4378_v46  ;;  %v3315_v24 = vpop.f32.mrb[17].mxu0 }
 0x48e   : > { %v3401_v27 = vadd.f32 %v4378_v46, %v3315_v24  ;;  %v5118_v45 = vpop.f32.mrb[18].mxu0 }
 0x48f   : > { %v3404_v16 = vadd.f32 %v5118_v45, %v4378_v46  ;;  %v3318_v5 = vpop.f32.mrb[19].mxu0  ;;  %v3419_v1 = vmax.f32 %v3403_v33, 0.0 }
 0x490   : > { %v3402_v11 = vadd.f32 %v4378_v46, %v3318_v5  ;;  %v3417_v10 = vmax.f32 %v3401_v27, 0.0 }
 0x491   : > { %v3420_v48 = vmax.f32 %v3404_v16, 0.0 }
 0x492   : > { %v3418_v38 = vmax.f32 %v3402_v11, 0.0 }
 0x493   : > { %v3434_v21 = vpack.c.bf16 %v3420_v48, %v3419_v1 }
 0x494   : > { %v3433_v17 = vpack.c.bf16 %v3418_v38, %v3417_v10  ;;  %v5121_v2 = vpop.f32.mrb[20].mxu0 }
 0x495   : > { %v3407_v12 = vadd.f32 %v5121_v2, %v4378_v46  ;;  %v3331_v59 = vpop.f32.mrb[21].mxu0 }
 0x496   : > { %v3405_v55 = vadd.f32 %v4378_v46, %v3331_v59  ;;  %v5122_v42 = vpop.f32.mrb[22].mxu0  ;;  %3582 = vmatmul.mubr.bf16.vlgmr.msra.gmra.mrb[64].mxu0 %v3433_v17 }
 0x497   : > { %v3408_v30 = vadd.f32 %v5122_v42, %v4378_v46  ;;  %v3334_v18 = vpop.f32.mrb[23].mxu0  ;;  %3591 = vmatprep.mubr.bf16.mxu0 %v7878_v36  ;;  %v3423_v44 = vmax.f32 %v3407_v12, 0.0 }
 0x498   : > { %v3406_v60 = vadd.f32 %v4378_v46, %v3334_v18  ;;  %v3421_v19 = vmax.f32 %v3405_v55, 0.0 }
 0x499   : > { %v3424_v4 = vmax.f32 %v3408_v30, 0.0 }
 0x49a   : > { %v3422_v53 = vmax.f32 %v3406_v60, 0.0 }
 0x49b   : > { %v3436_v6 = vpack.c.bf16 %v3424_v4, %v3423_v44 }
 0x49c   : > { %v3435_v14 = vpack.c.bf16 %v3422_v53, %v3421_v19  ;;  %v5125_v31 = vpop.f32.mrb[24].mxu0 }
 0x49d   : > { %v3411_v61 = vadd.f32 %v5125_v31, %v4378_v46  ;;  %v3347_v47 = vpop.f32.mrb[25].mxu0 }
 0x49e   : > { %v3409_v49 = vadd.f32 %v4378_v46, %v3347_v47  ;;  %v5126_v9 = vpop.f32.mrb[26].mxu0  ;;  %3592 = vmatmul.mubr.bf16.gmra.mrb[68].mxu0 %v3434_v21 }
 0x49f   : > { %v3412_v0 = vadd.f32 %v5126_v9, %v4378_v46  ;;  %v3350_v50 = vpop.f32.mrb[27].mxu0  ;;  %3601 = vmatprep.mubr.bf16.mxu0 %v7878_v36  ;;  %v3427_v56 = vmax.f32 %v3411_v61, 0.0 }
 0x4a0   : > { %v3410_v39 = vadd.f32 %v4378_v46, %v3350_v50  ;;  %v3425_v26 = vmax.f32 %v3409_v49, 0.0 }
 0x4a1   : > { %v3428_v35 = vmax.f32 %v3412_v0, 0.0 }
 0x4a2   : > { %v3426_v40 = vmax.f32 %v3410_v39, 0.0 }
 0x4a3   : > { %v3438_v63 = vpack.c.bf16 %v3428_v35, %v3427_v56 }
 0x4a4   : > { %v3437_v15 = vpack.c.bf16 %v3426_v40, %v3425_v26  ;;  %v5129_v22 = vpop.f32.mrb[28].mxu0 }
 0x4a5   : > { %v3415_v58 = vadd.f32 %v5129_v22, %v4378_v46  ;;  %v3363_v8 = vpop.f32.mrb[29].mxu0 }
 0x4a6   : > { %v3413_v34 = vadd.f32 %v4378_v46, %v3363_v8  ;;  %v5130_v3 = vpop.f32.mrb[30].mxu0  ;;  %3602 = vmatmul.mubr.bf16.gmra.mrb[72].mxu0 %v3435_v14 }
 0x4a7   : > { %v3416_v43 = vadd.f32 %v5130_v3, %v4378_v46  ;;  %v3366_v41 = vpop.f32.mrb[31].mxu0  ;;  %3611 = vmatprep.mubr.bf16.mxu0 %v7878_v36  ;;  %v3431_v62 = vmax.f32 %v3415_v58, 0.0 }
 0x4a8   : > { %v3414_v52 = vadd.f32 %v4378_v46, %v3366_v41  ;;  %v3429_v7 = vmax.f32 %v3413_v34, 0.0  ;;  %v7357_v46 = vrot.slane %v3457_v32, %v3465_v20 }
 0x4a9   : > { %v3432_v54 = vmax.f32 %v3416_v43, 0.0 }
 0x4aa   : > { %v3430_v57 = vmax.f32 %v3414_v52, 0.0 }
 0x4ab   : > { %v3440_v29 = vpack.c.bf16 %v3432_v54, %v3431_v62 }
 0x4ac   : > { %v3439_v23 = vpack.c.bf16 %v3430_v57, %v3429_v7 }
 0x4ae   : > { %3612 = vmatmul.mubr.bf16.gmra.mrb[76].mxu0 %v3436_v6 }
 0x4af   : > { %3621 = vmatprep.mubr.bf16.mxu0 %v7878_v36 }
 0x4b6   : > { %3622 = vmatmul.mubr.bf16.gmra.mrb[80].mxu0 %v3437_v15 }
 0x4b7   : > { %3631 = vmatprep.mubr.bf16.mxu0 %v7878_v36 }
 0x4be   : > { %3632 = vmatmul.mubr.bf16.gmra.mrb[84].mxu0 %v3438_v63 }
 0x4bf   : > { %3641 = vmatprep.mubr.bf16.mxu0 %v7878_v36 }
 0x4c6   : > { %3642 = vmatmul.mubr.bf16.gmra.mrb[88].mxu0 %v3439_v23 }
 0x4c7   : > { %3651 = vmatprep.mubr.bf16.mxu0 %v7878_v36 }
 0x4ce   : > { %3652 = vmatmul.mubr.bf16.gmra.mrb[92].mxu0 %v3440_v29 }
 0x569   : > { %v3583_v28 = vpop.f32.mrb[64].mxu0 }
 0x56a   : > { %v7360_v33 = vadd.f32 %v3583_v28, %v7355_v13  ;;  %v3585_v24 = vpop.f32.mrb[65].mxu0 }
 0x56b   : > { %v7363_v36 = vadd.f32 %v3585_v24, %v7357_v46  ;;  %v3587_v27 = vpop.f32.mrb[66].mxu0 }
 0x56c   : > { %v7366_v45 = vadd.f32 %v3587_v27, %v7355_v13  ;;  %v3589_v16 = vpop.f32.mrb[67].mxu0 }
 0x56d   : > { %v3662_v5 = vmax.f32 %v7360_v33, %v7363_v36  ;;  %v7371_v11 = vadd.f32 %v3589_v16, %v7357_v46 }
 0x56f   : > { %v3665_v1 = vmax.f32 %v7366_v45, %v7371_v11  ;;  %3663 = vmax.xlane.f32.xlu1 %v3662_v5 }
 0x571   : > { %v3593_v48 = vpop.f32.mrb[68].mxu0  ;;  %3666 = vmax.xlane.f32.xlu0 %v3665_v1 }
 0x572   : > { %v7376_v10 = vadd.f32 %v3593_v48, %v7355_v13  ;;  %v3595_v38 = vpop.f32.mrb[69].mxu0 }
 0x573   : > { %v7379_v21 = vadd.f32 %v3595_v38, %v7357_v46  ;;  %v3597_v17 = vpop.f32.mrb[70].mxu0 }
 0x574   : > { %v7382_v2 = vadd.f32 %v3597_v17, %v7355_v13  ;;  %v3599_v12 = vpop.f32.mrb[71].mxu0 }
 0x575   : > { %v3668_v59 = vmax.f32 %v7376_v10, %v7379_v21  ;;  %v7387_v55 = vadd.f32 %v3599_v12, %v7357_v46 }
 0x577   : > { %v3671_v42 = vmax.f32 %v7382_v2, %v7387_v55  ;;  %3669 = vmax.xlane.f32.xlu0 %v3668_v59 }
 0x579   : > { %v3603_v30 = vpop.f32.mrb[72].mxu0  ;;  %3672 = vmax.xlane.f32.xlu1 %v3671_v42 }
 0x57a   : > { %v7392_v18 = vadd.f32 %v3603_v30, %v7355_v13  ;;  %v3605_v60 = vpop.f32.mrb[73].mxu0 }
 0x57b   : > { %v7395_v44 = vadd.f32 %v3605_v60, %v7357_v46  ;;  %v3607_v4 = vpop.f32.mrb[74].mxu0 }
 0x57c   : > { %v7398_v19 = vadd.f32 %v3607_v4, %v7355_v13  ;;  %v3609_v53 = vpop.f32.mrb[75].mxu0 }
 0x57d   : > { %v3674_v6 = vmax.f32 %v7392_v18, %v7395_v44  ;;  %v7403_v14 = vadd.f32 %v3609_v53, %v7357_v46 }
 0x57f   : > { %v3677_v31 = vmax.f32 %v7398_v19, %v7403_v14  ;;  %3675 = vmax.xlane.f32.xlu0 %v3674_v6 }
 0x581   : > { %v3613_v61 = vpop.f32.mrb[76].mxu0  ;;  %3678 = vmax.xlane.f32.xlu1 %v3677_v31 }
 0x582   : > { %v7408_v47 = vadd.f32 %v3613_v61, %v7355_v13  ;;  %v3615_v49 = vpop.f32.mrb[77].mxu0 }
 0x583   : > { %v7411_v9 = vadd.f32 %v3615_v49, %v7357_v46  ;;  %v3617_v0 = vpop.f32.mrb[78].mxu0 }
 0x584   : > { %v7414_v50 = vadd.f32 %v3617_v0, %v7355_v13  ;;  %v3619_v39 = vpop.f32.mrb[79].mxu0 }
 0x585   : > { %v3680_v56 = vmax.f32 %v7408_v47, %v7411_v9  ;;  %v7419_v35 = vadd.f32 %v3619_v39, %v7357_v46 }
 0x587   : > { %v3683_v26 = vmax.f32 %v7414_v50, %v7419_v35  ;;  %3681 = vmax.xlane.f32.xlu0 %v3680_v56 }
 0x589   : > { %v3623_v40 = vpop.f32.mrb[80].mxu0  ;;  %3684 = vmax.xlane.f32.xlu1 %v3683_v26 }
 0x58a   : > { %v7424_v63 = vadd.f32 %v3623_v40, %v7355_v13  ;;  %v3625_v15 = vpop.f32.mrb[81].mxu0 }
 0x58b   : > { %v7427_v22 = vadd.f32 %v3625_v15, %v7357_v46  ;;  %v3627_v58 = vpop.f32.mrb[82].mxu0 }
 0x58c   : > { %v7430_v8 = vadd.f32 %v3627_v58, %v7355_v13  ;;  %v3629_v34 = vpop.f32.mrb[83].mxu0 }
 0x58d   : > { %v3686_v3 = vmax.f32 %v7424_v63, %v7427_v22  ;;  %v7435_v43 = vadd.f32 %v3629_v34, %v7357_v46 }
 0x58f   : > { %v3689_v41 = vmax.f32 %v7430_v8, %v7435_v43  ;;  %3687 = vmax.xlane.f32.xlu0 %v3686_v3 }
 0x591   : > { %v3633_v52 = vpop.f32.mrb[84].mxu0  ;;  %3690 = vmax.xlane.f32.xlu1 %v3689_v41 }
 0x592   : > { %v7440_v62 = vadd.f32 %v3633_v52, %v7355_v13  ;;  %v3635_v54 = vpop.f32.mrb[85].mxu0 }
 0x593   : > { %v7443_v7 = vadd.f32 %v3635_v54, %v7357_v46  ;;  %v3637_v57 = vpop.f32.mrb[86].mxu0 }
 0x594   : > { %v7446_v29 = vadd.f32 %v3637_v57, %v7355_v13  ;;  %v3639_v23 = vpop.f32.mrb[87].mxu0 }
 0x595   : > { %v3692_v25 = vmax.f32 %v7440_v62, %v7443_v7  ;;  %v7451_v37 = vadd.f32 %v3639_v23, %v7357_v46 }
 0x597   : > { %v3695_v51 = vmax.f32 %v7446_v29, %v7451_v37  ;;  %3693 = vmax.xlane.f32.xlu0 %v3692_v25 }
 0x599   : > { %3696 = vmax.xlane.f32.xlu1 %v3695_v51  ;;  %v3643_v32 = vpop.f32.mrb[88].mxu0 }
 0x59a   : > { %v7456_v20 = vadd.f32 %v3643_v32, %v7355_v13  ;;  %v3645_v28 = vpop.f32.mrb[89].mxu0 }
 0x59b   : > { %v7459_v24 = vadd.f32 %v3645_v28, %v7357_v46  ;;  %v3647_v27 = vpop.f32.mrb[90].mxu0 }
 0x59c   : > { %v7462_v16 = vadd.f32 %v3647_v27, %v7355_v13  ;;  %v3649_v5 = vpop.f32.mrb[91].mxu0 }
 0x59d   : > { %v3698_v1 = vmax.f32 %v7456_v20, %v7459_v24  ;;  %v7467_v48 = vadd.f32 %v3649_v5, %v7357_v46 }
 0x59f   : > { %v3701_v38 = vmax.f32 %v7462_v16, %v7467_v48  ;;  %3699 = vmax.xlane.f32.xlu0 %v3698_v1 }
 0x5a1   : > { %v3653_v17 = vpop.f32.mrb[92].mxu0  ;;  %3702 = vmax.xlane.f32.xlu1 %v3701_v38 }
 0x5a2   : > { %v7472_v12 = vadd.f32 %v3653_v17, %v7355_v13  ;;  %v3655_v59 = vpop.f32.mrb[93].mxu0 }
 0x5a3   : > { %v7475_v42 = vadd.f32 %v3655_v59, %v7357_v46  ;;  %v3657_v30 = vpop.f32.mrb[94].mxu0 }
 0x5a4   : > { %v7478_v60 = vadd.f32 %v3657_v30, %v7355_v13  ;;  %v3659_v4 = vpop.f32.mrb[95].mxu0 }
 0x5a5   : > { %v3704_v53 = vmax.f32 %v7472_v12, %v7475_v42  ;;  %v7483_v6 = vadd.f32 %v3659_v4, %v7357_v46 }
 0x5a7   : > { %v3707_v31 = vmax.f32 %v7478_v60, %v7483_v6  ;;  %3705 = vmax.xlane.f32.xlu0 %v3704_v53 }
 0x5a9   : > { %3708 = vmax.xlane.f32.xlu1 %v3707_v31 }
 0x5fc   : > { %v3664_v61 = vpop.xlane.xlu1 %3663 }
 0x5fd   : > { %v7488_v49 = vsub.f32 %v7360_v33, %v3664_v61  ;;  %v7491_v0 = vsub.f32 %v7363_v36, %v3664_v61 }
 0x5fe   : > { %v3667_v13 = vpop.xlane.xlu0 %3666 }
 0x5ff   : > { %v3742_v39 = vmul.f32 1.442695, %v7488_v49  ;;  %v3744_v56 = vmul.f32 1.442695, %v7491_v0  ;;  %v7496_v46 = vsub.f32 %v7366_v45, %v3667_v13  ;;  %v7499_v26 = vsub.f32 %v7371_v11, %v3667_v13 }
 0x601   : > { %5403 = vpow2.f32 %v3742_v39  ;;  %v3746_v40 = vmul.f32 1.442695, %v7496_v46  ;;  %v3748_v33 = vmul.f32 1.442695, %v7499_v26 }
 0x602   : > { %5405 = vpow2.f32 %v3744_v56 }
 0x603   : > { %5407 = vpow2.f32 %v3746_v40 }
 0x604   : > { %5409 = vpow2.f32 %v3748_v33  ;;  %v3670_v36 = vpop.xlane.xlu0 %3669 }
 0x605   : > { %v7504_v15 = vsub.f32 %v7376_v10, %v3670_v36  ;;  %v7507_v58 = vsub.f32 %v7379_v21, %v3670_v36 }
 0x606   : > { %v3673_v45 = vpop.xlane.xlu1 %3672 }
 0x607   : > { %v3750_v34 = vmul.f32 1.442695, %v7504_v15  ;;  %v3752_v11 = vmul.f32 1.442695, %v7507_v58  ;;  %v7512_v3 = vsub.f32 %v7382_v2, %v3673_v45  ;;  %v7515_v41 = vsub.f32 %v7387_v55, %v3673_v45 }
 0x609   : > { %5411 = vpow2.f32 %v3750_v34  ;;  %v3754_v52 = vmul.f32 1.442695, %v7512_v3  ;;  %v3756_v10 = vmul.f32 1.442695, %v7515_v41 }
 0x60a   : > { %5413 = vpow2.f32 %v3752_v11 }
 0x60b   : > { %v5404_v54 = vpop.eup %5403  ;;  %5415 = vpow2.f32 %v3754_v52 }
 0x60c   : > { %v5406_v21 = vpop.eup %5405  ;;  %5417 = vpow2.f32 %v3756_v10  ;;  %v3676_v57 = vpop.xlane.xlu0 %3675 }
 0x60d   : > { %v5408_v23 = vpop.eup %5407  ;;  %v7520_v25 = vsub.f32 %v7392_v18, %v3676_v57  ;;  %v7523_v2 = vsub.f32 %v7395_v44, %v3676_v57  ;;  %v3806_v55 = vadd.f32 %v5406_v21, %v5404_v54 }
 0x60e   : > { %v5410_v51 = vpop.eup %5409  ;;  %v3679_v32 = vpop.xlane.xlu1 %3678 }
 0x60f   : > { %v3758_v28 = vmul.f32 1.442695, %v7520_v25  ;;  %v3760_v27 = vmul.f32 1.442695, %v7523_v2  ;;  %v7528_v5 = vsub.f32 %v7398_v19, %v3679_v32  ;;  %v7531_v1 = vsub.f32 %v7403_v14, %v3679_v32  ;;  %3807 = vadd.xlane.f32.xlu0 %v3806_v55 }
 0x610   : > { %v3809_v38 = vadd.f32 %v5410_v51, %v5408_v23 }
 0x611   : > { %5419 = vpow2.f32 %v3758_v28  ;;  %v3762_v18 = vmul.f32 1.442695, %v7528_v5  ;;  %v3764_v44 = vmul.f32 1.442695, %v7531_v1 }
 0x612   : > { %5421 = vpow2.f32 %v3760_v27  ;;  %3810 = vadd.xlane.f32.xlu1 %v3809_v38 }
 0x613   : > { %v5412_v17 = vpop.eup %5411  ;;  %5423 = vpow2.f32 %v3762_v18 }
 0x614   : > { %v5414_v59 = vpop.eup %5413  ;;  %5425 = vpow2.f32 %v3764_v44  ;;  %v3682_v30 = vpop.xlane.xlu0 %3681 }
 0x615   : > { %v5416_v4 = vpop.eup %5415  ;;  %v7536_v19 = vsub.f32 %v7408_v47, %v3682_v30  ;;  %v7539_v14 = vsub.f32 %v7411_v9, %v3682_v30  ;;  %v3812_v53 = vadd.f32 %v5414_v59, %v5412_v17 }
 0x616   : > { %v5418_v31 = vpop.eup %5417  ;;  %v3685_v61 = vpop.xlane.xlu1 %3684 }
 0x617   : > { %v3766_v13 = vmul.f32 1.442695, %v7536_v19  ;;  %v3768_v39 = vmul.f32 1.442695, %v7539_v14  ;;  %v7544_v56 = vsub.f32 %v7414_v50, %v3685_v61  ;;  %v7547_v40 = vsub.f32 %v7419_v35, %v3685_v61  ;;  %3813 = vadd.xlane.f32.xlu0 %v3812_v53 }
 0x618   : > { %v3815_v33 = vadd.f32 %v5418_v31, %v5416_v4 }
 0x619   : > { %5427 = vpow2.f32 %v3766_v13  ;;  %v3770_v47 = vmul.f32 1.442695, %v7544_v56  ;;  %v3772_v9 = vmul.f32 1.442695, %v7547_v40 }
 0x61a   : > { %5429 = vpow2.f32 %v3768_v39  ;;  %3816 = vadd.xlane.f32.xlu1 %v3815_v33 }
 0x61b   : > { %v5420_v36 = vpop.eup %5419  ;;  %5431 = vpow2.f32 %v3770_v47 }
 0x61c   : > { %v5422_v45 = vpop.eup %5421  ;;  %5433 = vpow2.f32 %v3772_v9  ;;  %v3688_v34 = vpop.xlane.xlu0 %3687 }
 0x61d   : > { %v5424_v11 = vpop.eup %5423  ;;  %v7552_v50 = vsub.f32 %v7424_v63, %v3688_v34  ;;  %v7555_v35 = vsub.f32 %v7427_v22, %v3688_v34  ;;  %v3818_v52 = vadd.f32 %v5422_v45, %v5420_v36 }
 0x61e   : > { %v5426_v10 = vpop.eup %5425  ;;  %v3691_v54 = vpop.xlane.xlu1 %3690 }
 0x61f   : > { %v3774_v21 = vmul.f32 1.442695, %v7552_v50  ;;  %v3776_v57 = vmul.f32 1.442695, %v7555_v35  ;;  %v7560_v23 = vsub.f32 %v7430_v8, %v3691_v54  ;;  %v7563_v55 = vsub.f32 %v7435_v43, %v3691_v54  ;;  %3819 = vadd.xlane.f32.xlu0 %v3818_v52 }
 0x620   : > { %v3821_v51 = vadd.f32 %v5426_v10, %v5424_v11 }
 0x621   : > { %5435 = vpow2.f32 %v3774_v21  ;;  %v3778_v63 = vmul.f32 1.442695, %v7560_v23  ;;  %v3780_v22 = vmul.f32 1.442695, %v7563_v55 }
 0x622   : > { %5437 = vpow2.f32 %v3776_v57  ;;  %3822 = vadd.xlane.f32.xlu1 %v3821_v51 }
 0x623   : > { %v5428_v32 = vpop.eup %5427  ;;  %5439 = vpow2.f32 %v3778_v63 }
 0x624   : > { %v5430_v28 = vpop.eup %5429  ;;  %5441 = vpow2.f32 %v3780_v22  ;;  %v3694_v27 = vpop.xlane.xlu0 %3693 }
 0x625   : > { %v5432_v38 = vpop.eup %5431  ;;  %v7568_v8 = vsub.f32 %v7440_v62, %v3694_v27  ;;  %v7571_v43 = vsub.f32 %v7443_v7, %v3694_v27  ;;  %v3824_v18 = vadd.f32 %v5430_v28, %v5428_v32 }
 0x626   : > { %v5434_v44 = vpop.eup %5433  ;;  %v3697_v17 = vpop.xlane.xlu1 %3696 }
 0x627   : > { %v3782_v59 = vmul.f32 1.442695, %v7568_v8  ;;  %v3784_v30 = vmul.f32 1.442695, %v7571_v43  ;;  %v7576_v4 = vsub.f32 %v7446_v29, %v3697_v17  ;;  %v7579_v53 = vsub.f32 %v7451_v37, %v3697_v17  ;;  %3825 = vadd.xlane.f32.xlu0 %v3824_v18 }
 0x628   : > { %v3827_v31 = vadd.f32 %v5434_v44, %v5432_v38 }
 0x629   : > { %5443 = vpow2.f32 %v3782_v59  ;;  %v3786_v62 = vmul.f32 1.442695, %v7576_v4  ;;  %v3788_v7 = vmul.f32 1.442695, %v7579_v53 }
 0x62a   : > { %5445 = vpow2.f32 %v3784_v30  ;;  %3828 = vadd.xlane.f32.xlu1 %v3827_v31 }
 0x62b   : > { %v5436_v61 = vpop.eup %5435  ;;  %5447 = vpow2.f32 %v3786_v62 }
 0x62c   : > { %v5438_v13 = vpop.eup %5437  ;;  %5449 = vpow2.f32 %v3788_v7  ;;  %v3700_v39 = vpop.xlane.xlu0 %3699 }
 0x62d   : > { %v5440_v33 = vpop.eup %5439  ;;  %v7584_v29 = vsub.f32 %v7456_v20, %v3700_v39  ;;  %v7587_v37 = vsub.f32 %v7459_v24, %v3700_v39  ;;  %v3830_v47 = vadd.f32 %v5438_v13, %v5436_v61 }
 0x62e   : > { %v5442_v9 = vpop.eup %5441  ;;  %v3703_v36 = vpop.xlane.xlu1 %3702 }
 0x62f   : > { %v3790_v45 = vmul.f32 1.442695, %v7584_v29  ;;  %v3792_v34 = vmul.f32 1.442695, %v7587_v37  ;;  %v7592_v11 = vsub.f32 %v7462_v16, %v3703_v36  ;;  %v7595_v52 = vsub.f32 %v7467_v48, %v3703_v36  ;;  %3831 = vadd.xlane.f32.xlu0 %v3830_v47 }
 0x630   : > { %v3833_v10 = vadd.f32 %v5442_v9, %v5440_v33 }
 0x631   : > { %5451 = vpow2.f32 %v3790_v45  ;;  %v3794_v20 = vmul.f32 1.442695, %v7592_v11  ;;  %v3796_v24 = vmul.f32 1.442695, %v7595_v52 }
 0x632   : > { %5453 = vpow2.f32 %v3792_v34  ;;  %3834 = vadd.xlane.f32.xlu1 %v3833_v10 }
 0x633   : > { %v5444_v54 = vpop.eup %5443  ;;  %5455 = vpow2.f32 %v3794_v20 }
 0x634   : > { %v5446_v21 = vpop.eup %5445  ;;  %5457 = vpow2.f32 %v3796_v24  ;;  %v3706_v57 = vpop.xlane.xlu0 %3705 }
 0x635   : > { %v5448_v51 = vpop.eup %5447  ;;  %v7600_v16 = vsub.f32 %v7472_v12, %v3706_v57  ;;  %v7603_v48 = vsub.f32 %v7475_v42, %v3706_v57  ;;  %v3836_v63 = vadd.f32 %v5446_v21, %v5444_v54 }
 0x636   : > { %v5450_v22 = vpop.eup %5449  ;;  %v3709_v32 = vpop.xlane.xlu1 %3708 }
 0x637   : > { %v3798_v28 = vmul.f32 1.442695, %v7600_v16  ;;  %v3800_v27 = vmul.f32 1.442695, %v7603_v48  ;;  %v7608_v38 = vsub.f32 %v7478_v60, %v3709_v32  ;;  %v7611_v18 = vsub.f32 %v7483_v6, %v3709_v32  ;;  %3837 = vadd.xlane.f32.xlu0 %v3836_v63 }
 0x638   : > { %v3839_v44 = vadd.f32 %v5450_v22, %v5448_v51 }
 0x639   : > { %5459 = vpow2.f32 %v3798_v28  ;;  %v3802_v12 = vmul.f32 1.442695, %v7608_v38  ;;  %v3804_v42 = vmul.f32 1.442695, %v7611_v18 }
 0x63a   : > { %5461 = vpow2.f32 %v3800_v27  ;;  %3840 = vadd.xlane.f32.xlu1 %v3839_v44 }
 0x63b   : > { %v5452_v17 = vpop.eup %5451  ;;  %5463 = vpow2.f32 %v3802_v12 }
 0x63c   : > { %v5454_v59 = vpop.eup %5453  ;;  %5465 = vpow2.f32 %v3804_v42 }
 0x63d   : > { %v5456_v30 = vpop.eup %5455  ;;  %v3842_v31 = vadd.f32 %v5454_v59, %v5452_v17 }
 0x63e   : > { %v5458_v60 = vpop.eup %5457 }
 0x63f   : > { %3843 = vadd.xlane.f32.xlu0 %v3842_v31  ;;  %v3845_v6 = vadd.f32 %v5458_v60, %v5456_v30 }
 0x641   : > { %3846 = vadd.xlane.f32.xlu1 %v3845_v6 }
 0x643   : > { %v5460_v62 = vpop.eup %5459 }
 0x644   : > { %v5462_v7 = vpop.eup %5461 }
 0x645   : > { %v5464_v61 = vpop.eup %5463  ;;  %v3848_v13 = vadd.f32 %v5462_v7, %v5460_v62 }
 0x646   : > { %v5466_v39 = vpop.eup %5465 }
 0x647   : > { %3849 = vadd.xlane.f32.xlu0 %v3848_v13  ;;  %v3851_v33 = vadd.f32 %v5466_v39, %v5464_v61 }
 0x649   : > { %3852 = vadd.xlane.f32.xlu1 %v3851_v33 }
 0x69c   : > { %v3808_v47 = vpop.xlane.xlu0 %3807 }
 0x69d   : > { %5467 = vlog2.f32 %v3808_v47 }
 0x69f   : > { %v3811_v9 = vpop.xlane.xlu1 %3810 }
 0x6a0   : > { %5469 = vlog2.f32 %v3811_v9 }
 0x6a4   : > { %v3814_v36 = vpop.xlane.xlu0 %3813 }
 0x6a5   : > { %5471 = vlog2.f32 %v3814_v36 }
 0x6a7   : > { %v5468_v45 = vpop.eup %5467  ;;  %v3817_v34 = vpop.xlane.xlu1 %3816 }
 0x6a8   : > { %v3855_v10 = vmul.f32 0.6931472, %v5468_v45  ;;  %5473 = vlog2.f32 %v3817_v34 }
 0x6aa   : > { %v5470_v20 = vpop.eup %5469  ;;  %v3886_v24 = vsub.f32 %v7488_v49, %v3855_v10  ;;  %v3887_v54 = vsub.f32 %v7491_v0, %v3855_v10 }
 0x6ab   : > { %v3857_v21 = vmul.f32 0.6931472, %v5470_v20 }
 0x6ac   : > { %3918 = vst [vmem:[%s7620_s15] sm:$0xff] %v3886_v24  ;;  %3919 = vst [vmem:[%s7620_s15 + $0x8] sm:$0xff] %v3887_v54  ;;  %v3820_v57 = vpop.xlane.xlu0 %3819 }
 0x6ad   : > { %v3888_v51 = vsub.f32 %v7496_v46, %v3857_v21  ;;  %v3889_v63 = vsub.f32 %v7499_v26, %v3857_v21  ;;  %5475 = vlog2.f32 %v3820_v57 }
 0x6af   : > { %v5472_v49 = vpop.eup %5471  ;;  %3920 = vst [vmem:[%s7620_s15 + $0x10] sm:$0xff] %v3888_v51  ;;  %3921 = vst [vmem:[%s7620_s15 + $0x18] sm:$0xff] %v3889_v63  ;;  %v3823_v0 = vpop.xlane.xlu1 %3822 }
 0x6b0   : > { %v3859_v22 = vmul.f32 0.6931472, %v5472_v49  ;;  %5477 = vlog2.f32 %v3823_v0 }
 0x6b2   : > { %v5474_v32 = vpop.eup %5473  ;;  %v3890_v28 = vsub.f32 %v7504_v15, %v3859_v22  ;;  %v3891_v27 = vsub.f32 %v7507_v58, %v3859_v22 }
 0x6b3   : > { %v3861_v44 = vmul.f32 0.6931472, %v5474_v32 }
 0x6b4   : > { %3922 = vst [vmem:[%s7620_s15 + $0x20] sm:$0xff] %v3890_v28  ;;  %3923 = vst [vmem:[%s7620_s15 + $0x28] sm:$0xff] %v3891_v27  ;;  %v3826_v46 = vpop.xlane.xlu0 %3825 }
 0x6b5   : > { %v3892_v26 = vsub.f32 %v7512_v3, %v3861_v44  ;;  %v3893_v12 = vsub.f32 %v7515_v41, %v3861_v44  ;;  %5479 = vlog2.f32 %v3826_v46 }
 0x6b7   : > { %v5476_v42 = vpop.eup %5475  ;;  %3924 = vst [vmem:[%s7620_s15 + $0x30] sm:$0xff] %v3892_v26  ;;  %3925 = vst [vmem:[%s7620_s15 + $0x38] sm:$0xff] %v3893_v12  ;;  %v3829_v17 = vpop.xlane.xlu1 %3828 }
 0x6b8   : > { %v3863_v15 = vmul.f32 0.6931472, %v5476_v42  ;;  %5481 = vlog2.f32 %v3829_v17 }
 0x6ba   : > { %v5478_v58 = vpop.eup %5477  ;;  %v3894_v59 = vsub.f32 %v7520_v25, %v3863_v15  ;;  %v3895_v30 = vsub.f32 %v7523_v2, %v3863_v15 }
 0x6bb   : > { %v3865_v31 = vmul.f32 0.6931472, %v5478_v58 }
 0x6bc   : > { %3926 = vst [vmem:[%s7620_s15 + $0x40] sm:$0xff] %v3894_v59  ;;  %3927 = vst [vmem:[%s7620_s15 + $0x48] sm:$0xff] %v3895_v30  ;;  %v3832_v3 = vpop.xlane.xlu0 %3831 }
 0x6bd   : > { %v3896_v41 = vsub.f32 %v7528_v5, %v3865_v31  ;;  %v3897_v60 = vsub.f32 %v7531_v1, %v3865_v31  ;;  %5483 = vlog2.f32 %v3832_v3 }
 0x6bf   : > { %v5480_v6 = vpop.eup %5479  ;;  %3928 = vst [vmem:[%s7620_s15 + $0x50] sm:$0xff] %v3896_v41  ;;  %3929 = vst [vmem:[%s7620_s15 + $0x58] sm:$0xff] %v3897_v60  ;;  %v3835_v62 = vpop.xlane.xlu1 %3834 }
 0x6c0   : > { %v3867_v25 = vmul.f32 0.6931472, %v5480_v6  ;;  %5485 = vlog2.f32 %v3835_v62 }
 0x6c2   : > { %v5482_v2 = vpop.eup %5481  ;;  %v3898_v7 = vsub.f32 %v7536_v19, %v3867_v25  ;;  %v3899_v61 = vsub.f32 %v7539_v14, %v3867_v25 }
 0x6c3   : > { %v3869_v13 = vmul.f32 0.6931472, %v5482_v2 }
 0x6c4   : > { %3930 = vst [vmem:[%s7620_s15 + $0x60] sm:$0xff] %v3898_v7  ;;  %3931 = vst [vmem:[%s7620_s15 + $0x68] sm:$0xff] %v3899_v61  ;;  %v3838_v5 = vpop.xlane.xlu0 %3837 }
 0x6c5   : > { %v3900_v1 = vsub.f32 %v7544_v56, %v3869_v13  ;;  %v3901_v39 = vsub.f32 %v7547_v40, %v3869_v13  ;;  %5487 = vlog2.f32 %v3838_v5 }
 0x6c7   : > { %v5484_v33 = vpop.eup %5483  ;;  %3932 = vst [vmem:[%s7620_s15 + $0x70] sm:$0xff] %v3900_v1  ;;  %3933 = vst [vmem:[%s7620_s15 + $0x78] sm:$0xff] %v3901_v39  ;;  %v3841_v47 = vpop.xlane.xlu1 %3840 }
 0x6c8   : > { %v3871_v19 = vmul.f32 0.6931472, %v5484_v33  ;;  %5489 = vlog2.f32 %v3841_v47 }
 0x6ca   : > { %v5486_v14 = vpop.eup %5485  ;;  %v3902_v9 = vsub.f32 %v7552_v50, %v3871_v19  ;;  %v3903_v36 = vsub.f32 %v7555_v35, %v3871_v19 }
 0x6cb   : > { %v3873_v45 = vmul.f32 0.6931472, %v5486_v14 }
 0x6cc   : > { %3934 = vst [vmem:[%s7620_s15 + $0x80] sm:$0xff] %v3902_v9  ;;  %3935 = vst [vmem:[%s7620_s15 + $0x88] sm:$0xff] %v3903_v36  ;;  %v3844_v56 = vpop.xlane.xlu0 %3843 }
 0x6cd   : > { %v3904_v40 = vsub.f32 %v7560_v23, %v3873_v45  ;;  %v3905_v34 = vsub.f32 %v7563_v55, %v3873_v45  ;;  %5491 = vlog2.f32 %v3844_v56 }
 0x6ce   : > { %v3847_v10 = vpop.xlane.xlu1 %3846 }
 0x6cf   : > { %v5488_v20 = vpop.eup %5487  ;;  %3936 = vst [vmem:[%s7620_s15 + $0x90] sm:$0xff] %v3904_v40  ;;  %3937 = vst [vmem:[%s7620_s15 + $0x98] sm:$0xff] %v3905_v34  ;;  %5493 = vlog2.f32 %v3847_v10 }
 0x6d0   : > { %v3875_v50 = vmul.f32 0.6931472, %v5488_v20 }
 0x6d2   : > { %v5490_v35 = vpop.eup %5489  ;;  %v3906_v24 = vsub.f32 %v7568_v8, %v3875_v50  ;;  %v3907_v54 = vsub.f32 %v7571_v43, %v3875_v50 }
 0x6d3   : > { %v3877_v21 = vmul.f32 0.6931472, %v5490_v35 }
 0x6d4   : > { %3938 = vst [vmem:[%s7620_s15 + $0xa0] sm:$0xff] %v3906_v24  ;;  %3939 = vst [vmem:[%s7620_s15 + $0xa8] sm:$0xff] %v3907_v54  ;;  %v3850_v23 = vpop.xlane.xlu0 %3849 }
 0x6d5   : > { %v3908_v55 = vsub.f32 %v7576_v4, %v3877_v21  ;;  %v3909_v57 = vsub.f32 %v7579_v53, %v3877_v21  ;;  %5495 = vlog2.f32 %v3850_v23 }
 0x6d6   : > { %v3853_v51 = vpop.xlane.xlu1 %3852 }
 0x6d7   : > { %v5492_v63 = vpop.eup %5491  ;;  %3940 = vst [vmem:[%s7620_s15 + $0xb0] sm:$0xff] %v3908_v55  ;;  %3941 = vst [vmem:[%s7620_s15 + $0xb8] sm:$0xff] %v3909_v57  ;;  %5497 = vlog2.f32 %v3853_v51 }
 0x6d8   : > { %v3879_v8 = vmul.f32 0.6931472, %v5492_v63 }
 0x6d9   : > { %v5494_v43 = vpop.eup %5493 }
 0x6da   : > { %v3910_v49 = vsub.f32 %v7584_v29, %v3879_v8  ;;  %v3911_v0 = vsub.f32 %v7587_v37, %v3879_v8  ;;  %v3881_v22 = vmul.f32 0.6931472, %v5494_v43 }
 0x6dc   : > { %3942 = vst [vmem:[%s7620_s15 + $0xc0] sm:$0xff] %v3910_v49  ;;  %3943 = vst [vmem:[%s7620_s15 + $0xc8] sm:$0xff] %v3911_v0  ;;  %v3912_v4 = vsub.f32 %v7592_v11, %v3881_v22  ;;  %v3913_v53 = vsub.f32 %v7595_v52, %v3881_v22 }
 0x6de   : > { %3944 = vst [vmem:[%s7620_s15 + $0xd0] sm:$0xff] %v3912_v4  ;;  %3945 = vst [vmem:[%s7620_s15 + $0xd8] sm:$0xff] %v3913_v53 }
 0x6df   : > { %v5496_v32 = vpop.eup %5495 }
 0x6e0   : > { %v3883_v28 = vmul.f32 0.6931472, %v5496_v32 }
 0x6e1   : > { %v5498_v29 = vpop.eup %5497 }
 0x6e2   : > { %v3914_v37 = vsub.f32 %v7600_v16, %v3883_v28  ;;  %v3915_v27 = vsub.f32 %v7603_v48, %v3883_v28  ;;  %v3885_v44 = vmul.f32 0.6931472, %v5498_v29 }
 0x6e4   : > { %3946 = vst [vmem:[%s7620_s15 + $0xe0] sm:$0xff] %v3914_v37  ;;  %3947 = vst [vmem:[%s7620_s15 + $0xe8] sm:$0xff] %v3915_v27  ;;  %v3916_v11 = vsub.f32 %v7608_v38, %v3885_v44  ;;  %v3917_v52 = vsub.f32 %v7611_v18, %v3885_v44 }
 0x6e6   : > { %3948 = vst [vmem:[%s7620_s15 + $0xf0] sm:$0xff] %v3916_v11  ;;  %3949 = vst [vmem:[%s7620_s15 + $0xf8] sm:$0xff] %v3917_v52 }
 0x6e7   : > { %5559 = shalt.err (!%p5556_p3)
}
 0x6e8   : > { %s5560_s11 = scalar_lea.hbm %s7683_s20, 4096  ;;  %s5564_s13 = scalar_lea.hbm %s7742_s6, 32768 }
 0x6e9   : > { %p5561_p4 = scmp.ne.s32.totalorder %s7683_s20, %s5560_s11  ;;  %p5565_p9 = scmp.lt.u32.totalorder %s7683_s20, %s7742_s6 }
 0x6ea   : > { %p5566_p10 = scmp.lt.u32.totalorder %s5564_s13, %s5560_s11  ;;  %p5568_p12 = scmp.lt.u32.totalorder %s5560_s11, %s7683_s20 }
 0x6eb   : > { %p5562_p7 = pnand %p5561_p4, %p5695_p5 }
 0x6ec   : > { %p5567_p11 = por %p5566_p10, %p5565_p9 }
 0x6ed   : > { %p5563_p8 = pneg %p5562_p7 }
 0x6ee   : > { %p5569_p13 = por %p5568_p12, %p5567_p11 }
 0x6f0   : > { %p5570_p0 = pnand %p5569_p13, %p5563_p8 }
 0x6f2   : > { %5573 = shalt.err (!%p5570_p0)
}
 0x6f3   : > { %s5620_s16 = smov 256   ;;  %s5621_s18 = smov 16  }
 0x6f4   : > { %5259 = dma.vmem_to_hbm [thread:$0]  (%p5695_p5), %s7685_s17, 4096, %s7683_s20, %s7695_s25, %s5620_s16, %s5620_s16, %s5621_s18  }
 0x6f5 PF: > { %p5265_p1 = scmp.ge.s32.totalorder %s5608_s24, 2  ;;  %s3980_s19 = sand.u32 1, %s5596_s21  }
 0x6f6   : > { %s3981_s28 = scalar_lea.sflag [#allocation3], %s3980_s19 }
 0x6f7   : > { %p5262_p2 = pnand %p5265_p1, %p5699_p6 }
 0x6f9   : > { %5591 = dma.done.wait (!%p5262_p2), %s3981_s28, 4096  }
 0x6fa   : > { %5593 = vsyncadd (!%p5262_p2), %s3981_s28, 4294963200  ;;  %p16_p3 = scmp.ge.s32.totalorder %s5682_s27, 10   ;;  %s7880_s21 = smov %s5600_s22 }
 0x6fb   : > { %s7881_s22 = smov %s5604_s23  ;;  %s7882_s23 = smov %s5693_s30 }
 0x6fc   : > { %s7883_s24 = smov %s5682_s27  ;;  %18 = sbr.rel (!%p16_p3) target bundleno = 3 (0x3), region = 79 }
 0x703   :  { %3986 = vsyncpa [#allocation3], 1 }
 0x704   :  { %3988 = vsyncpa [#allocation3 + $0x1], 1 }

</bundles_post_ra>
